<compile_context>
chip_gen: v5e
topology: v5e:2x2
jax: 0.10.0
libtpu: 0.0.40
codegen_flags: <defaults>
</compile_context>

<pallas_src>
import functools

import jax
import jax.numpy as jnp
from jax import lax
from jax.experimental import pallas as pl
from jax.experimental.pallas import tpu as pltpu  # noqa: F401  (TPU backend)

# ---- model hyper-parameters (small, deterministic) ----
EMB = 32          # embedding_dim
HEAD = 4          # head_num
QKV = 8           # qkv_dim  (HEAD * QKV == EMB)
FF = 64           # ff_hidden_dim
LAYERS = 2        # encoder_layer_num
CLIP = 10.0       # logit_clipping
BN_EPS = 1e-5

BATCH = 2
PROBLEM = 8       # number of knapsack items
POMO = 8          # group size

_INV_SQRT_D = 1.0 / float(QKV) ** 0.5
_INV_SQRT_E = 1.0 / float(EMB) ** 0.5


# =======================  fused Pallas kernel  =======================

def _kp_fused_kernel(problems_ref, capacity_ref, mask_ref,
                     emb_w_ref, emb_b_ref,
                     wq_ref, wk_ref, wv_ref, wcomb_ref, bcomb_ref,
                     sc1_ref, sh1_ref, w1_ref, b1_ref, w2_ref, b2_ref,
                     sc2_ref, sh2_ref,
                     dwq_ref, dwq_cap_ref, dwk_ref, dwv_ref, dwcomb_ref, dbcomb_ref,
                     probs_ref, sel_ref, *, batch, problem, group):
    f32 = jnp.float32

    def mm(a, b):                          # plain MXU matmul
        return jnp.dot(a, b, preferred_element_type=f32)

    def mm_nt(a, b):                       # contract last dims: (n,d),(p,d)->(n,p)
        return lax.dot_general(a, b, (((1,), (1,)), ((), ())),
                               preferred_element_type=f32)

    def softmax_rows(s):                   # numerically-stable row softmax (lane axis)
        s = s - jnp.max(s, axis=-1, keepdims=True)
        e = jnp.exp(s)
        return e / jnp.sum(e, axis=-1, keepdims=True)

    # ---------------- encoder (per-batch; BN eval mode is a pure affine) ----------
    xs = [mm(problems_ref[b], emb_w_ref[...]) + emb_b_ref[...]          # each (P, E)
          for b in range(batch)]

    for l in range(LAYERS):
        nxt = []
        for b in range(batch):
            xb = xs[b]
            mh = jnp.zeros((problem, EMB), f32)
            for h in range(HEAD):
                q = mm(xb, wq_ref[l, h])                                # (P, D)
                k = mm(xb, wk_ref[l, h])
                v = mm(xb, wv_ref[l, h])
                w = softmax_rows(mm_nt(q, k) * _INV_SQRT_D)             # (P, P)
                mh = mh + mm(mm(w, v), wcomb_ref[l, h])                 # (P, E)
            mh = mh + bcomb_ref[l]
            out1 = (xb + mh) * sc1_ref[l] + sh1_ref[l]                  # Add&Norm 1
            hid = jnp.maximum(mm(out1, w1_ref[l]) + b1_ref[l], 0.0)     # (P, FF)
            ffo = mm(hid, w2_ref[l]) + b2_ref[l]                        # (P, E)
            nxt.append((out1 + ffo) * sc2_ref[l] + sh2_ref[l])          # Add&Norm 2
        xs = nxt

    # ---------------- decoder (set_kv + forward, argmax) --------------------------
    mean_w = jnp.full((1, problem), 1.0 / problem, f32)                 # graph mean
    for b in range(batch):
        enc_b = xs[b]                                                   # (P, E)
        graph = mm(mean_w, enc_b)                                       # (1, E)
        cap_b = capacity_ref[b]                                         # (G, 1)
        mask_b = mask_ref[b]                                            # (G, P)
        # NOTE: an all -inf mask row would yield NaN here, exactly as in the
        # PyTorch reference (reference semantics preserved).

        mh = jnp.zeros((group, EMB), f32)
        for h in range(HEAD):
            # q = Wq([graph | capacity]) split into graph-part + capacity rank-1 term
            q = mm(graph, dwq_ref[h]) + cap_b * dwq_cap_ref[h]          # (G, D)
            k = mm(enc_b, dwk_ref[h])                                   # (P, D)
            v = mm(enc_b, dwv_ref[h])
            w = softmax_rows(mm_nt(q, k) * _INV_SQRT_D + mask_b)        # (G, P)
            mh = mh + mm(mm(w, v), dwcomb_ref[h])                       # (G, E)
        mh = mh + dbcomb_ref[...]

        score = mm_nt(mh, enc_b) * _INV_SQRT_E                          # (G, P)
        probs_b = softmax_rows(CLIP * jnp.tanh(score) + mask_b)         # (G, P)
        probs_ref[b] = probs_b

        # argmax(dim=-1) as min-index-of-max (first occurrence, like torch/jnp)
        col = lax.broadcasted_iota(jnp.int32, (group, problem), 1).astype(f32)
        is_max = probs_b >= jnp.max(probs_b, axis=-1, keepdims=True)
        sel = jnp.min(jnp.where(is_max, col, float(problem)), axis=-1, keepdims=True)
        sel_ref[b] = sel.astype(jnp.int32)                              # (G, 1)


# =======================  host-side weight re-layout & wrapper  =======================

def _per_head_in(w):
    """(E_in, H*D) -> (H, E_in, D): per-head slices of an input-projection weight."""
    return w.reshape(w.shape[0], HEAD, QKV).transpose(1, 0, 2)


def _per_head_out(w):
    """(H*D, E) -> (H, D, E): per-head slices of the multi-head-combine weight."""
    return w.reshape(HEAD, QKV, EMB)


def _bn_fold(gamma, beta, run_mean, run_var):
    """BatchNorm1d eval mode -> per-channel scale/shift."""
    scale = gamma * lax.rsqrt(run_var + BN_EPS)
    return scale.reshape(1, EMB), (beta - run_mean * scale).reshape(1, EMB)


def kp_model_forward(problems, capacity, ninf_mask, params):
    """KPModel.pre_forward + forward (eval, eval_type='argmax') as one fused kernel."""
    B, Pn, _ = problems.shape
    G = capacity.shape[1]

    lyr = params['layers']
    wq = jnp.stack([_per_head_in(lp['Wq']) for lp in lyr])        # (L, H, E, D)
    wk = jnp.stack([_per_head_in(lp['Wk']) for lp in lyr])
    wv = jnp.stack([_per_head_in(lp['Wv']) for lp in lyr])
    wcomb = jnp.stack([_per_head_out(lp['Wcomb']) for lp in lyr])  # (L, H, D, E)
    bcomb = jnp.stack([lp['bcomb'].reshape(1, EMB) for lp in lyr])

    bn1 = [_bn_fold(lp['bn1_g'], lp['bn1_b'], lp['bn1_rm'], lp['bn1_rv']) for lp in lyr]
    bn2 = [_bn_fold(lp['bn2_g'], lp['bn2_b'], lp['bn2_rm'], lp['bn2_rv']) for lp in lyr]
    sc1 = jnp.stack([s for s, _ in bn1]); sh1 = jnp.stack([t for _, t in bn1])
    sc2 = jnp.stack([s for s, _ in bn2]); sh2 = jnp.stack([t for _, t in bn2])

    w1 = jnp.stack([lp['W1'] for lp in lyr])                      # (L, E, FF)
    b1 = jnp.stack([lp['b1'].reshape(1, FF) for lp in lyr])
    w2 = jnp.stack([lp['W2'] for lp in lyr])                      # (L, FF, E)
    b2 = jnp.stack([lp['b2'].reshape(1, EMB) for lp in lyr])

    dwq_full = _per_head_in(params['dec_Wq'])                     # (H, E+1, D)
    dwq, dwq_cap = dwq_full[:, :EMB, :], dwq_full[:, EMB:, :]     # (H,E,D), (H,1,D)
    dwk = _per_head_in(params['dec_Wk'])
    dwv = _per_head_in(params['dec_Wv'])
    dwcomb = _per_head_out(params['dec_Wcomb'])                   # (H, D, E)
    dbcomb = params['dec_bcomb'].reshape(1, EMB)

    kernel = functools.partial(_kp_fused_kernel, batch=B, problem=Pn, group=G)
    probs, sel = pl.pallas_call(
        kernel,
        out_shape=(jax.ShapeDtypeStruct((B, G, Pn), jnp.float32),
                   jax.ShapeDtypeStruct((B, G, 1), jnp.int32)),
    )(problems, capacity.reshape(B, G, 1), ninf_mask,
      params['emb_W'], params['emb_b'].reshape(1, EMB),
      wq, wk, wv, wcomb, bcomb,
      sc1, sh1, w1, b1, w2, b2, sc2, sh2,
      dwq, dwq_cap, dwk, dwv, dwcomb, dbcomb)

    selected = sel[..., 0]                                        # (B, G) int32
    # TODO(synk): torch.multinomial sampling branch (training / eval_type='softmax')
    # is stochastic and intentionally not translated; the reference argmax branch
    # returns prob=None (probs are returned here for inspection).
    return selected, probs


# =======================  deterministic parameter init  =======================

def init_params(key):
    keys = iter(jax.random.split(key, 64))

    def w(shape, scale=0.05):
        return jax.random.normal(next(keys), shape, jnp.float32) * scale

    params = {'emb_W': w((2, EMB)), 'emb_b': w((EMB,)), 'layers': []}
    for _ in range(LAYERS):
        params['layers'].append(dict(
            Wq=w((EMB, HEAD * QKV)), Wk=w((EMB, HEAD * QKV)), Wv=w((EMB, HEAD * QKV)),
            Wcomb=w((HEAD * QKV, EMB)), bcomb=w((EMB,)),
            bn1_g=1.0 + w((EMB,)), bn1_b=w((EMB,)),
            bn1_rm=jnp.zeros((EMB,), jnp.float32), bn1_rv=jnp.ones((EMB,), jnp.float32),
            W1=w((EMB, FF)), b1=w((FF,)), W2=w((FF, EMB)), b2=w((EMB,)),
            bn2_g=1.0 + w((EMB,)), bn2_b=w((EMB,)),
            bn2_rm=jnp.zeros((EMB,), jnp.float32), bn2_rv=jnp.ones((EMB,), jnp.float32),
        ))
    params['dec_Wq'] = w((EMB + 1, HEAD * QKV))
    params['dec_Wk'] = w((EMB, HEAD * QKV))
    params['dec_Wv'] = w((EMB, HEAD * QKV))
    params['dec_Wcomb'] = w((HEAD * QKV, EMB))
    params['dec_bcomb'] = w((EMB,))
    return params


if __name__ == "__main__":
    key = jax.random.PRNGKey(0)
    kparam, kdata = jax.random.split(key)
    params = init_params(kparam)

    k1, k2 = jax.random.split(kdata)
    problems = jax.random.uniform(k1, (BATCH, PROBLEM, 2), jnp.float32)        # (value, weight)
    capacity = jax.random.uniform(k2, (BATCH, POMO), jnp.float32) * 5.0 + 1.0  # remaining capacity

    # fit_ninf_mask: each POMO group has already taken item (g % PROBLEM)
    g_idx = jnp.arange(POMO)[:, None]
    p_idx = jnp.arange(PROBLEM)[None, :]
    mask2d = jnp.where(p_idx == (g_idx % PROBLEM), -jnp.inf, 0.0).astype(jnp.float32)
    ninf_mask = jnp.broadcast_to(mask2d, (BATCH, POMO, PROBLEM))

    fwd = jax.jit(kp_model_forward)
    selected, probs = fwd(problems, capacity, ninf_mask, params)
    jax.block_until_ready((selected, probs))
    print("KERNEL_OK")
</pallas_src>

<mosaic_0001>
module attributes {stable_mosaic.version = 11 : i64} {
  func.func @_kp_fused_kernel(%arg0: memref<2x8x2xf32, #tpu.memory_space<vmem>>, %arg1: memref<2x8x1xf32, #tpu.memory_space<vmem>>, %arg2: memref<2x8x8xf32, #tpu.memory_space<vmem>>, %arg3: memref<2x32xf32, #tpu.memory_space<vmem>>, %arg4: memref<1x32xf32, #tpu.memory_space<vmem>>, %arg5: memref<2x4x32x8xf32, #tpu.memory_space<vmem>>, %arg6: memref<2x4x32x8xf32, #tpu.memory_space<vmem>>, %arg7: memref<2x4x32x8xf32, #tpu.memory_space<vmem>>, %arg8: memref<2x4x8x32xf32, #tpu.memory_space<vmem>>, %arg9: memref<2x1x32xf32, #tpu.memory_space<vmem>>, %arg10: memref<2x1x32xf32, #tpu.memory_space<vmem>>, %arg11: memref<2x1x32xf32, #tpu.memory_space<vmem>>, %arg12: memref<2x32x64xf32, #tpu.memory_space<vmem>>, %arg13: memref<2x1x64xf32, #tpu.memory_space<vmem>>, %arg14: memref<2x64x32xf32, #tpu.memory_space<vmem>>, %arg15: memref<2x1x32xf32, #tpu.memory_space<vmem>>, %arg16: memref<2x1x32xf32, #tpu.memory_space<vmem>>, %arg17: memref<2x1x32xf32, #tpu.memory_space<vmem>>, %arg18: memref<4x32x8xf32, #tpu.memory_space<vmem>>, %arg19: memref<4x1x8xf32, #tpu.memory_space<vmem>>, %arg20: memref<4x32x8xf32, #tpu.memory_space<vmem>>, %arg21: memref<4x32x8xf32, #tpu.memory_space<vmem>>, %arg22: memref<4x8x32xf32, #tpu.memory_space<vmem>>, %arg23: memref<1x32xf32, #tpu.memory_space<vmem>>, %arg24: memref<2x8x8xf32, #tpu.memory_space<vmem>>, %arg25: memref<2x8x1xi32, #tpu.memory_space<vmem>>) attributes {dimension_semantics = [], scalar_prefetch = 0 : i64, scratch_operands = 0 : i64, tpu.core_type = #tpu.core_type<tc>} {
    %c0 = arith.constant 0 : index
    %c0_0 = arith.constant 0 : index
    %c0_1 = arith.constant 0 : index
    %0 = vector.load %arg0[%c0, %c0_0, %c0_1] : memref<2x8x2xf32, #tpu.memory_space<vmem>>, vector<1x8x2xf32>
    %1 = vector.shape_cast %0 : vector<1x8x2xf32> to vector<8x2xf32>
    %c0_2 = arith.constant 0 : index
    %c0_3 = arith.constant 0 : index
    %2 = vector.load %arg3[%c0_2, %c0_3] : memref<2x32xf32, #tpu.memory_space<vmem>>, vector<2x32xf32>
    %cst = arith.constant dense<0.000000e+00> : vector<8x32xf32>
    %3 = tpu.matmul %1, %2, %cst {dimension_numbers = #tpu.dot_dimension_numbers<[1], [0], [0], [1], [0, 0, 1, 1], [], []>} : vector<8x2xf32>, vector<2x32xf32>, vector<8x32xf32> -> vector<8x32xf32>
    %c0_4 = arith.constant 0 : index
    %c0_5 = arith.constant 0 : index
    %4 = vector.load %arg4[%c0_4, %c0_5] : memref<1x32xf32, #tpu.memory_space<vmem>>, vector<1x32xf32>
    %5 = vector.broadcast %4 : vector<1x32xf32> to vector<8x32xf32>
    %6 = arith.addf %3, %5 : vector<8x32xf32>
    %c1 = arith.constant 1 : index
    %c0_6 = arith.constant 0 : index
    %c0_7 = arith.constant 0 : index
    %7 = vector.load %arg0[%c1, %c0_6, %c0_7] : memref<2x8x2xf32, #tpu.memory_space<vmem>>, vector<1x8x2xf32>
    %8 = vector.shape_cast %7 : vector<1x8x2xf32> to vector<8x2xf32>
    %c0_8 = arith.constant 0 : index
    %c0_9 = arith.constant 0 : index
    %9 = vector.load %arg3[%c0_8, %c0_9] : memref<2x32xf32, #tpu.memory_space<vmem>>, vector<2x32xf32>
    %cst_10 = arith.constant dense<0.000000e+00> : vector<8x32xf32>
    %10 = tpu.matmul %8, %9, %cst_10 {dimension_numbers = #tpu.dot_dimension_numbers<[1], [0], [0], [1], [0, 0, 1, 1], [], []>} : vector<8x2xf32>, vector<2x32xf32>, vector<8x32xf32> -> vector<8x32xf32>
    %c0_11 = arith.constant 0 : index
    %c0_12 = arith.constant 0 : index
    %11 = vector.load %arg4[%c0_11, %c0_12] : memref<1x32xf32, #tpu.memory_space<vmem>>, vector<1x32xf32>
    %12 = vector.broadcast %11 : vector<1x32xf32> to vector<8x32xf32>
    %13 = arith.addf %10, %12 : vector<8x32xf32>
    %cst_13 = arith.constant 0.000000e+00 : f32
    %14 = vector.broadcast %cst_13 : f32 to vector<8x32xf32>
    %c0_14 = arith.constant 0 : index
    %c0_15 = arith.constant 0 : index
    %c0_16 = arith.constant 0 : index
    %c0_17 = arith.constant 0 : index
    %15 = vector.load %arg5[%c0_14, %c0_15, %c0_16, %c0_17] : memref<2x4x32x8xf32, #tpu.memory_space<vmem>>, vector<1x1x32x8xf32>
    %16 = vector.shape_cast %15 : vector<1x1x32x8xf32> to vector<32x8xf32>
    %cst_18 = arith.constant dense<0.000000e+00> : vector<8x8xf32>
    %17 = tpu.matmul %6, %16, %cst_18 {dimension_numbers = #tpu.dot_dimension_numbers<[1], [0], [0], [1], [0, 0, 1, 1], [], []>} : vector<8x32xf32>, vector<32x8xf32>, vector<8x8xf32> -> vector<8x8xf32>
    %c0_19 = arith.constant 0 : index
    %c0_20 = arith.constant 0 : index
    %c0_21 = arith.constant 0 : index
    %c0_22 = arith.constant 0 : index
    %18 = vector.load %arg6[%c0_19, %c0_20, %c0_21, %c0_22] : memref<2x4x32x8xf32, #tpu.memory_space<vmem>>, vector<1x1x32x8xf32>
    %19 = vector.shape_cast %18 : vector<1x1x32x8xf32> to vector<32x8xf32>
    %cst_23 = arith.constant dense<0.000000e+00> : vector<8x8xf32>
    %20 = tpu.matmul %6, %19, %cst_23 {dimension_numbers = #tpu.dot_dimension_numbers<[1], [0], [0], [1], [0, 0, 1, 1], [], []>} : vector<8x32xf32>, vector<32x8xf32>, vector<8x8xf32> -> vector<8x8xf32>
    %c0_24 = arith.constant 0 : index
    %c0_25 = arith.constant 0 : index
    %c0_26 = arith.constant 0 : index
    %c0_27 = arith.constant 0 : index
    %21 = vector.load %arg7[%c0_24, %c0_25, %c0_26, %c0_27] : memref<2x4x32x8xf32, #tpu.memory_space<vmem>>, vector<1x1x32x8xf32>
    %22 = vector.shape_cast %21 : vector<1x1x32x8xf32> to vector<32x8xf32>
    %cst_28 = arith.constant dense<0.000000e+00> : vector<8x8xf32>
    %23 = tpu.matmul %6, %22, %cst_28 {dimension_numbers = #tpu.dot_dimension_numbers<[1], [0], [0], [1], [0, 0, 1, 1], [], []>} : vector<8x32xf32>, vector<32x8xf32>, vector<8x8xf32> -> vector<8x8xf32>
    %cst_29 = arith.constant dense<0.000000e+00> : vector<8x8xf32>
    %24 = tpu.matmul %17, %20, %cst_29 {dimension_numbers = #tpu.dot_dimension_numbers<[1], [1], [0], [0], [0, 0, 1, 0], [], []>} : vector<8x8xf32>, vector<8x8xf32>, vector<8x8xf32> -> vector<8x8xf32>
    %cst_30 = arith.constant 0.353553385 : f32
    %25 = vector.broadcast %cst_30 : f32 to vector<8x8xf32>
    %26 = arith.mulf %24, %25 : vector<8x8xf32>
    %cst_31 = arith.constant dense<0xFF800000> : vector<8xf32>
    %27 = vector.multi_reduction <maximumf>, %26, %cst_31 [1] : vector<8x8xf32> to vector<8xf32>
    %28 = vector.shape_cast %27 : vector<8xf32> to vector<8x1xf32>
    %29 = vector.broadcast %28 : vector<8x1xf32> to vector<8x8xf32>
    %30 = arith.subf %26, %29 : vector<8x8xf32>
    %31 = math.exp %30 : vector<8x8xf32>
    %cst_32 = arith.constant dense<0.000000e+00> : vector<8xf32>
    %32 = vector.multi_reduction <add>, %31, %cst_32 [1] : vector<8x8xf32> to vector<8xf32>
    %33 = vector.shape_cast %32 : vector<8xf32> to vector<8x1xf32>
    %34 = vector.broadcast %33 : vector<8x1xf32> to vector<8x8xf32>
    %35 = arith.divf %31, %34 : vector<8x8xf32>
    %cst_33 = arith.constant dense<0.000000e+00> : vector<8x8xf32>
    %36 = tpu.matmul %35, %23, %cst_33 {dimension_numbers = #tpu.dot_dimension_numbers<[1], [0], [0], [1], [0, 0, 1, 1], [], []>} : vector<8x8xf32>, vector<8x8xf32>, vector<8x8xf32> -> vector<8x8xf32>
    %c0_34 = arith.constant 0 : index
    %c0_35 = arith.constant 0 : index
    %c0_36 = arith.constant 0 : index
    %c0_37 = arith.constant 0 : index
    %37 = vector.load %arg8[%c0_34, %c0_35, %c0_36, %c0_37] : memref<2x4x8x32xf32, #tpu.memory_space<vmem>>, vector<1x1x8x32xf32>
    %38 = vector.shape_cast %37 : vector<1x1x8x32xf32> to vector<8x32xf32>
    %cst_38 = arith.constant dense<0.000000e+00> : vector<8x32xf32>
    %39 = tpu.matmul %36, %38, %cst_38 {dimension_numbers = #tpu.dot_dimension_numbers<[1], [0], [0], [1], [0, 0, 1, 1], [], []>} : vector<8x8xf32>, vector<8x32xf32>, vector<8x32xf32> -> vector<8x32xf32>
    %40 = arith.addf %14, %39 : vector<8x32xf32>
    %c0_39 = arith.constant 0 : index
    %c1_40 = arith.constant 1 : index
    %c0_41 = arith.constant 0 : index
    %c0_42 = arith.constant 0 : index
    %41 = vector.load %arg5[%c0_39, %c1_40, %c0_41, %c0_42] : memref<2x4x32x8xf32, #tpu.memory_space<vmem>>, vector<1x1x32x8xf32>
    %42 = vector.shape_cast %41 : vector<1x1x32x8xf32> to vector<32x8xf32>
    %cst_43 = arith.constant dense<0.000000e+00> : vector<8x8xf32>
    %43 = tpu.matmul %6, %42, %cst_43 {dimension_numbers = #tpu.dot_dimension_numbers<[1], [0], [0], [1], [0, 0, 1, 1], [], []>} : vector<8x32xf32>, vector<32x8xf32>, vector<8x8xf32> -> vector<8x8xf32>
    %c0_44 = arith.constant 0 : index
    %c1_45 = arith.constant 1 : index
    %c0_46 = arith.constant 0 : index
    %c0_47 = arith.constant 0 : index
    %44 = vector.load %arg6[%c0_44, %c1_45, %c0_46, %c0_47] : memref<2x4x32x8xf32, #tpu.memory_space<vmem>>, vector<1x1x32x8xf32>
    %45 = vector.shape_cast %44 : vector<1x1x32x8xf32> to vector<32x8xf32>
    %cst_48 = arith.constant dense<0.000000e+00> : vector<8x8xf32>
    %46 = tpu.matmul %6, %45, %cst_48 {dimension_numbers = #tpu.dot_dimension_numbers<[1], [0], [0], [1], [0, 0, 1, 1], [], []>} : vector<8x32xf32>, vector<32x8xf32>, vector<8x8xf32> -> vector<8x8xf32>
    %c0_49 = arith.constant 0 : index
    %c1_50 = arith.constant 1 : index
    %c0_51 = arith.constant 0 : index
    %c0_52 = arith.constant 0 : index
    %47 = vector.load %arg7[%c0_49, %c1_50, %c0_51, %c0_52] : memref<2x4x32x8xf32, #tpu.memory_space<vmem>>, vector<1x1x32x8xf32>
    %48 = vector.shape_cast %47 : vector<1x1x32x8xf32> to vector<32x8xf32>
    %cst_53 = arith.constant dense<0.000000e+00> : vector<8x8xf32>
    %49 = tpu.matmul %6, %48, %cst_53 {dimension_numbers = #tpu.dot_dimension_numbers<[1], [0], [0], [1], [0, 0, 1, 1], [], []>} : vector<8x32xf32>, vector<32x8xf32>, vector<8x8xf32> -> vector<8x8xf32>
    %cst_54 = arith.constant dense<0.000000e+00> : vector<8x8xf32>
    %50 = tpu.matmul %43, %46, %cst_54 {dimension_numbers = #tpu.dot_dimension_numbers<[1], [1], [0], [0], [0, 0, 1, 0], [], []>} : vector<8x8xf32>, vector<8x8xf32>, vector<8x8xf32> -> vector<8x8xf32>
    %cst_55 = arith.constant 0.353553385 : f32
    %51 = vector.broadcast %cst_55 : f32 to vector<8x8xf32>
    %52 = arith.mulf %50, %51 : vector<8x8xf32>
    %cst_56 = arith.constant dense<0xFF800000> : vector<8xf32>
    %53 = vector.multi_reduction <maximumf>, %52, %cst_56 [1] : vector<8x8xf32> to vector<8xf32>
    %54 = vector.shape_cast %53 : vector<8xf32> to vector<8x1xf32>
    %55 = vector.broadcast %54 : vector<8x1xf32> to vector<8x8xf32>
    %56 = arith.subf %52, %55 : vector<8x8xf32>
    %57 = math.exp %56 : vector<8x8xf32>
    %cst_57 = arith.constant dense<0.000000e+00> : vector<8xf32>
    %58 = vector.multi_reduction <add>, %57, %cst_57 [1] : vector<8x8xf32> to vector<8xf32>
    %59 = vector.shape_cast %58 : vector<8xf32> to vector<8x1xf32>
    %60 = vector.broadcast %59 : vector<8x1xf32> to vector<8x8xf32>
    %61 = arith.divf %57, %60 : vector<8x8xf32>
    %cst_58 = arith.constant dense<0.000000e+00> : vector<8x8xf32>
    %62 = tpu.matmul %61, %49, %cst_58 {dimension_numbers = #tpu.dot_dimension_numbers<[1], [0], [0], [1], [0, 0, 1, 1], [], []>} : vector<8x8xf32>, vector<8x8xf32>, vector<8x8xf32> -> vector<8x8xf32>
    %c0_59 = arith.constant 0 : index
    %c1_60 = arith.constant 1 : index
    %c0_61 = arith.constant 0 : index
    %c0_62 = arith.constant 0 : index
    %63 = vector.load %arg8[%c0_59, %c1_60, %c0_61, %c0_62] : memref<2x4x8x32xf32, #tpu.memory_space<vmem>>, vector<1x1x8x32xf32>
    %64 = vector.shape_cast %63 : vector<1x1x8x32xf32> to vector<8x32xf32>
    %cst_63 = arith.constant dense<0.000000e+00> : vector<8x32xf32>
    %65 = tpu.matmul %62, %64, %cst_63 {dimension_numbers = #tpu.dot_dimension_numbers<[1], [0], [0], [1], [0, 0, 1, 1], [], []>} : vector<8x8xf32>, vector<8x32xf32>, vector<8x32xf32> -> vector<8x32xf32>
    %66 = arith.addf %40, %65 : vector<8x32xf32>
    %c0_64 = arith.constant 0 : index
    %c2 = arith.constant 2 : index
    %c0_65 = arith.constant 0 : index
    %c0_66 = arith.constant 0 : index
    %67 = vector.load %arg5[%c0_64, %c2, %c0_65, %c0_66] : memref<2x4x32x8xf32, #tpu.memory_space<vmem>>, vector<1x1x32x8xf32>
    %68 = vector.shape_cast %67 : vector<1x1x32x8xf32> to vector<32x8xf32>
    %cst_67 = arith.constant dense<0.000000e+00> : vector<8x8xf32>
    %69 = tpu.matmul %6, %68, %cst_67 {dimension_numbers = #tpu.dot_dimension_numbers<[1], [0], [0], [1], [0, 0, 1, 1], [], []>} : vector<8x32xf32>, vector<32x8xf32>, vector<8x8xf32> -> vector<8x8xf32>
    %c0_68 = arith.constant 0 : index
    %c2_69 = arith.constant 2 : index
    %c0_70 = arith.constant 0 : index
    %c0_71 = arith.constant 0 : index
    %70 = vector.load %arg6[%c0_68, %c2_69, %c0_70, %c0_71] : memref<2x4x32x8xf32, #tpu.memory_space<vmem>>, vector<1x1x32x8xf32>
    %71 = vector.shape_cast %70 : vector<1x1x32x8xf32> to vector<32x8xf32>
    %cst_72 = arith.constant dense<0.000000e+00> : vector<8x8xf32>
    %72 = tpu.matmul %6, %71, %cst_72 {dimension_numbers = #tpu.dot_dimension_numbers<[1], [0], [0], [1], [0, 0, 1, 1], [], []>} : vector<8x32xf32>, vector<32x8xf32>, vector<8x8xf32> -> vector<8x8xf32>
    %c0_73 = arith.constant 0 : index
    %c2_74 = arith.constant 2 : index
    %c0_75 = arith.constant 0 : index
    %c0_76 = arith.constant 0 : index
    %73 = vector.load %arg7[%c0_73, %c2_74, %c0_75, %c0_76] : memref<2x4x32x8xf32, #tpu.memory_space<vmem>>, vector<1x1x32x8xf32>
    %74 = vector.shape_cast %73 : vector<1x1x32x8xf32> to vector<32x8xf32>
    %cst_77 = arith.constant dense<0.000000e+00> : vector<8x8xf32>
    %75 = tpu.matmul %6, %74, %cst_77 {dimension_numbers = #tpu.dot_dimension_numbers<[1], [0], [0], [1], [0, 0, 1, 1], [], []>} : vector<8x32xf32>, vector<32x8xf32>, vector<8x8xf32> -> vector<8x8xf32>
    %cst_78 = arith.constant dense<0.000000e+00> : vector<8x8xf32>
    %76 = tpu.matmul %69, %72, %cst_78 {dimension_numbers = #tpu.dot_dimension_numbers<[1], [1], [0], [0], [0, 0, 1, 0], [], []>} : vector<8x8xf32>, vector<8x8xf32>, vector<8x8xf32> -> vector<8x8xf32>
    %cst_79 = arith.constant 0.353553385 : f32
    %77 = vector.broadcast %cst_79 : f32 to vector<8x8xf32>
    %78 = arith.mulf %76, %77 : vector<8x8xf32>
    %cst_80 = arith.constant dense<0xFF800000> : vector<8xf32>
    %79 = vector.multi_reduction <maximumf>, %78, %cst_80 [1] : vector<8x8xf32> to vector<8xf32>
    %80 = vector.shape_cast %79 : vector<8xf32> to vector<8x1xf32>
    %81 = vector.broadcast %80 : vector<8x1xf32> to vector<8x8xf32>
    %82 = arith.subf %78, %81 : vector<8x8xf32>
    %83 = math.exp %82 : vector<8x8xf32>
    %cst_81 = arith.constant dense<0.000000e+00> : vector<8xf32>
    %84 = vector.multi_reduction <add>, %83, %cst_81 [1] : vector<8x8xf32> to vector<8xf32>
    %85 = vector.shape_cast %84 : vector<8xf32> to vector<8x1xf32>
    %86 = vector.broadcast %85 : vector<8x1xf32> to vector<8x8xf32>
    %87 = arith.divf %83, %86 : vector<8x8xf32>
    %cst_82 = arith.constant dense<0.000000e+00> : vector<8x8xf32>
    %88 = tpu.matmul %87, %75, %cst_82 {dimension_numbers = #tpu.dot_dimension_numbers<[1], [0], [0], [1], [0, 0, 1, 1], [], []>} : vector<8x8xf32>, vector<8x8xf32>, vector<8x8xf32> -> vector<8x8xf32>
    %c0_83 = arith.constant 0 : index
    %c2_84 = arith.constant 2 : index
    %c0_85 = arith.constant 0 : index
    %c0_86 = arith.constant 0 : index
    %89 = vector.load %arg8[%c0_83, %c2_84, %c0_85, %c0_86] : memref<2x4x8x32xf32, #tpu.memory_space<vmem>>, vector<1x1x8x32xf32>
    %90 = vector.shape_cast %89 : vector<1x1x8x32xf32> to vector<8x32xf32>
    %cst_87 = arith.constant dense<0.000000e+00> : vector<8x32xf32>
    %91 = tpu.matmul %88, %90, %cst_87 {dimension_numbers = #tpu.dot_dimension_numbers<[1], [0], [0], [1], [0, 0, 1, 1], [], []>} : vector<8x8xf32>, vector<8x32xf32>, vector<8x32xf32> -> vector<8x32xf32>
    %92 = arith.addf %66, %91 : vector<8x32xf32>
    %c0_88 = arith.constant 0 : index
    %c3 = arith.constant 3 : index
    %c0_89 = arith.constant 0 : index
    %c0_90 = arith.constant 0 : index
    %93 = vector.load %arg5[%c0_88, %c3, %c0_89, %c0_90] : memref<2x4x32x8xf32, #tpu.memory_space<vmem>>, vector<1x1x32x8xf32>
    %94 = vector.shape_cast %93 : vector<1x1x32x8xf32> to vector<32x8xf32>
    %cst_91 = arith.constant dense<0.000000e+00> : vector<8x8xf32>
    %95 = tpu.matmul %6, %94, %cst_91 {dimension_numbers = #tpu.dot_dimension_numbers<[1], [0], [0], [1], [0, 0, 1, 1], [], []>} : vector<8x32xf32>, vector<32x8xf32>, vector<8x8xf32> -> vector<8x8xf32>
    %c0_92 = arith.constant 0 : index
    %c3_93 = arith.constant 3 : index
    %c0_94 = arith.constant 0 : index
    %c0_95 = arith.constant 0 : index
    %96 = vector.load %arg6[%c0_92, %c3_93, %c0_94, %c0_95] : memref<2x4x32x8xf32, #tpu.memory_space<vmem>>, vector<1x1x32x8xf32>
    %97 = vector.shape_cast %96 : vector<1x1x32x8xf32> to vector<32x8xf32>
    %cst_96 = arith.constant dense<0.000000e+00> : vector<8x8xf32>
    %98 = tpu.matmul %6, %97, %cst_96 {dimension_numbers = #tpu.dot_dimension_numbers<[1], [0], [0], [1], [0, 0, 1, 1], [], []>} : vector<8x32xf32>, vector<32x8xf32>, vector<8x8xf32> -> vector<8x8xf32>
    %c0_97 = arith.constant 0 : index
    %c3_98 = arith.constant 3 : index
    %c0_99 = arith.constant 0 : index
    %c0_100 = arith.constant 0 : index
    %99 = vector.load %arg7[%c0_97, %c3_98, %c0_99, %c0_100] : memref<2x4x32x8xf32, #tpu.memory_space<vmem>>, vector<1x1x32x8xf32>
    %100 = vector.shape_cast %99 : vector<1x1x32x8xf32> to vector<32x8xf32>
    %cst_101 = arith.constant dense<0.000000e+00> : vector<8x8xf32>
    %101 = tpu.matmul %6, %100, %cst_101 {dimension_numbers = #tpu.dot_dimension_numbers<[1], [0], [0], [1], [0, 0, 1, 1], [], []>} : vector<8x32xf32>, vector<32x8xf32>, vector<8x8xf32> -> vector<8x8xf32>
    %cst_102 = arith.constant dense<0.000000e+00> : vector<8x8xf32>
    %102 = tpu.matmul %95, %98, %cst_102 {dimension_numbers = #tpu.dot_dimension_numbers<[1], [1], [0], [0], [0, 0, 1, 0], [], []>} : vector<8x8xf32>, vector<8x8xf32>, vector<8x8xf32> -> vector<8x8xf32>
    %cst_103 = arith.constant 0.353553385 : f32
    %103 = vector.broadcast %cst_103 : f32 to vector<8x8xf32>
    %104 = arith.mulf %102, %103 : vector<8x8xf32>
    %cst_104 = arith.constant dense<0xFF800000> : vector<8xf32>
    %105 = vector.multi_reduction <maximumf>, %104, %cst_104 [1] : vector<8x8xf32> to vector<8xf32>
    %106 = vector.shape_cast %105 : vector<8xf32> to vector<8x1xf32>
    %107 = vector.broadcast %106 : vector<8x1xf32> to vector<8x8xf32>
    %108 = arith.subf %104, %107 : vector<8x8xf32>
    %109 = math.exp %108 : vector<8x8xf32>
    %cst_105 = arith.constant dense<0.000000e+00> : vector<8xf32>
    %110 = vector.multi_reduction <add>, %109, %cst_105 [1] : vector<8x8xf32> to vector<8xf32>
    %111 = vector.shape_cast %110 : vector<8xf32> to vector<8x1xf32>
    %112 = vector.broadcast %111 : vector<8x1xf32> to vector<8x8xf32>
    %113 = arith.divf %109, %112 : vector<8x8xf32>
    %cst_106 = arith.constant dense<0.000000e+00> : vector<8x8xf32>
    %114 = tpu.matmul %113, %101, %cst_106 {dimension_numbers = #tpu.dot_dimension_numbers<[1], [0], [0], [1], [0, 0, 1, 1], [], []>} : vector<8x8xf32>, vector<8x8xf32>, vector<8x8xf32> -> vector<8x8xf32>
    %c0_107 = arith.constant 0 : index
    %c3_108 = arith.constant 3 : index
    %c0_109 = arith.constant 0 : index
    %c0_110 = arith.constant 0 : index
    %115 = vector.load %arg8[%c0_107, %c3_108, %c0_109, %c0_110] : memref<2x4x8x32xf32, #tpu.memory_space<vmem>>, vector<1x1x8x32xf32>
    %116 = vector.shape_cast %115 : vector<1x1x8x32xf32> to vector<8x32xf32>
    %cst_111 = arith.constant dense<0.000000e+00> : vector<8x32xf32>
    %117 = tpu.matmul %114, %116, %cst_111 {dimension_numbers = #tpu.dot_dimension_numbers<[1], [0], [0], [1], [0, 0, 1, 1], [], []>} : vector<8x8xf32>, vector<8x32xf32>, vector<8x32xf32> -> vector<8x32xf32>
    %118 = arith.addf %92, %117 : vector<8x32xf32>
    %c0_112 = arith.constant 0 : index
    %c0_113 = arith.constant 0 : index
    %c0_114 = arith.constant 0 : index
    %119 = vector.load %arg9[%c0_112, %c0_113, %c0_114] : memref<2x1x32xf32, #tpu.memory_space<vmem>>, vector<1x1x32xf32>
    %120 = vector.shape_cast %119 : vector<1x1x32xf32> to vector<1x32xf32>
    %121 = vector.broadcast %120 : vector<1x32xf32> to vector<8x32xf32>
    %122 = arith.addf %118, %121 : vector<8x32xf32>
    %123 = arith.addf %6, %122 : vector<8x32xf32>
    %c0_115 = arith.constant 0 : index
    %c0_116 = arith.constant 0 : index
    %c0_117 = arith.constant 0 : index
    %124 = vector.load %arg10[%c0_115, %c0_116, %c0_117] : memref<2x1x32xf32, #tpu.memory_space<vmem>>, vector<1x1x32xf32>
    %125 = vector.shape_cast %124 : vector<1x1x32xf32> to vector<1x32xf32>
    %126 = vector.broadcast %125 : vector<1x32xf32> to vector<8x32xf32>
    %127 = arith.mulf %123, %126 : vector<8x32xf32>
    %c0_118 = arith.constant 0 : index
    %c0_119 = arith.constant 0 : index
    %c0_120 = arith.constant 0 : index
    %128 = vector.load %arg11[%c0_118, %c0_119, %c0_120] : memref<2x1x32xf32, #tpu.memory_space<vmem>>, vector<1x1x32xf32>
    %129 = vector.shape_cast %128 : vector<1x1x32xf32> to vector<1x32xf32>
    %130 = vector.broadcast %129 : vector<1x32xf32> to vector<8x32xf32>
    %131 = arith.addf %127, %130 : vector<8x32xf32>
    %c0_121 = arith.constant 0 : index
    %c0_122 = arith.constant 0 : index
    %c0_123 = arith.constant 0 : index
    %132 = vector.load %arg12[%c0_121, %c0_122, %c0_123] : memref<2x32x64xf32, #tpu.memory_space<vmem>>, vector<1x32x64xf32>
    %133 = vector.shape_cast %132 : vector<1x32x64xf32> to vector<32x64xf32>
    %cst_124 = arith.constant dense<0.000000e+00> : vector<8x64xf32>
    %134 = tpu.matmul %131, %133, %cst_124 {dimension_numbers = #tpu.dot_dimension_numbers<[1], [0], [0], [1], [0, 0, 1, 1], [], []>} : vector<8x32xf32>, vector<32x64xf32>, vector<8x64xf32> -> vector<8x64xf32>
    %c0_125 = arith.constant 0 : index
    %c0_126 = arith.constant 0 : index
    %c0_127 = arith.constant 0 : index
    %135 = vector.load %arg13[%c0_125, %c0_126, %c0_127] : memref<2x1x64xf32, #tpu.memory_space<vmem>>, vector<1x1x64xf32>
    %136 = vector.shape_cast %135 : vector<1x1x64xf32> to vector<1x64xf32>
    %137 = vector.broadcast %136 : vector<1x64xf32> to vector<8x64xf32>
    %138 = arith.addf %134, %137 : vector<8x64xf32>
    %cst_128 = arith.constant 0.000000e+00 : f32
    %139 = vector.broadcast %cst_128 : f32 to vector<8x64xf32>
    %140 = arith.maximumf %138, %139 : vector<8x64xf32>
    %c0_129 = arith.constant 0 : index
    %c0_130 = arith.constant 0 : index
    %c0_131 = arith.constant 0 : index
    %141 = vector.load %arg14[%c0_129, %c0_130, %c0_131] : memref<2x64x32xf32, #tpu.memory_space<vmem>>, vector<1x64x32xf32>
    %142 = vector.shape_cast %141 : vector<1x64x32xf32> to vector<64x32xf32>
    %cst_132 = arith.constant dense<0.000000e+00> : vector<8x32xf32>
    %143 = tpu.matmul %140, %142, %cst_132 {dimension_numbers = #tpu.dot_dimension_numbers<[1], [0], [0], [1], [0, 0, 1, 1], [], []>} : vector<8x64xf32>, vector<64x32xf32>, vector<8x32xf32> -> vector<8x32xf32>
    %c0_133 = arith.constant 0 : index
    %c0_134 = arith.constant 0 : index
    %c0_135 = arith.constant 0 : index
    %144 = vector.load %arg15[%c0_133, %c0_134, %c0_135] : memref<2x1x32xf32, #tpu.memory_space<vmem>>, vector<1x1x32xf32>
    %145 = vector.shape_cast %144 : vector<1x1x32xf32> to vector<1x32xf32>
    %146 = vector.broadcast %145 : vector<1x32xf32> to vector<8x32xf32>
    %147 = arith.addf %143, %146 : vector<8x32xf32>
    %148 = arith.addf %131, %147 : vector<8x32xf32>
    %c0_136 = arith.constant 0 : index
    %c0_137 = arith.constant 0 : index
    %c0_138 = arith.constant 0 : index
    %149 = vector.load %arg16[%c0_136, %c0_137, %c0_138] : memref<2x1x32xf32, #tpu.memory_space<vmem>>, vector<1x1x32xf32>
    %150 = vector.shape_cast %149 : vector<1x1x32xf32> to vector<1x32xf32>
    %151 = vector.broadcast %150 : vector<1x32xf32> to vector<8x32xf32>
    %152 = arith.mulf %148, %151 : vector<8x32xf32>
    %c0_139 = arith.constant 0 : index
    %c0_140 = arith.constant 0 : index
    %c0_141 = arith.constant 0 : index
    %153 = vector.load %arg17[%c0_139, %c0_140, %c0_141] : memref<2x1x32xf32, #tpu.memory_space<vmem>>, vector<1x1x32xf32>
    %154 = vector.shape_cast %153 : vector<1x1x32xf32> to vector<1x32xf32>
    %155 = vector.broadcast %154 : vector<1x32xf32> to vector<8x32xf32>
    %156 = arith.addf %152, %155 : vector<8x32xf32>
    %cst_142 = arith.constant 0.000000e+00 : f32
    %157 = vector.broadcast %cst_142 : f32 to vector<8x32xf32>
    %c0_143 = arith.constant 0 : index
    %c0_144 = arith.constant 0 : index
    %c0_145 = arith.constant 0 : index
    %c0_146 = arith.constant 0 : index
    %158 = vector.load %arg5[%c0_143, %c0_144, %c0_145, %c0_146] : memref<2x4x32x8xf32, #tpu.memory_space<vmem>>, vector<1x1x32x8xf32>
    %159 = vector.shape_cast %158 : vector<1x1x32x8xf32> to vector<32x8xf32>
    %cst_147 = arith.constant dense<0.000000e+00> : vector<8x8xf32>
    %160 = tpu.matmul %13, %159, %cst_147 {dimension_numbers = #tpu.dot_dimension_numbers<[1], [0], [0], [1], [0, 0, 1, 1], [], []>} : vector<8x32xf32>, vector<32x8xf32>, vector<8x8xf32> -> vector<8x8xf32>
    %c0_148 = arith.constant 0 : index
    %c0_149 = arith.constant 0 : index
    %c0_150 = arith.constant 0 : index
    %c0_151 = arith.constant 0 : index
    %161 = vector.load %arg6[%c0_148, %c0_149, %c0_150, %c0_151] : memref<2x4x32x8xf32, #tpu.memory_space<vmem>>, vector<1x1x32x8xf32>
    %162 = vector.shape_cast %161 : vector<1x1x32x8xf32> to vector<32x8xf32>
    %cst_152 = arith.constant dense<0.000000e+00> : vector<8x8xf32>
    %163 = tpu.matmul %13, %162, %cst_152 {dimension_numbers = #tpu.dot_dimension_numbers<[1], [0], [0], [1], [0, 0, 1, 1], [], []>} : vector<8x32xf32>, vector<32x8xf32>, vector<8x8xf32> -> vector<8x8xf32>
    %c0_153 = arith.constant 0 : index
    %c0_154 = arith.constant 0 : index
    %c0_155 = arith.constant 0 : index
    %c0_156 = arith.constant 0 : index
    %164 = vector.load %arg7[%c0_153, %c0_154, %c0_155, %c0_156] : memref<2x4x32x8xf32, #tpu.memory_space<vmem>>, vector<1x1x32x8xf32>
    %165 = vector.shape_cast %164 : vector<1x1x32x8xf32> to vector<32x8xf32>
    %cst_157 = arith.constant dense<0.000000e+00> : vector<8x8xf32>
    %166 = tpu.matmul %13, %165, %cst_157 {dimension_numbers = #tpu.dot_dimension_numbers<[1], [0], [0], [1], [0, 0, 1, 1], [], []>} : vector<8x32xf32>, vector<32x8xf32>, vector<8x8xf32> -> vector<8x8xf32>
    %cst_158 = arith.constant dense<0.000000e+00> : vector<8x8xf32>
    %167 = tpu.matmul %160, %163, %cst_158 {dimension_numbers = #tpu.dot_dimension_numbers<[1], [1], [0], [0], [0, 0, 1, 0], [], []>} : vector<8x8xf32>, vector<8x8xf32>, vector<8x8xf32> -> vector<8x8xf32>
    %cst_159 = arith.constant 0.353553385 : f32
    %168 = vector.broadcast %cst_159 : f32 to vector<8x8xf32>
    %169 = arith.mulf %167, %168 : vector<8x8xf32>
    %cst_160 = arith.constant dense<0xFF800000> : vector<8xf32>
    %170 = vector.multi_reduction <maximumf>, %169, %cst_160 [1] : vector<8x8xf32> to vector<8xf32>
    %171 = vector.shape_cast %170 : vector<8xf32> to vector<8x1xf32>
    %172 = vector.broadcast %171 : vector<8x1xf32> to vector<8x8xf32>
    %173 = arith.subf %169, %172 : vector<8x8xf32>
    %174 = math.exp %173 : vector<8x8xf32>
    %cst_161 = arith.constant dense<0.000000e+00> : vector<8xf32>
    %175 = vector.multi_reduction <add>, %174, %cst_161 [1] : vector<8x8xf32> to vector<8xf32>
    %176 = vector.shape_cast %175 : vector<8xf32> to vector<8x1xf32>
    %177 = vector.broadcast %176 : vector<8x1xf32> to vector<8x8xf32>
    %178 = arith.divf %174, %177 : vector<8x8xf32>
    %cst_162 = arith.constant dense<0.000000e+00> : vector<8x8xf32>
    %179 = tpu.matmul %178, %166, %cst_162 {dimension_numbers = #tpu.dot_dimension_numbers<[1], [0], [0], [1], [0, 0, 1, 1], [], []>} : vector<8x8xf32>, vector<8x8xf32>, vector<8x8xf32> -> vector<8x8xf32>
    %c0_163 = arith.constant 0 : index
    %c0_164 = arith.constant 0 : index
    %c0_165 = arith.constant 0 : index
    %c0_166 = arith.constant 0 : index
    %180 = vector.load %arg8[%c0_163, %c0_164, %c0_165, %c0_166] : memref<2x4x8x32xf32, #tpu.memory_space<vmem>>, vector<1x1x8x32xf32>
    %181 = vector.shape_cast %180 : vector<1x1x8x32xf32> to vector<8x32xf32>
    %cst_167 = arith.constant dense<0.000000e+00> : vector<8x32xf32>
    %182 = tpu.matmul %179, %181, %cst_167 {dimension_numbers = #tpu.dot_dimension_numbers<[1], [0], [0], [1], [0, 0, 1, 1], [], []>} : vector<8x8xf32>, vector<8x32xf32>, vector<8x32xf32> -> vector<8x32xf32>
    %183 = arith.addf %157, %182 : vector<8x32xf32>
    %c0_168 = arith.constant 0 : index
    %c1_169 = arith.constant 1 : index
    %c0_170 = arith.constant 0 : index
    %c0_171 = arith.constant 0 : index
    %184 = vector.load %arg5[%c0_168, %c1_169, %c0_170, %c0_171] : memref<2x4x32x8xf32, #tpu.memory_space<vmem>>, vector<1x1x32x8xf32>
    %185 = vector.shape_cast %184 : vector<1x1x32x8xf32> to vector<32x8xf32>
    %cst_172 = arith.constant dense<0.000000e+00> : vector<8x8xf32>
    %186 = tpu.matmul %13, %185, %cst_172 {dimension_numbers = #tpu.dot_dimension_numbers<[1], [0], [0], [1], [0, 0, 1, 1], [], []>} : vector<8x32xf32>, vector<32x8xf32>, vector<8x8xf32> -> vector<8x8xf32>
    %c0_173 = arith.constant 0 : index
    %c1_174 = arith.constant 1 : index
    %c0_175 = arith.constant 0 : index
    %c0_176 = arith.constant 0 : index
    %187 = vector.load %arg6[%c0_173, %c1_174, %c0_175, %c0_176] : memref<2x4x32x8xf32, #tpu.memory_space<vmem>>, vector<1x1x32x8xf32>
    %188 = vector.shape_cast %187 : vector<1x1x32x8xf32> to vector<32x8xf32>
    %cst_177 = arith.constant dense<0.000000e+00> : vector<8x8xf32>
    %189 = tpu.matmul %13, %188, %cst_177 {dimension_numbers = #tpu.dot_dimension_numbers<[1], [0], [0], [1], [0, 0, 1, 1], [], []>} : vector<8x32xf32>, vector<32x8xf32>, vector<8x8xf32> -> vector<8x8xf32>
    %c0_178 = arith.constant 0 : index
    %c1_179 = arith.constant 1 : index
    %c0_180 = arith.constant 0 : index
    %c0_181 = arith.constant 0 : index
    %190 = vector.load %arg7[%c0_178, %c1_179, %c0_180, %c0_181] : memref<2x4x32x8xf32, #tpu.memory_space<vmem>>, vector<1x1x32x8xf32>
    %191 = vector.shape_cast %190 : vector<1x1x32x8xf32> to vector<32x8xf32>
    %cst_182 = arith.constant dense<0.000000e+00> : vector<8x8xf32>
    %192 = tpu.matmul %13, %191, %cst_182 {dimension_numbers = #tpu.dot_dimension_numbers<[1], [0], [0], [1], [0, 0, 1, 1], [], []>} : vector<8x32xf32>, vector<32x8xf32>, vector<8x8xf32> -> vector<8x8xf32>
    %cst_183 = arith.constant dense<0.000000e+00> : vector<8x8xf32>
    %193 = tpu.matmul %186, %189, %cst_183 {dimension_numbers = #tpu.dot_dimension_numbers<[1], [1], [0], [0], [0, 0, 1, 0], [], []>} : vector<8x8xf32>, vector<8x8xf32>, vector<8x8xf32> -> vector<8x8xf32>
    %cst_184 = arith.constant 0.353553385 : f32
    %194 = vector.broadcast %cst_184 : f32 to vector<8x8xf32>
    %195 = arith.mulf %193, %194 : vector<8x8xf32>
    %cst_185 = arith.constant dense<0xFF800000> : vector<8xf32>
    %196 = vector.multi_reduction <maximumf>, %195, %cst_185 [1] : vector<8x8xf32> to vector<8xf32>
    %197 = vector.shape_cast %196 : vector<8xf32> to vector<8x1xf32>
    %198 = vector.broadcast %197 : vector<8x1xf32> to vector<8x8xf32>
    %199 = arith.subf %195, %198 : vector<8x8xf32>
    %200 = math.exp %199 : vector<8x8xf32>
    %cst_186 = arith.constant dense<0.000000e+00> : vector<8xf32>
    %201 = vector.multi_reduction <add>, %200, %cst_186 [1] : vector<8x8xf32> to vector<8xf32>
    %202 = vector.shape_cast %201 : vector<8xf32> to vector<8x1xf32>
    %203 = vector.broadcast %202 : vector<8x1xf32> to vector<8x8xf32>
    %204 = arith.divf %200, %203 : vector<8x8xf32>
    %cst_187 = arith.constant dense<0.000000e+00> : vector<8x8xf32>
    %205 = tpu.matmul %204, %192, %cst_187 {dimension_numbers = #tpu.dot_dimension_numbers<[1], [0], [0], [1], [0, 0, 1, 1], [], []>} : vector<8x8xf32>, vector<8x8xf32>, vector<8x8xf32> -> vector<8x8xf32>
    %c0_188 = arith.constant 0 : index
    %c1_189 = arith.constant 1 : index
    %c0_190 = arith.constant 0 : index
    %c0_191 = arith.constant 0 : index
    %206 = vector.load %arg8[%c0_188, %c1_189, %c0_190, %c0_191] : memref<2x4x8x32xf32, #tpu.memory_space<vmem>>, vector<1x1x8x32xf32>
    %207 = vector.shape_cast %206 : vector<1x1x8x32xf32> to vector<8x32xf32>
    %cst_192 = arith.constant dense<0.000000e+00> : vector<8x32xf32>
    %208 = tpu.matmul %205, %207, %cst_192 {dimension_numbers = #tpu.dot_dimension_numbers<[1], [0], [0], [1], [0, 0, 1, 1], [], []>} : vector<8x8xf32>, vector<8x32xf32>, vector<8x32xf32> -> vector<8x32xf32>
    %209 = arith.addf %183, %208 : vector<8x32xf32>
    %c0_193 = arith.constant 0 : index
    %c2_194 = arith.constant 2 : index
    %c0_195 = arith.constant 0 : index
    %c0_196 = arith.constant 0 : index
    %210 = vector.load %arg5[%c0_193, %c2_194, %c0_195, %c0_196] : memref<2x4x32x8xf32, #tpu.memory_space<vmem>>, vector<1x1x32x8xf32>
    %211 = vector.shape_cast %210 : vector<1x1x32x8xf32> to vector<32x8xf32>
    %cst_197 = arith.constant dense<0.000000e+00> : vector<8x8xf32>
    %212 = tpu.matmul %13, %211, %cst_197 {dimension_numbers = #tpu.dot_dimension_numbers<[1], [0], [0], [1], [0, 0, 1, 1], [], []>} : vector<8x32xf32>, vector<32x8xf32>, vector<8x8xf32> -> vector<8x8xf32>
    %c0_198 = arith.constant 0 : index
    %c2_199 = arith.constant 2 : index
    %c0_200 = arith.constant 0 : index
    %c0_201 = arith.constant 0 : index
    %213 = vector.load %arg6[%c0_198, %c2_199, %c0_200, %c0_201] : memref<2x4x32x8xf32, #tpu.memory_space<vmem>>, vector<1x1x32x8xf32>
    %214 = vector.shape_cast %213 : vector<1x1x32x8xf32> to vector<32x8xf32>
    %cst_202 = arith.constant dense<0.000000e+00> : vector<8x8xf32>
    %215 = tpu.matmul %13, %214, %cst_202 {dimension_numbers = #tpu.dot_dimension_numbers<[1], [0], [0], [1], [0, 0, 1, 1], [], []>} : vector<8x32xf32>, vector<32x8xf32>, vector<8x8xf32> -> vector<8x8xf32>
    %c0_203 = arith.constant 0 : index
    %c2_204 = arith.constant 2 : index
    %c0_205 = arith.constant 0 : index
    %c0_206 = arith.constant 0 : index
    %216 = vector.load %arg7[%c0_203, %c2_204, %c0_205, %c0_206] : memref<2x4x32x8xf32, #tpu.memory_space<vmem>>, vector<1x1x32x8xf32>
    %217 = vector.shape_cast %216 : vector<1x1x32x8xf32> to vector<32x8xf32>
    %cst_207 = arith.constant dense<0.000000e+00> : vector<8x8xf32>
    %218 = tpu.matmul %13, %217, %cst_207 {dimension_numbers = #tpu.dot_dimension_numbers<[1], [0], [0], [1], [0, 0, 1, 1], [], []>} : vector<8x32xf32>, vector<32x8xf32>, vector<8x8xf32> -> vector<8x8xf32>
    %cst_208 = arith.constant dense<0.000000e+00> : vector<8x8xf32>
    %219 = tpu.matmul %212, %215, %cst_208 {dimension_numbers = #tpu.dot_dimension_numbers<[1], [1], [0], [0], [0, 0, 1, 0], [], []>} : vector<8x8xf32>, vector<8x8xf32>, vector<8x8xf32> -> vector<8x8xf32>
    %cst_209 = arith.constant 0.353553385 : f32
    %220 = vector.broadcast %cst_209 : f32 to vector<8x8xf32>
    %221 = arith.mulf %219, %220 : vector<8x8xf32>
    %cst_210 = arith.constant dense<0xFF800000> : vector<8xf32>
    %222 = vector.multi_reduction <maximumf>, %221, %cst_210 [1] : vector<8x8xf32> to vector<8xf32>
    %223 = vector.shape_cast %222 : vector<8xf32> to vector<8x1xf32>
    %224 = vector.broadcast %223 : vector<8x1xf32> to vector<8x8xf32>
    %225 = arith.subf %221, %224 : vector<8x8xf32>
    %226 = math.exp %225 : vector<8x8xf32>
    %cst_211 = arith.constant dense<0.000000e+00> : vector<8xf32>
    %227 = vector.multi_reduction <add>, %226, %cst_211 [1] : vector<8x8xf32> to vector<8xf32>
    %228 = vector.shape_cast %227 : vector<8xf32> to vector<8x1xf32>
    %229 = vector.broadcast %228 : vector<8x1xf32> to vector<8x8xf32>
    %230 = arith.divf %226, %229 : vector<8x8xf32>
    %cst_212 = arith.constant dense<0.000000e+00> : vector<8x8xf32>
    %231 = tpu.matmul %230, %218, %cst_212 {dimension_numbers = #tpu.dot_dimension_numbers<[1], [0], [0], [1], [0, 0, 1, 1], [], []>} : vector<8x8xf32>, vector<8x8xf32>, vector<8x8xf32> -> vector<8x8xf32>
    %c0_213 = arith.constant 0 : index
    %c2_214 = arith.constant 2 : index
    %c0_215 = arith.constant 0 : index
    %c0_216 = arith.constant 0 : index
    %232 = vector.load %arg8[%c0_213, %c2_214, %c0_215, %c0_216] : memref<2x4x8x32xf32, #tpu.memory_space<vmem>>, vector<1x1x8x32xf32>
    %233 = vector.shape_cast %232 : vector<1x1x8x32xf32> to vector<8x32xf32>
    %cst_217 = arith.constant dense<0.000000e+00> : vector<8x32xf32>
    %234 = tpu.matmul %231, %233, %cst_217 {dimension_numbers = #tpu.dot_dimension_numbers<[1], [0], [0], [1], [0, 0, 1, 1], [], []>} : vector<8x8xf32>, vector<8x32xf32>, vector<8x32xf32> -> vector<8x32xf32>
    %235 = arith.addf %209, %234 : vector<8x32xf32>
    %c0_218 = arith.constant 0 : index
    %c3_219 = arith.constant 3 : index
    %c0_220 = arith.constant 0 : index
    %c0_221 = arith.constant 0 : index
    %236 = vector.load %arg5[%c0_218, %c3_219, %c0_220, %c0_221] : memref<2x4x32x8xf32, #tpu.memory_space<vmem>>, vector<1x1x32x8xf32>
    %237 = vector.shape_cast %236 : vector<1x1x32x8xf32> to vector<32x8xf32>
    %cst_222 = arith.constant dense<0.000000e+00> : vector<8x8xf32>
    %238 = tpu.matmul %13, %237, %cst_222 {dimension_numbers = #tpu.dot_dimension_numbers<[1], [0], [0], [1], [0, 0, 1, 1], [], []>} : vector<8x32xf32>, vector<32x8xf32>, vector<8x8xf32> -> vector<8x8xf32>
    %c0_223 = arith.constant 0 : index
    %c3_224 = arith.constant 3 : index
    %c0_225 = arith.constant 0 : index
    %c0_226 = arith.constant 0 : index
    %239 = vector.load %arg6[%c0_223, %c3_224, %c0_225, %c0_226] : memref<2x4x32x8xf32, #tpu.memory_space<vmem>>, vector<1x1x32x8xf32>
    %240 = vector.shape_cast %239 : vector<1x1x32x8xf32> to vector<32x8xf32>
    %cst_227 = arith.constant dense<0.000000e+00> : vector<8x8xf32>
    %241 = tpu.matmul %13, %240, %cst_227 {dimension_numbers = #tpu.dot_dimension_numbers<[1], [0], [0], [1], [0, 0, 1, 1], [], []>} : vector<8x32xf32>, vector<32x8xf32>, vector<8x8xf32> -> vector<8x8xf32>
    %c0_228 = arith.constant 0 : index
    %c3_229 = arith.constant 3 : index
    %c0_230 = arith.constant 0 : index
    %c0_231 = arith.constant 0 : index
    %242 = vector.load %arg7[%c0_228, %c3_229, %c0_230, %c0_231] : memref<2x4x32x8xf32, #tpu.memory_space<vmem>>, vector<1x1x32x8xf32>
    %243 = vector.shape_cast %242 : vector<1x1x32x8xf32> to vector<32x8xf32>
    %cst_232 = arith.constant dense<0.000000e+00> : vector<8x8xf32>
    %244 = tpu.matmul %13, %243, %cst_232 {dimension_numbers = #tpu.dot_dimension_numbers<[1], [0], [0], [1], [0, 0, 1, 1], [], []>} : vector<8x32xf32>, vector<32x8xf32>, vector<8x8xf32> -> vector<8x8xf32>
    %cst_233 = arith.constant dense<0.000000e+00> : vector<8x8xf32>
    %245 = tpu.matmul %238, %241, %cst_233 {dimension_numbers = #tpu.dot_dimension_numbers<[1], [1], [0], [0], [0, 0, 1, 0], [], []>} : vector<8x8xf32>, vector<8x8xf32>, vector<8x8xf32> -> vector<8x8xf32>
    %cst_234 = arith.constant 0.353553385 : f32
    %246 = vector.broadcast %cst_234 : f32 to vector<8x8xf32>
    %247 = arith.mulf %245, %246 : vector<8x8xf32>
    %cst_235 = arith.constant dense<0xFF800000> : vector<8xf32>
    %248 = vector.multi_reduction <maximumf>, %247, %cst_235 [1] : vector<8x8xf32> to vector<8xf32>
    %249 = vector.shape_cast %248 : vector<8xf32> to vector<8x1xf32>
    %250 = vector.broadcast %249 : vector<8x1xf32> to vector<8x8xf32>
    %251 = arith.subf %247, %250 : vector<8x8xf32>
    %252 = math.exp %251 : vector<8x8xf32>
    %cst_236 = arith.constant dense<0.000000e+00> : vector<8xf32>
    %253 = vector.multi_reduction <add>, %252, %cst_236 [1] : vector<8x8xf32> to vector<8xf32>
    %254 = vector.shape_cast %253 : vector<8xf32> to vector<8x1xf32>
    %255 = vector.broadcast %254 : vector<8x1xf32> to vector<8x8xf32>
    %256 = arith.divf %252, %255 : vector<8x8xf32>
    %cst_237 = arith.constant dense<0.000000e+00> : vector<8x8xf32>
    %257 = tpu.matmul %256, %244, %cst_237 {dimension_numbers = #tpu.dot_dimension_numbers<[1], [0], [0], [1], [0, 0, 1, 1], [], []>} : vector<8x8xf32>, vector<8x8xf32>, vector<8x8xf32> -> vector<8x8xf32>
    %c0_238 = arith.constant 0 : index
    %c3_239 = arith.constant 3 : index
    %c0_240 = arith.constant 0 : index
    %c0_241 = arith.constant 0 : index
    %258 = vector.load %arg8[%c0_238, %c3_239, %c0_240, %c0_241] : memref<2x4x8x32xf32, #tpu.memory_space<vmem>>, vector<1x1x8x32xf32>
    %259 = vector.shape_cast %258 : vector<1x1x8x32xf32> to vector<8x32xf32>
    %cst_242 = arith.constant dense<0.000000e+00> : vector<8x32xf32>
    %260 = tpu.matmul %257, %259, %cst_242 {dimension_numbers = #tpu.dot_dimension_numbers<[1], [0], [0], [1], [0, 0, 1, 1], [], []>} : vector<8x8xf32>, vector<8x32xf32>, vector<8x32xf32> -> vector<8x32xf32>
    %261 = arith.addf %235, %260 : vector<8x32xf32>
    %c0_243 = arith.constant 0 : index
    %c0_244 = arith.constant 0 : index
    %c0_245 = arith.constant 0 : index
    %262 = vector.load %arg9[%c0_243, %c0_244, %c0_245] : memref<2x1x32xf32, #tpu.memory_space<vmem>>, vector<1x1x32xf32>
    %263 = vector.shape_cast %262 : vector<1x1x32xf32> to vector<1x32xf32>
    %264 = vector.broadcast %263 : vector<1x32xf32> to vector<8x32xf32>
    %265 = arith.addf %261, %264 : vector<8x32xf32>
    %266 = arith.addf %13, %265 : vector<8x32xf32>
    %c0_246 = arith.constant 0 : index
    %c0_247 = arith.constant 0 : index
    %c0_248 = arith.constant 0 : index
    %267 = vector.load %arg10[%c0_246, %c0_247, %c0_248] : memref<2x1x32xf32, #tpu.memory_space<vmem>>, vector<1x1x32xf32>
    %268 = vector.shape_cast %267 : vector<1x1x32xf32> to vector<1x32xf32>
    %269 = vector.broadcast %268 : vector<1x32xf32> to vector<8x32xf32>
    %270 = arith.mulf %266, %269 : vector<8x32xf32>
    %c0_249 = arith.constant 0 : index
    %c0_250 = arith.constant 0 : index
    %c0_251 = arith.constant 0 : index
    %271 = vector.load %arg11[%c0_249, %c0_250, %c0_251] : memref<2x1x32xf32, #tpu.memory_space<vmem>>, vector<1x1x32xf32>
    %272 = vector.shape_cast %271 : vector<1x1x32xf32> to vector<1x32xf32>
    %273 = vector.broadcast %272 : vector<1x32xf32> to vector<8x32xf32>
    %274 = arith.addf %270, %273 : vector<8x32xf32>
    %c0_252 = arith.constant 0 : index
    %c0_253 = arith.constant 0 : index
    %c0_254 = arith.constant 0 : index
    %275 = vector.load %arg12[%c0_252, %c0_253, %c0_254] : memref<2x32x64xf32, #tpu.memory_space<vmem>>, vector<1x32x64xf32>
    %276 = vector.shape_cast %275 : vector<1x32x64xf32> to vector<32x64xf32>
    %cst_255 = arith.constant dense<0.000000e+00> : vector<8x64xf32>
    %277 = tpu.matmul %274, %276, %cst_255 {dimension_numbers = #tpu.dot_dimension_numbers<[1], [0], [0], [1], [0, 0, 1, 1], [], []>} : vector<8x32xf32>, vector<32x64xf32>, vector<8x64xf32> -> vector<8x64xf32>
    %c0_256 = arith.constant 0 : index
    %c0_257 = arith.constant 0 : index
    %c0_258 = arith.constant 0 : index
    %278 = vector.load %arg13[%c0_256, %c0_257, %c0_258] : memref<2x1x64xf32, #tpu.memory_space<vmem>>, vector<1x1x64xf32>
    %279 = vector.shape_cast %278 : vector<1x1x64xf32> to vector<1x64xf32>
    %280 = vector.broadcast %279 : vector<1x64xf32> to vector<8x64xf32>
    %281 = arith.addf %277, %280 : vector<8x64xf32>
    %cst_259 = arith.constant 0.000000e+00 : f32
    %282 = vector.broadcast %cst_259 : f32 to vector<8x64xf32>
    %283 = arith.maximumf %281, %282 : vector<8x64xf32>
    %c0_260 = arith.constant 0 : index
    %c0_261 = arith.constant 0 : index
    %c0_262 = arith.constant 0 : index
    %284 = vector.load %arg14[%c0_260, %c0_261, %c0_262] : memref<2x64x32xf32, #tpu.memory_space<vmem>>, vector<1x64x32xf32>
    %285 = vector.shape_cast %284 : vector<1x64x32xf32> to vector<64x32xf32>
    %cst_263 = arith.constant dense<0.000000e+00> : vector<8x32xf32>
    %286 = tpu.matmul %283, %285, %cst_263 {dimension_numbers = #tpu.dot_dimension_numbers<[1], [0], [0], [1], [0, 0, 1, 1], [], []>} : vector<8x64xf32>, vector<64x32xf32>, vector<8x32xf32> -> vector<8x32xf32>
    %c0_264 = arith.constant 0 : index
    %c0_265 = arith.constant 0 : index
    %c0_266 = arith.constant 0 : index
    %287 = vector.load %arg15[%c0_264, %c0_265, %c0_266] : memref<2x1x32xf32, #tpu.memory_space<vmem>>, vector<1x1x32xf32>
    %288 = vector.shape_cast %287 : vector<1x1x32xf32> to vector<1x32xf32>
    %289 = vector.broadcast %288 : vector<1x32xf32> to vector<8x32xf32>
    %290 = arith.addf %286, %289 : vector<8x32xf32>
    %291 = arith.addf %274, %290 : vector<8x32xf32>
    %c0_267 = arith.constant 0 : index
    %c0_268 = arith.constant 0 : index
    %c0_269 = arith.constant 0 : index
    %292 = vector.load %arg16[%c0_267, %c0_268, %c0_269] : memref<2x1x32xf32, #tpu.memory_space<vmem>>, vector<1x1x32xf32>
    %293 = vector.shape_cast %292 : vector<1x1x32xf32> to vector<1x32xf32>
    %294 = vector.broadcast %293 : vector<1x32xf32> to vector<8x32xf32>
    %295 = arith.mulf %291, %294 : vector<8x32xf32>
    %c0_270 = arith.constant 0 : index
    %c0_271 = arith.constant 0 : index
    %c0_272 = arith.constant 0 : index
    %296 = vector.load %arg17[%c0_270, %c0_271, %c0_272] : memref<2x1x32xf32, #tpu.memory_space<vmem>>, vector<1x1x32xf32>
    %297 = vector.shape_cast %296 : vector<1x1x32xf32> to vector<1x32xf32>
    %298 = vector.broadcast %297 : vector<1x32xf32> to vector<8x32xf32>
    %299 = arith.addf %295, %298 : vector<8x32xf32>
    %cst_273 = arith.constant 0.000000e+00 : f32
    %300 = vector.broadcast %cst_273 : f32 to vector<8x32xf32>
    %c1_274 = arith.constant 1 : index
    %c0_275 = arith.constant 0 : index
    %c0_276 = arith.constant 0 : index
    %c0_277 = arith.constant 0 : index
    %301 = vector.load %arg5[%c1_274, %c0_275, %c0_276, %c0_277] : memref<2x4x32x8xf32, #tpu.memory_space<vmem>>, vector<1x1x32x8xf32>
    %302 = vector.shape_cast %301 : vector<1x1x32x8xf32> to vector<32x8xf32>
    %cst_278 = arith.constant dense<0.000000e+00> : vector<8x8xf32>
    %303 = tpu.matmul %156, %302, %cst_278 {dimension_numbers = #tpu.dot_dimension_numbers<[1], [0], [0], [1], [0, 0, 1, 1], [], []>} : vector<8x32xf32>, vector<32x8xf32>, vector<8x8xf32> -> vector<8x8xf32>
    %c1_279 = arith.constant 1 : index
    %c0_280 = arith.constant 0 : index
    %c0_281 = arith.constant 0 : index
    %c0_282 = arith.constant 0 : index
    %304 = vector.load %arg6[%c1_279, %c0_280, %c0_281, %c0_282] : memref<2x4x32x8xf32, #tpu.memory_space<vmem>>, vector<1x1x32x8xf32>
    %305 = vector.shape_cast %304 : vector<1x1x32x8xf32> to vector<32x8xf32>
    %cst_283 = arith.constant dense<0.000000e+00> : vector<8x8xf32>
    %306 = tpu.matmul %156, %305, %cst_283 {dimension_numbers = #tpu.dot_dimension_numbers<[1], [0], [0], [1], [0, 0, 1, 1], [], []>} : vector<8x32xf32>, vector<32x8xf32>, vector<8x8xf32> -> vector<8x8xf32>
    %c1_284 = arith.constant 1 : index
    %c0_285 = arith.constant 0 : index
    %c0_286 = arith.constant 0 : index
    %c0_287 = arith.constant 0 : index
    %307 = vector.load %arg7[%c1_284, %c0_285, %c0_286, %c0_287] : memref<2x4x32x8xf32, #tpu.memory_space<vmem>>, vector<1x1x32x8xf32>
    %308 = vector.shape_cast %307 : vector<1x1x32x8xf32> to vector<32x8xf32>
    %cst_288 = arith.constant dense<0.000000e+00> : vector<8x8xf32>
    %309 = tpu.matmul %156, %308, %cst_288 {dimension_numbers = #tpu.dot_dimension_numbers<[1], [0], [0], [1], [0, 0, 1, 1], [], []>} : vector<8x32xf32>, vector<32x8xf32>, vector<8x8xf32> -> vector<8x8xf32>
    %cst_289 = arith.constant dense<0.000000e+00> : vector<8x8xf32>
    %310 = tpu.matmul %303, %306, %cst_289 {dimension_numbers = #tpu.dot_dimension_numbers<[1], [1], [0], [0], [0, 0, 1, 0], [], []>} : vector<8x8xf32>, vector<8x8xf32>, vector<8x8xf32> -> vector<8x8xf32>
    %cst_290 = arith.constant 0.353553385 : f32
    %311 = vector.broadcast %cst_290 : f32 to vector<8x8xf32>
    %312 = arith.mulf %310, %311 : vector<8x8xf32>
    %cst_291 = arith.constant dense<0xFF800000> : vector<8xf32>
    %313 = vector.multi_reduction <maximumf>, %312, %cst_291 [1] : vector<8x8xf32> to vector<8xf32>
    %314 = vector.shape_cast %313 : vector<8xf32> to vector<8x1xf32>
    %315 = vector.broadcast %314 : vector<8x1xf32> to vector<8x8xf32>
    %316 = arith.subf %312, %315 : vector<8x8xf32>
    %317 = math.exp %316 : vector<8x8xf32>
    %cst_292 = arith.constant dense<0.000000e+00> : vector<8xf32>
    %318 = vector.multi_reduction <add>, %317, %cst_292 [1] : vector<8x8xf32> to vector<8xf32>
    %319 = vector.shape_cast %318 : vector<8xf32> to vector<8x1xf32>
    %320 = vector.broadcast %319 : vector<8x1xf32> to vector<8x8xf32>
    %321 = arith.divf %317, %320 : vector<8x8xf32>
    %cst_293 = arith.constant dense<0.000000e+00> : vector<8x8xf32>
    %322 = tpu.matmul %321, %309, %cst_293 {dimension_numbers = #tpu.dot_dimension_numbers<[1], [0], [0], [1], [0, 0, 1, 1], [], []>} : vector<8x8xf32>, vector<8x8xf32>, vector<8x8xf32> -> vector<8x8xf32>
    %c1_294 = arith.constant 1 : index
    %c0_295 = arith.constant 0 : index
    %c0_296 = arith.constant 0 : index
    %c0_297 = arith.constant 0 : index
    %323 = vector.load %arg8[%c1_294, %c0_295, %c0_296, %c0_297] : memref<2x4x8x32xf32, #tpu.memory_space<vmem>>, vector<1x1x8x32xf32>
    %324 = vector.shape_cast %323 : vector<1x1x8x32xf32> to vector<8x32xf32>
    %cst_298 = arith.constant dense<0.000000e+00> : vector<8x32xf32>
    %325 = tpu.matmul %322, %324, %cst_298 {dimension_numbers = #tpu.dot_dimension_numbers<[1], [0], [0], [1], [0, 0, 1, 1], [], []>} : vector<8x8xf32>, vector<8x32xf32>, vector<8x32xf32> -> vector<8x32xf32>
    %326 = arith.addf %300, %325 : vector<8x32xf32>
    %c1_299 = arith.constant 1 : index
    %c1_300 = arith.constant 1 : index
    %c0_301 = arith.constant 0 : index
    %c0_302 = arith.constant 0 : index
    %327 = vector.load %arg5[%c1_299, %c1_300, %c0_301, %c0_302] : memref<2x4x32x8xf32, #tpu.memory_space<vmem>>, vector<1x1x32x8xf32>
    %328 = vector.shape_cast %327 : vector<1x1x32x8xf32> to vector<32x8xf32>
    %cst_303 = arith.constant dense<0.000000e+00> : vector<8x8xf32>
    %329 = tpu.matmul %156, %328, %cst_303 {dimension_numbers = #tpu.dot_dimension_numbers<[1], [0], [0], [1], [0, 0, 1, 1], [], []>} : vector<8x32xf32>, vector<32x8xf32>, vector<8x8xf32> -> vector<8x8xf32>
    %c1_304 = arith.constant 1 : index
    %c1_305 = arith.constant 1 : index
    %c0_306 = arith.constant 0 : index
    %c0_307 = arith.constant 0 : index
    %330 = vector.load %arg6[%c1_304, %c1_305, %c0_306, %c0_307] : memref<2x4x32x8xf32, #tpu.memory_space<vmem>>, vector<1x1x32x8xf32>
    %331 = vector.shape_cast %330 : vector<1x1x32x8xf32> to vector<32x8xf32>
    %cst_308 = arith.constant dense<0.000000e+00> : vector<8x8xf32>
    %332 = tpu.matmul %156, %331, %cst_308 {dimension_numbers = #tpu.dot_dimension_numbers<[1], [0], [0], [1], [0, 0, 1, 1], [], []>} : vector<8x32xf32>, vector<32x8xf32>, vector<8x8xf32> -> vector<8x8xf32>
    %c1_309 = arith.constant 1 : index
    %c1_310 = arith.constant 1 : index
    %c0_311 = arith.constant 0 : index
    %c0_312 = arith.constant 0 : index
    %333 = vector.load %arg7[%c1_309, %c1_310, %c0_311, %c0_312] : memref<2x4x32x8xf32, #tpu.memory_space<vmem>>, vector<1x1x32x8xf32>
    %334 = vector.shape_cast %333 : vector<1x1x32x8xf32> to vector<32x8xf32>
    %cst_313 = arith.constant dense<0.000000e+00> : vector<8x8xf32>
    %335 = tpu.matmul %156, %334, %cst_313 {dimension_numbers = #tpu.dot_dimension_numbers<[1], [0], [0], [1], [0, 0, 1, 1], [], []>} : vector<8x32xf32>, vector<32x8xf32>, vector<8x8xf32> -> vector<8x8xf32>
    %cst_314 = arith.constant dense<0.000000e+00> : vector<8x8xf32>
    %336 = tpu.matmul %329, %332, %cst_314 {dimension_numbers = #tpu.dot_dimension_numbers<[1], [1], [0], [0], [0, 0, 1, 0], [], []>} : vector<8x8xf32>, vector<8x8xf32>, vector<8x8xf32> -> vector<8x8xf32>
    %cst_315 = arith.constant 0.353553385 : f32
    %337 = vector.broadcast %cst_315 : f32 to vector<8x8xf32>
    %338 = arith.mulf %336, %337 : vector<8x8xf32>
    %cst_316 = arith.constant dense<0xFF800000> : vector<8xf32>
    %339 = vector.multi_reduction <maximumf>, %338, %cst_316 [1] : vector<8x8xf32> to vector<8xf32>
    %340 = vector.shape_cast %339 : vector<8xf32> to vector<8x1xf32>
    %341 = vector.broadcast %340 : vector<8x1xf32> to vector<8x8xf32>
    %342 = arith.subf %338, %341 : vector<8x8xf32>
    %343 = math.exp %342 : vector<8x8xf32>
    %cst_317 = arith.constant dense<0.000000e+00> : vector<8xf32>
    %344 = vector.multi_reduction <add>, %343, %cst_317 [1] : vector<8x8xf32> to vector<8xf32>
    %345 = vector.shape_cast %344 : vector<8xf32> to vector<8x1xf32>
    %346 = vector.broadcast %345 : vector<8x1xf32> to vector<8x8xf32>
    %347 = arith.divf %343, %346 : vector<8x8xf32>
    %cst_318 = arith.constant dense<0.000000e+00> : vector<8x8xf32>
    %348 = tpu.matmul %347, %335, %cst_318 {dimension_numbers = #tpu.dot_dimension_numbers<[1], [0], [0], [1], [0, 0, 1, 1], [], []>} : vector<8x8xf32>, vector<8x8xf32>, vector<8x8xf32> -> vector<8x8xf32>
    %c1_319 = arith.constant 1 : index
    %c1_320 = arith.constant 1 : index
    %c0_321 = arith.constant 0 : index
    %c0_322 = arith.constant 0 : index
    %349 = vector.load %arg8[%c1_319, %c1_320, %c0_321, %c0_322] : memref<2x4x8x32xf32, #tpu.memory_space<vmem>>, vector<1x1x8x32xf32>
    %350 = vector.shape_cast %349 : vector<1x1x8x32xf32> to vector<8x32xf32>
    %cst_323 = arith.constant dense<0.000000e+00> : vector<8x32xf32>
    %351 = tpu.matmul %348, %350, %cst_323 {dimension_numbers = #tpu.dot_dimension_numbers<[1], [0], [0], [1], [0, 0, 1, 1], [], []>} : vector<8x8xf32>, vector<8x32xf32>, vector<8x32xf32> -> vector<8x32xf32>
    %352 = arith.addf %326, %351 : vector<8x32xf32>
    %c1_324 = arith.constant 1 : index
    %c2_325 = arith.constant 2 : index
    %c0_326 = arith.constant 0 : index
    %c0_327 = arith.constant 0 : index
    %353 = vector.load %arg5[%c1_324, %c2_325, %c0_326, %c0_327] : memref<2x4x32x8xf32, #tpu.memory_space<vmem>>, vector<1x1x32x8xf32>
    %354 = vector.shape_cast %353 : vector<1x1x32x8xf32> to vector<32x8xf32>
    %cst_328 = arith.constant dense<0.000000e+00> : vector<8x8xf32>
    %355 = tpu.matmul %156, %354, %cst_328 {dimension_numbers = #tpu.dot_dimension_numbers<[1], [0], [0], [1], [0, 0, 1, 1], [], []>} : vector<8x32xf32>, vector<32x8xf32>, vector<8x8xf32> -> vector<8x8xf32>
    %c1_329 = arith.constant 1 : index
    %c2_330 = arith.constant 2 : index
    %c0_331 = arith.constant 0 : index
    %c0_332 = arith.constant 0 : index
    %356 = vector.load %arg6[%c1_329, %c2_330, %c0_331, %c0_332] : memref<2x4x32x8xf32, #tpu.memory_space<vmem>>, vector<1x1x32x8xf32>
    %357 = vector.shape_cast %356 : vector<1x1x32x8xf32> to vector<32x8xf32>
    %cst_333 = arith.constant dense<0.000000e+00> : vector<8x8xf32>
    %358 = tpu.matmul %156, %357, %cst_333 {dimension_numbers = #tpu.dot_dimension_numbers<[1], [0], [0], [1], [0, 0, 1, 1], [], []>} : vector<8x32xf32>, vector<32x8xf32>, vector<8x8xf32> -> vector<8x8xf32>
    %c1_334 = arith.constant 1 : index
    %c2_335 = arith.constant 2 : index
    %c0_336 = arith.constant 0 : index
    %c0_337 = arith.constant 0 : index
    %359 = vector.load %arg7[%c1_334, %c2_335, %c0_336, %c0_337] : memref<2x4x32x8xf32, #tpu.memory_space<vmem>>, vector<1x1x32x8xf32>
    %360 = vector.shape_cast %359 : vector<1x1x32x8xf32> to vector<32x8xf32>
    %cst_338 = arith.constant dense<0.000000e+00> : vector<8x8xf32>
    %361 = tpu.matmul %156, %360, %cst_338 {dimension_numbers = #tpu.dot_dimension_numbers<[1], [0], [0], [1], [0, 0, 1, 1], [], []>} : vector<8x32xf32>, vector<32x8xf32>, vector<8x8xf32> -> vector<8x8xf32>
    %cst_339 = arith.constant dense<0.000000e+00> : vector<8x8xf32>
    %362 = tpu.matmul %355, %358, %cst_339 {dimension_numbers = #tpu.dot_dimension_numbers<[1], [1], [0], [0], [0, 0, 1, 0], [], []>} : vector<8x8xf32>, vector<8x8xf32>, vector<8x8xf32> -> vector<8x8xf32>
    %cst_340 = arith.constant 0.353553385 : f32
    %363 = vector.broadcast %cst_340 : f32 to vector<8x8xf32>
    %364 = arith.mulf %362, %363 : vector<8x8xf32>
    %cst_341 = arith.constant dense<0xFF800000> : vector<8xf32>
    %365 = vector.multi_reduction <maximumf>, %364, %cst_341 [1] : vector<8x8xf32> to vector<8xf32>
    %366 = vector.shape_cast %365 : vector<8xf32> to vector<8x1xf32>
    %367 = vector.broadcast %366 : vector<8x1xf32> to vector<8x8xf32>
    %368 = arith.subf %364, %367 : vector<8x8xf32>
    %369 = math.exp %368 : vector<8x8xf32>
    %cst_342 = arith.constant dense<0.000000e+00> : vector<8xf32>
    %370 = vector.multi_reduction <add>, %369, %cst_342 [1] : vector<8x8xf32> to vector<8xf32>
    %371 = vector.shape_cast %370 : vector<8xf32> to vector<8x1xf32>
    %372 = vector.broadcast %371 : vector<8x1xf32> to vector<8x8xf32>
    %373 = arith.divf %369, %372 : vector<8x8xf32>
    %cst_343 = arith.constant dense<0.000000e+00> : vector<8x8xf32>
    %374 = tpu.matmul %373, %361, %cst_343 {dimension_numbers = #tpu.dot_dimension_numbers<[1], [0], [0], [1], [0, 0, 1, 1], [], []>} : vector<8x8xf32>, vector<8x8xf32>, vector<8x8xf32> -> vector<8x8xf32>
    %c1_344 = arith.constant 1 : index
    %c2_345 = arith.constant 2 : index
    %c0_346 = arith.constant 0 : index
    %c0_347 = arith.constant 0 : index
    %375 = vector.load %arg8[%c1_344, %c2_345, %c0_346, %c0_347] : memref<2x4x8x32xf32, #tpu.memory_space<vmem>>, vector<1x1x8x32xf32>
    %376 = vector.shape_cast %375 : vector<1x1x8x32xf32> to vector<8x32xf32>
    %cst_348 = arith.constant dense<0.000000e+00> : vector<8x32xf32>
    %377 = tpu.matmul %374, %376, %cst_348 {dimension_numbers = #tpu.dot_dimension_numbers<[1], [0], [0], [1], [0, 0, 1, 1], [], []>} : vector<8x8xf32>, vector<8x32xf32>, vector<8x32xf32> -> vector<8x32xf32>
    %378 = arith.addf %352, %377 : vector<8x32xf32>
    %c1_349 = arith.constant 1 : index
    %c3_350 = arith.constant 3 : index
    %c0_351 = arith.constant 0 : index
    %c0_352 = arith.constant 0 : index
    %379 = vector.load %arg5[%c1_349, %c3_350, %c0_351, %c0_352] : memref<2x4x32x8xf32, #tpu.memory_space<vmem>>, vector<1x1x32x8xf32>
    %380 = vector.shape_cast %379 : vector<1x1x32x8xf32> to vector<32x8xf32>
    %cst_353 = arith.constant dense<0.000000e+00> : vector<8x8xf32>
    %381 = tpu.matmul %156, %380, %cst_353 {dimension_numbers = #tpu.dot_dimension_numbers<[1], [0], [0], [1], [0, 0, 1, 1], [], []>} : vector<8x32xf32>, vector<32x8xf32>, vector<8x8xf32> -> vector<8x8xf32>
    %c1_354 = arith.constant 1 : index
    %c3_355 = arith.constant 3 : index
    %c0_356 = arith.constant 0 : index
    %c0_357 = arith.constant 0 : index
    %382 = vector.load %arg6[%c1_354, %c3_355, %c0_356, %c0_357] : memref<2x4x32x8xf32, #tpu.memory_space<vmem>>, vector<1x1x32x8xf32>
    %383 = vector.shape_cast %382 : vector<1x1x32x8xf32> to vector<32x8xf32>
    %cst_358 = arith.constant dense<0.000000e+00> : vector<8x8xf32>
    %384 = tpu.matmul %156, %383, %cst_358 {dimension_numbers = #tpu.dot_dimension_numbers<[1], [0], [0], [1], [0, 0, 1, 1], [], []>} : vector<8x32xf32>, vector<32x8xf32>, vector<8x8xf32> -> vector<8x8xf32>
    %c1_359 = arith.constant 1 : index
    %c3_360 = arith.constant 3 : index
    %c0_361 = arith.constant 0 : index
    %c0_362 = arith.constant 0 : index
    %385 = vector.load %arg7[%c1_359, %c3_360, %c0_361, %c0_362] : memref<2x4x32x8xf32, #tpu.memory_space<vmem>>, vector<1x1x32x8xf32>
    %386 = vector.shape_cast %385 : vector<1x1x32x8xf32> to vector<32x8xf32>
    %cst_363 = arith.constant dense<0.000000e+00> : vector<8x8xf32>
    %387 = tpu.matmul %156, %386, %cst_363 {dimension_numbers = #tpu.dot_dimension_numbers<[1], [0], [0], [1], [0, 0, 1, 1], [], []>} : vector<8x32xf32>, vector<32x8xf32>, vector<8x8xf32> -> vector<8x8xf32>
    %cst_364 = arith.constant dense<0.000000e+00> : vector<8x8xf32>
    %388 = tpu.matmul %381, %384, %cst_364 {dimension_numbers = #tpu.dot_dimension_numbers<[1], [1], [0], [0], [0, 0, 1, 0], [], []>} : vector<8x8xf32>, vector<8x8xf32>, vector<8x8xf32> -> vector<8x8xf32>
    %cst_365 = arith.constant 0.353553385 : f32
    %389 = vector.broadcast %cst_365 : f32 to vector<8x8xf32>
    %390 = arith.mulf %388, %389 : vector<8x8xf32>
    %cst_366 = arith.constant dense<0xFF800000> : vector<8xf32>
    %391 = vector.multi_reduction <maximumf>, %390, %cst_366 [1] : vector<8x8xf32> to vector<8xf32>
    %392 = vector.shape_cast %391 : vector<8xf32> to vector<8x1xf32>
    %393 = vector.broadcast %392 : vector<8x1xf32> to vector<8x8xf32>
    %394 = arith.subf %390, %393 : vector<8x8xf32>
    %395 = math.exp %394 : vector<8x8xf32>
    %cst_367 = arith.constant dense<0.000000e+00> : vector<8xf32>
    %396 = vector.multi_reduction <add>, %395, %cst_367 [1] : vector<8x8xf32> to vector<8xf32>
    %397 = vector.shape_cast %396 : vector<8xf32> to vector<8x1xf32>
    %398 = vector.broadcast %397 : vector<8x1xf32> to vector<8x8xf32>
    %399 = arith.divf %395, %398 : vector<8x8xf32>
    %cst_368 = arith.constant dense<0.000000e+00> : vector<8x8xf32>
    %400 = tpu.matmul %399, %387, %cst_368 {dimension_numbers = #tpu.dot_dimension_numbers<[1], [0], [0], [1], [0, 0, 1, 1], [], []>} : vector<8x8xf32>, vector<8x8xf32>, vector<8x8xf32> -> vector<8x8xf32>
    %c1_369 = arith.constant 1 : index
    %c3_370 = arith.constant 3 : index
    %c0_371 = arith.constant 0 : index
    %c0_372 = arith.constant 0 : index
    %401 = vector.load %arg8[%c1_369, %c3_370, %c0_371, %c0_372] : memref<2x4x8x32xf32, #tpu.memory_space<vmem>>, vector<1x1x8x32xf32>
    %402 = vector.shape_cast %401 : vector<1x1x8x32xf32> to vector<8x32xf32>
    %cst_373 = arith.constant dense<0.000000e+00> : vector<8x32xf32>
    %403 = tpu.matmul %400, %402, %cst_373 {dimension_numbers = #tpu.dot_dimension_numbers<[1], [0], [0], [1], [0, 0, 1, 1], [], []>} : vector<8x8xf32>, vector<8x32xf32>, vector<8x32xf32> -> vector<8x32xf32>
    %404 = arith.addf %378, %403 : vector<8x32xf32>
    %c1_374 = arith.constant 1 : index
    %c0_375 = arith.constant 0 : index
    %c0_376 = arith.constant 0 : index
    %405 = vector.load %arg9[%c1_374, %c0_375, %c0_376] : memref<2x1x32xf32, #tpu.memory_space<vmem>>, vector<1x1x32xf32>
    %406 = vector.shape_cast %405 : vector<1x1x32xf32> to vector<1x32xf32>
    %407 = vector.broadcast %406 : vector<1x32xf32> to vector<8x32xf32>
    %408 = arith.addf %404, %407 : vector<8x32xf32>
    %409 = arith.addf %156, %408 : vector<8x32xf32>
    %c1_377 = arith.constant 1 : index
    %c0_378 = arith.constant 0 : index
    %c0_379 = arith.constant 0 : index
    %410 = vector.load %arg10[%c1_377, %c0_378, %c0_379] : memref<2x1x32xf32, #tpu.memory_space<vmem>>, vector<1x1x32xf32>
    %411 = vector.shape_cast %410 : vector<1x1x32xf32> to vector<1x32xf32>
    %412 = vector.broadcast %411 : vector<1x32xf32> to vector<8x32xf32>
    %413 = arith.mulf %409, %412 : vector<8x32xf32>
    %c1_380 = arith.constant 1 : index
    %c0_381 = arith.constant 0 : index
    %c0_382 = arith.constant 0 : index
    %414 = vector.load %arg11[%c1_380, %c0_381, %c0_382] : memref<2x1x32xf32, #tpu.memory_space<vmem>>, vector<1x1x32xf32>
    %415 = vector.shape_cast %414 : vector<1x1x32xf32> to vector<1x32xf32>
    %416 = vector.broadcast %415 : vector<1x32xf32> to vector<8x32xf32>
    %417 = arith.addf %413, %416 : vector<8x32xf32>
    %c1_383 = arith.constant 1 : index
    %c0_384 = arith.constant 0 : index
    %c0_385 = arith.constant 0 : index
    %418 = vector.load %arg12[%c1_383, %c0_384, %c0_385] : memref<2x32x64xf32, #tpu.memory_space<vmem>>, vector<1x32x64xf32>
    %419 = vector.shape_cast %418 : vector<1x32x64xf32> to vector<32x64xf32>
    %cst_386 = arith.constant dense<0.000000e+00> : vector<8x64xf32>
    %420 = tpu.matmul %417, %419, %cst_386 {dimension_numbers = #tpu.dot_dimension_numbers<[1], [0], [0], [1], [0, 0, 1, 1], [], []>} : vector<8x32xf32>, vector<32x64xf32>, vector<8x64xf32> -> vector<8x64xf32>
    %c1_387 = arith.constant 1 : index
    %c0_388 = arith.constant 0 : index
    %c0_389 = arith.constant 0 : index
    %421 = vector.load %arg13[%c1_387, %c0_388, %c0_389] : memref<2x1x64xf32, #tpu.memory_space<vmem>>, vector<1x1x64xf32>
    %422 = vector.shape_cast %421 : vector<1x1x64xf32> to vector<1x64xf32>
    %423 = vector.broadcast %422 : vector<1x64xf32> to vector<8x64xf32>
    %424 = arith.addf %420, %423 : vector<8x64xf32>
    %cst_390 = arith.constant 0.000000e+00 : f32
    %425 = vector.broadcast %cst_390 : f32 to vector<8x64xf32>
    %426 = arith.maximumf %424, %425 : vector<8x64xf32>
    %c1_391 = arith.constant 1 : index
    %c0_392 = arith.constant 0 : index
    %c0_393 = arith.constant 0 : index
    %427 = vector.load %arg14[%c1_391, %c0_392, %c0_393] : memref<2x64x32xf32, #tpu.memory_space<vmem>>, vector<1x64x32xf32>
    %428 = vector.shape_cast %427 : vector<1x64x32xf32> to vector<64x32xf32>
    %cst_394 = arith.constant dense<0.000000e+00> : vector<8x32xf32>
    %429 = tpu.matmul %426, %428, %cst_394 {dimension_numbers = #tpu.dot_dimension_numbers<[1], [0], [0], [1], [0, 0, 1, 1], [], []>} : vector<8x64xf32>, vector<64x32xf32>, vector<8x32xf32> -> vector<8x32xf32>
    %c1_395 = arith.constant 1 : index
    %c0_396 = arith.constant 0 : index
    %c0_397 = arith.constant 0 : index
    %430 = vector.load %arg15[%c1_395, %c0_396, %c0_397] : memref<2x1x32xf32, #tpu.memory_space<vmem>>, vector<1x1x32xf32>
    %431 = vector.shape_cast %430 : vector<1x1x32xf32> to vector<1x32xf32>
    %432 = vector.broadcast %431 : vector<1x32xf32> to vector<8x32xf32>
    %433 = arith.addf %429, %432 : vector<8x32xf32>
    %434 = arith.addf %417, %433 : vector<8x32xf32>
    %c1_398 = arith.constant 1 : index
    %c0_399 = arith.constant 0 : index
    %c0_400 = arith.constant 0 : index
    %435 = vector.load %arg16[%c1_398, %c0_399, %c0_400] : memref<2x1x32xf32, #tpu.memory_space<vmem>>, vector<1x1x32xf32>
    %436 = vector.shape_cast %435 : vector<1x1x32xf32> to vector<1x32xf32>
    %437 = vector.broadcast %436 : vector<1x32xf32> to vector<8x32xf32>
    %438 = arith.mulf %434, %437 : vector<8x32xf32>
    %c1_401 = arith.constant 1 : index
    %c0_402 = arith.constant 0 : index
    %c0_403 = arith.constant 0 : index
    %439 = vector.load %arg17[%c1_401, %c0_402, %c0_403] : memref<2x1x32xf32, #tpu.memory_space<vmem>>, vector<1x1x32xf32>
    %440 = vector.shape_cast %439 : vector<1x1x32xf32> to vector<1x32xf32>
    %441 = vector.broadcast %440 : vector<1x32xf32> to vector<8x32xf32>
    %442 = arith.addf %438, %441 : vector<8x32xf32>
    %cst_404 = arith.constant 0.000000e+00 : f32
    %443 = vector.broadcast %cst_404 : f32 to vector<8x32xf32>
    %c1_405 = arith.constant 1 : index
    %c0_406 = arith.constant 0 : index
    %c0_407 = arith.constant 0 : index
    %c0_408 = arith.constant 0 : index
    %444 = vector.load %arg5[%c1_405, %c0_406, %c0_407, %c0_408] : memref<2x4x32x8xf32, #tpu.memory_space<vmem>>, vector<1x1x32x8xf32>
    %445 = vector.shape_cast %444 : vector<1x1x32x8xf32> to vector<32x8xf32>
    %cst_409 = arith.constant dense<0.000000e+00> : vector<8x8xf32>
    %446 = tpu.matmul %299, %445, %cst_409 {dimension_numbers = #tpu.dot_dimension_numbers<[1], [0], [0], [1], [0, 0, 1, 1], [], []>} : vector<8x32xf32>, vector<32x8xf32>, vector<8x8xf32> -> vector<8x8xf32>
    %c1_410 = arith.constant 1 : index
    %c0_411 = arith.constant 0 : index
    %c0_412 = arith.constant 0 : index
    %c0_413 = arith.constant 0 : index
    %447 = vector.load %arg6[%c1_410, %c0_411, %c0_412, %c0_413] : memref<2x4x32x8xf32, #tpu.memory_space<vmem>>, vector<1x1x32x8xf32>
    %448 = vector.shape_cast %447 : vector<1x1x32x8xf32> to vector<32x8xf32>
    %cst_414 = arith.constant dense<0.000000e+00> : vector<8x8xf32>
    %449 = tpu.matmul %299, %448, %cst_414 {dimension_numbers = #tpu.dot_dimension_numbers<[1], [0], [0], [1], [0, 0, 1, 1], [], []>} : vector<8x32xf32>, vector<32x8xf32>, vector<8x8xf32> -> vector<8x8xf32>
    %c1_415 = arith.constant 1 : index
    %c0_416 = arith.constant 0 : index
    %c0_417 = arith.constant 0 : index
    %c0_418 = arith.constant 0 : index
    %450 = vector.load %arg7[%c1_415, %c0_416, %c0_417, %c0_418] : memref<2x4x32x8xf32, #tpu.memory_space<vmem>>, vector<1x1x32x8xf32>
    %451 = vector.shape_cast %450 : vector<1x1x32x8xf32> to vector<32x8xf32>
    %cst_419 = arith.constant dense<0.000000e+00> : vector<8x8xf32>
    %452 = tpu.matmul %299, %451, %cst_419 {dimension_numbers = #tpu.dot_dimension_numbers<[1], [0], [0], [1], [0, 0, 1, 1], [], []>} : vector<8x32xf32>, vector<32x8xf32>, vector<8x8xf32> -> vector<8x8xf32>
    %cst_420 = arith.constant dense<0.000000e+00> : vector<8x8xf32>
    %453 = tpu.matmul %446, %449, %cst_420 {dimension_numbers = #tpu.dot_dimension_numbers<[1], [1], [0], [0], [0, 0, 1, 0], [], []>} : vector<8x8xf32>, vector<8x8xf32>, vector<8x8xf32> -> vector<8x8xf32>
    %cst_421 = arith.constant 0.353553385 : f32
    %454 = vector.broadcast %cst_421 : f32 to vector<8x8xf32>
    %455 = arith.mulf %453, %454 : vector<8x8xf32>
    %cst_422 = arith.constant dense<0xFF800000> : vector<8xf32>
    %456 = vector.multi_reduction <maximumf>, %455, %cst_422 [1] : vector<8x8xf32> to vector<8xf32>
    %457 = vector.shape_cast %456 : vector<8xf32> to vector<8x1xf32>
    %458 = vector.broadcast %457 : vector<8x1xf32> to vector<8x8xf32>
    %459 = arith.subf %455, %458 : vector<8x8xf32>
    %460 = math.exp %459 : vector<8x8xf32>
    %cst_423 = arith.constant dense<0.000000e+00> : vector<8xf32>
    %461 = vector.multi_reduction <add>, %460, %cst_423 [1] : vector<8x8xf32> to vector<8xf32>
    %462 = vector.shape_cast %461 : vector<8xf32> to vector<8x1xf32>
    %463 = vector.broadcast %462 : vector<8x1xf32> to vector<8x8xf32>
    %464 = arith.divf %460, %463 : vector<8x8xf32>
    %cst_424 = arith.constant dense<0.000000e+00> : vector<8x8xf32>
    %465 = tpu.matmul %464, %452, %cst_424 {dimension_numbers = #tpu.dot_dimension_numbers<[1], [0], [0], [1], [0, 0, 1, 1], [], []>} : vector<8x8xf32>, vector<8x8xf32>, vector<8x8xf32> -> vector<8x8xf32>
    %c1_425 = arith.constant 1 : index
    %c0_426 = arith.constant 0 : index
    %c0_427 = arith.constant 0 : index
    %c0_428 = arith.constant 0 : index
    %466 = vector.load %arg8[%c1_425, %c0_426, %c0_427, %c0_428] : memref<2x4x8x32xf32, #tpu.memory_space<vmem>>, vector<1x1x8x32xf32>
    %467 = vector.shape_cast %466 : vector<1x1x8x32xf32> to vector<8x32xf32>
    %cst_429 = arith.constant dense<0.000000e+00> : vector<8x32xf32>
    %468 = tpu.matmul %465, %467, %cst_429 {dimension_numbers = #tpu.dot_dimension_numbers<[1], [0], [0], [1], [0, 0, 1, 1], [], []>} : vector<8x8xf32>, vector<8x32xf32>, vector<8x32xf32> -> vector<8x32xf32>
    %469 = arith.addf %443, %468 : vector<8x32xf32>
    %c1_430 = arith.constant 1 : index
    %c1_431 = arith.constant 1 : index
    %c0_432 = arith.constant 0 : index
    %c0_433 = arith.constant 0 : index
    %470 = vector.load %arg5[%c1_430, %c1_431, %c0_432, %c0_433] : memref<2x4x32x8xf32, #tpu.memory_space<vmem>>, vector<1x1x32x8xf32>
    %471 = vector.shape_cast %470 : vector<1x1x32x8xf32> to vector<32x8xf32>
    %cst_434 = arith.constant dense<0.000000e+00> : vector<8x8xf32>
    %472 = tpu.matmul %299, %471, %cst_434 {dimension_numbers = #tpu.dot_dimension_numbers<[1], [0], [0], [1], [0, 0, 1, 1], [], []>} : vector<8x32xf32>, vector<32x8xf32>, vector<8x8xf32> -> vector<8x8xf32>
    %c1_435 = arith.constant 1 : index
    %c1_436 = arith.constant 1 : index
    %c0_437 = arith.constant 0 : index
    %c0_438 = arith.constant 0 : index
    %473 = vector.load %arg6[%c1_435, %c1_436, %c0_437, %c0_438] : memref<2x4x32x8xf32, #tpu.memory_space<vmem>>, vector<1x1x32x8xf32>
    %474 = vector.shape_cast %473 : vector<1x1x32x8xf32> to vector<32x8xf32>
    %cst_439 = arith.constant dense<0.000000e+00> : vector<8x8xf32>
    %475 = tpu.matmul %299, %474, %cst_439 {dimension_numbers = #tpu.dot_dimension_numbers<[1], [0], [0], [1], [0, 0, 1, 1], [], []>} : vector<8x32xf32>, vector<32x8xf32>, vector<8x8xf32> -> vector<8x8xf32>
    %c1_440 = arith.constant 1 : index
    %c1_441 = arith.constant 1 : index
    %c0_442 = arith.constant 0 : index
    %c0_443 = arith.constant 0 : index
    %476 = vector.load %arg7[%c1_440, %c1_441, %c0_442, %c0_443] : memref<2x4x32x8xf32, #tpu.memory_space<vmem>>, vector<1x1x32x8xf32>
    %477 = vector.shape_cast %476 : vector<1x1x32x8xf32> to vector<32x8xf32>
    %cst_444 = arith.constant dense<0.000000e+00> : vector<8x8xf32>
    %478 = tpu.matmul %299, %477, %cst_444 {dimension_numbers = #tpu.dot_dimension_numbers<[1], [0], [0], [1], [0, 0, 1, 1], [], []>} : vector<8x32xf32>, vector<32x8xf32>, vector<8x8xf32> -> vector<8x8xf32>
    %cst_445 = arith.constant dense<0.000000e+00> : vector<8x8xf32>
    %479 = tpu.matmul %472, %475, %cst_445 {dimension_numbers = #tpu.dot_dimension_numbers<[1], [1], [0], [0], [0, 0, 1, 0], [], []>} : vector<8x8xf32>, vector<8x8xf32>, vector<8x8xf32> -> vector<8x8xf32>
    %cst_446 = arith.constant 0.353553385 : f32
    %480 = vector.broadcast %cst_446 : f32 to vector<8x8xf32>
    %481 = arith.mulf %479, %480 : vector<8x8xf32>
    %cst_447 = arith.constant dense<0xFF800000> : vector<8xf32>
    %482 = vector.multi_reduction <maximumf>, %481, %cst_447 [1] : vector<8x8xf32> to vector<8xf32>
    %483 = vector.shape_cast %482 : vector<8xf32> to vector<8x1xf32>
    %484 = vector.broadcast %483 : vector<8x1xf32> to vector<8x8xf32>
    %485 = arith.subf %481, %484 : vector<8x8xf32>
    %486 = math.exp %485 : vector<8x8xf32>
    %cst_448 = arith.constant dense<0.000000e+00> : vector<8xf32>
    %487 = vector.multi_reduction <add>, %486, %cst_448 [1] : vector<8x8xf32> to vector<8xf32>
    %488 = vector.shape_cast %487 : vector<8xf32> to vector<8x1xf32>
    %489 = vector.broadcast %488 : vector<8x1xf32> to vector<8x8xf32>
    %490 = arith.divf %486, %489 : vector<8x8xf32>
    %cst_449 = arith.constant dense<0.000000e+00> : vector<8x8xf32>
    %491 = tpu.matmul %490, %478, %cst_449 {dimension_numbers = #tpu.dot_dimension_numbers<[1], [0], [0], [1], [0, 0, 1, 1], [], []>} : vector<8x8xf32>, vector<8x8xf32>, vector<8x8xf32> -> vector<8x8xf32>
    %c1_450 = arith.constant 1 : index
    %c1_451 = arith.constant 1 : index
    %c0_452 = arith.constant 0 : index
    %c0_453 = arith.constant 0 : index
    %492 = vector.load %arg8[%c1_450, %c1_451, %c0_452, %c0_453] : memref<2x4x8x32xf32, #tpu.memory_space<vmem>>, vector<1x1x8x32xf32>
    %493 = vector.shape_cast %492 : vector<1x1x8x32xf32> to vector<8x32xf32>
    %cst_454 = arith.constant dense<0.000000e+00> : vector<8x32xf32>
    %494 = tpu.matmul %491, %493, %cst_454 {dimension_numbers = #tpu.dot_dimension_numbers<[1], [0], [0], [1], [0, 0, 1, 1], [], []>} : vector<8x8xf32>, vector<8x32xf32>, vector<8x32xf32> -> vector<8x32xf32>
    %495 = arith.addf %469, %494 : vector<8x32xf32>
    %c1_455 = arith.constant 1 : index
    %c2_456 = arith.constant 2 : index
    %c0_457 = arith.constant 0 : index
    %c0_458 = arith.constant 0 : index
    %496 = vector.load %arg5[%c1_455, %c2_456, %c0_457, %c0_458] : memref<2x4x32x8xf32, #tpu.memory_space<vmem>>, vector<1x1x32x8xf32>
    %497 = vector.shape_cast %496 : vector<1x1x32x8xf32> to vector<32x8xf32>
    %cst_459 = arith.constant dense<0.000000e+00> : vector<8x8xf32>
    %498 = tpu.matmul %299, %497, %cst_459 {dimension_numbers = #tpu.dot_dimension_numbers<[1], [0], [0], [1], [0, 0, 1, 1], [], []>} : vector<8x32xf32>, vector<32x8xf32>, vector<8x8xf32> -> vector<8x8xf32>
    %c1_460 = arith.constant 1 : index
    %c2_461 = arith.constant 2 : index
    %c0_462 = arith.constant 0 : index
    %c0_463 = arith.constant 0 : index
    %499 = vector.load %arg6[%c1_460, %c2_461, %c0_462, %c0_463] : memref<2x4x32x8xf32, #tpu.memory_space<vmem>>, vector<1x1x32x8xf32>
    %500 = vector.shape_cast %499 : vector<1x1x32x8xf32> to vector<32x8xf32>
    %cst_464 = arith.constant dense<0.000000e+00> : vector<8x8xf32>
    %501 = tpu.matmul %299, %500, %cst_464 {dimension_numbers = #tpu.dot_dimension_numbers<[1], [0], [0], [1], [0, 0, 1, 1], [], []>} : vector<8x32xf32>, vector<32x8xf32>, vector<8x8xf32> -> vector<8x8xf32>
    %c1_465 = arith.constant 1 : index
    %c2_466 = arith.constant 2 : index
    %c0_467 = arith.constant 0 : index
    %c0_468 = arith.constant 0 : index
    %502 = vector.load %arg7[%c1_465, %c2_466, %c0_467, %c0_468] : memref<2x4x32x8xf32, #tpu.memory_space<vmem>>, vector<1x1x32x8xf32>
    %503 = vector.shape_cast %502 : vector<1x1x32x8xf32> to vector<32x8xf32>
    %cst_469 = arith.constant dense<0.000000e+00> : vector<8x8xf32>
    %504 = tpu.matmul %299, %503, %cst_469 {dimension_numbers = #tpu.dot_dimension_numbers<[1], [0], [0], [1], [0, 0, 1, 1], [], []>} : vector<8x32xf32>, vector<32x8xf32>, vector<8x8xf32> -> vector<8x8xf32>
    %cst_470 = arith.constant dense<0.000000e+00> : vector<8x8xf32>
    %505 = tpu.matmul %498, %501, %cst_470 {dimension_numbers = #tpu.dot_dimension_numbers<[1], [1], [0], [0], [0, 0, 1, 0], [], []>} : vector<8x8xf32>, vector<8x8xf32>, vector<8x8xf32> -> vector<8x8xf32>
    %cst_471 = arith.constant 0.353553385 : f32
    %506 = vector.broadcast %cst_471 : f32 to vector<8x8xf32>
    %507 = arith.mulf %505, %506 : vector<8x8xf32>
    %cst_472 = arith.constant dense<0xFF800000> : vector<8xf32>
    %508 = vector.multi_reduction <maximumf>, %507, %cst_472 [1] : vector<8x8xf32> to vector<8xf32>
    %509 = vector.shape_cast %508 : vector<8xf32> to vector<8x1xf32>
    %510 = vector.broadcast %509 : vector<8x1xf32> to vector<8x8xf32>
    %511 = arith.subf %507, %510 : vector<8x8xf32>
    %512 = math.exp %511 : vector<8x8xf32>
    %cst_473 = arith.constant dense<0.000000e+00> : vector<8xf32>
    %513 = vector.multi_reduction <add>, %512, %cst_473 [1] : vector<8x8xf32> to vector<8xf32>
    %514 = vector.shape_cast %513 : vector<8xf32> to vector<8x1xf32>
    %515 = vector.broadcast %514 : vector<8x1xf32> to vector<8x8xf32>
    %516 = arith.divf %512, %515 : vector<8x8xf32>
    %cst_474 = arith.constant dense<0.000000e+00> : vector<8x8xf32>
    %517 = tpu.matmul %516, %504, %cst_474 {dimension_numbers = #tpu.dot_dimension_numbers<[1], [0], [0], [1], [0, 0, 1, 1], [], []>} : vector<8x8xf32>, vector<8x8xf32>, vector<8x8xf32> -> vector<8x8xf32>
    %c1_475 = arith.constant 1 : index
    %c2_476 = arith.constant 2 : index
    %c0_477 = arith.constant 0 : index
    %c0_478 = arith.constant 0 : index
    %518 = vector.load %arg8[%c1_475, %c2_476, %c0_477, %c0_478] : memref<2x4x8x32xf32, #tpu.memory_space<vmem>>, vector<1x1x8x32xf32>
    %519 = vector.shape_cast %518 : vector<1x1x8x32xf32> to vector<8x32xf32>
    %cst_479 = arith.constant dense<0.000000e+00> : vector<8x32xf32>
    %520 = tpu.matmul %517, %519, %cst_479 {dimension_numbers = #tpu.dot_dimension_numbers<[1], [0], [0], [1], [0, 0, 1, 1], [], []>} : vector<8x8xf32>, vector<8x32xf32>, vector<8x32xf32> -> vector<8x32xf32>
    %521 = arith.addf %495, %520 : vector<8x32xf32>
    %c1_480 = arith.constant 1 : index
    %c3_481 = arith.constant 3 : index
    %c0_482 = arith.constant 0 : index
    %c0_483 = arith.constant 0 : index
    %522 = vector.load %arg5[%c1_480, %c3_481, %c0_482, %c0_483] : memref<2x4x32x8xf32, #tpu.memory_space<vmem>>, vector<1x1x32x8xf32>
    %523 = vector.shape_cast %522 : vector<1x1x32x8xf32> to vector<32x8xf32>
    %cst_484 = arith.constant dense<0.000000e+00> : vector<8x8xf32>
    %524 = tpu.matmul %299, %523, %cst_484 {dimension_numbers = #tpu.dot_dimension_numbers<[1], [0], [0], [1], [0, 0, 1, 1], [], []>} : vector<8x32xf32>, vector<32x8xf32>, vector<8x8xf32> -> vector<8x8xf32>
    %c1_485 = arith.constant 1 : index
    %c3_486 = arith.constant 3 : index
    %c0_487 = arith.constant 0 : index
    %c0_488 = arith.constant 0 : index
    %525 = vector.load %arg6[%c1_485, %c3_486, %c0_487, %c0_488] : memref<2x4x32x8xf32, #tpu.memory_space<vmem>>, vector<1x1x32x8xf32>
    %526 = vector.shape_cast %525 : vector<1x1x32x8xf32> to vector<32x8xf32>
    %cst_489 = arith.constant dense<0.000000e+00> : vector<8x8xf32>
    %527 = tpu.matmul %299, %526, %cst_489 {dimension_numbers = #tpu.dot_dimension_numbers<[1], [0], [0], [1], [0, 0, 1, 1], [], []>} : vector<8x32xf32>, vector<32x8xf32>, vector<8x8xf32> -> vector<8x8xf32>
    %c1_490 = arith.constant 1 : index
    %c3_491 = arith.constant 3 : index
    %c0_492 = arith.constant 0 : index
    %c0_493 = arith.constant 0 : index
    %528 = vector.load %arg7[%c1_490, %c3_491, %c0_492, %c0_493] : memref<2x4x32x8xf32, #tpu.memory_space<vmem>>, vector<1x1x32x8xf32>
    %529 = vector.shape_cast %528 : vector<1x1x32x8xf32> to vector<32x8xf32>
    %cst_494 = arith.constant dense<0.000000e+00> : vector<8x8xf32>
    %530 = tpu.matmul %299, %529, %cst_494 {dimension_numbers = #tpu.dot_dimension_numbers<[1], [0], [0], [1], [0, 0, 1, 1], [], []>} : vector<8x32xf32>, vector<32x8xf32>, vector<8x8xf32> -> vector<8x8xf32>
    %cst_495 = arith.constant dense<0.000000e+00> : vector<8x8xf32>
    %531 = tpu.matmul %524, %527, %cst_495 {dimension_numbers = #tpu.dot_dimension_numbers<[1], [1], [0], [0], [0, 0, 1, 0], [], []>} : vector<8x8xf32>, vector<8x8xf32>, vector<8x8xf32> -> vector<8x8xf32>
    %cst_496 = arith.constant 0.353553385 : f32
    %532 = vector.broadcast %cst_496 : f32 to vector<8x8xf32>
    %533 = arith.mulf %531, %532 : vector<8x8xf32>
    %cst_497 = arith.constant dense<0xFF800000> : vector<8xf32>
    %534 = vector.multi_reduction <maximumf>, %533, %cst_497 [1] : vector<8x8xf32> to vector<8xf32>
    %535 = vector.shape_cast %534 : vector<8xf32> to vector<8x1xf32>
    %536 = vector.broadcast %535 : vector<8x1xf32> to vector<8x8xf32>
    %537 = arith.subf %533, %536 : vector<8x8xf32>
    %538 = math.exp %537 : vector<8x8xf32>
    %cst_498 = arith.constant dense<0.000000e+00> : vector<8xf32>
    %539 = vector.multi_reduction <add>, %538, %cst_498 [1] : vector<8x8xf32> to vector<8xf32>
    %540 = vector.shape_cast %539 : vector<8xf32> to vector<8x1xf32>
    %541 = vector.broadcast %540 : vector<8x1xf32> to vector<8x8xf32>
    %542 = arith.divf %538, %541 : vector<8x8xf32>
    %cst_499 = arith.constant dense<0.000000e+00> : vector<8x8xf32>
    %543 = tpu.matmul %542, %530, %cst_499 {dimension_numbers = #tpu.dot_dimension_numbers<[1], [0], [0], [1], [0, 0, 1, 1], [], []>} : vector<8x8xf32>, vector<8x8xf32>, vector<8x8xf32> -> vector<8x8xf32>
    %c1_500 = arith.constant 1 : index
    %c3_501 = arith.constant 3 : index
    %c0_502 = arith.constant 0 : index
    %c0_503 = arith.constant 0 : index
    %544 = vector.load %arg8[%c1_500, %c3_501, %c0_502, %c0_503] : memref<2x4x8x32xf32, #tpu.memory_space<vmem>>, vector<1x1x8x32xf32>
    %545 = vector.shape_cast %544 : vector<1x1x8x32xf32> to vector<8x32xf32>
    %cst_504 = arith.constant dense<0.000000e+00> : vector<8x32xf32>
    %546 = tpu.matmul %543, %545, %cst_504 {dimension_numbers = #tpu.dot_dimension_numbers<[1], [0], [0], [1], [0, 0, 1, 1], [], []>} : vector<8x8xf32>, vector<8x32xf32>, vector<8x32xf32> -> vector<8x32xf32>
    %547 = arith.addf %521, %546 : vector<8x32xf32>
    %c1_505 = arith.constant 1 : index
    %c0_506 = arith.constant 0 : index
    %c0_507 = arith.constant 0 : index
    %548 = vector.load %arg9[%c1_505, %c0_506, %c0_507] : memref<2x1x32xf32, #tpu.memory_space<vmem>>, vector<1x1x32xf32>
    %549 = vector.shape_cast %548 : vector<1x1x32xf32> to vector<1x32xf32>
    %550 = vector.broadcast %549 : vector<1x32xf32> to vector<8x32xf32>
    %551 = arith.addf %547, %550 : vector<8x32xf32>
    %552 = arith.addf %299, %551 : vector<8x32xf32>
    %c1_508 = arith.constant 1 : index
    %c0_509 = arith.constant 0 : index
    %c0_510 = arith.constant 0 : index
    %553 = vector.load %arg10[%c1_508, %c0_509, %c0_510] : memref<2x1x32xf32, #tpu.memory_space<vmem>>, vector<1x1x32xf32>
    %554 = vector.shape_cast %553 : vector<1x1x32xf32> to vector<1x32xf32>
    %555 = vector.broadcast %554 : vector<1x32xf32> to vector<8x32xf32>
    %556 = arith.mulf %552, %555 : vector<8x32xf32>
    %c1_511 = arith.constant 1 : index
    %c0_512 = arith.constant 0 : index
    %c0_513 = arith.constant 0 : index
    %557 = vector.load %arg11[%c1_511, %c0_512, %c0_513] : memref<2x1x32xf32, #tpu.memory_space<vmem>>, vector<1x1x32xf32>
    %558 = vector.shape_cast %557 : vector<1x1x32xf32> to vector<1x32xf32>
    %559 = vector.broadcast %558 : vector<1x32xf32> to vector<8x32xf32>
    %560 = arith.addf %556, %559 : vector<8x32xf32>
    %c1_514 = arith.constant 1 : index
    %c0_515 = arith.constant 0 : index
    %c0_516 = arith.constant 0 : index
    %561 = vector.load %arg12[%c1_514, %c0_515, %c0_516] : memref<2x32x64xf32, #tpu.memory_space<vmem>>, vector<1x32x64xf32>
    %562 = vector.shape_cast %561 : vector<1x32x64xf32> to vector<32x64xf32>
    %cst_517 = arith.constant dense<0.000000e+00> : vector<8x64xf32>
    %563 = tpu.matmul %560, %562, %cst_517 {dimension_numbers = #tpu.dot_dimension_numbers<[1], [0], [0], [1], [0, 0, 1, 1], [], []>} : vector<8x32xf32>, vector<32x64xf32>, vector<8x64xf32> -> vector<8x64xf32>
    %c1_518 = arith.constant 1 : index
    %c0_519 = arith.constant 0 : index
    %c0_520 = arith.constant 0 : index
    %564 = vector.load %arg13[%c1_518, %c0_519, %c0_520] : memref<2x1x64xf32, #tpu.memory_space<vmem>>, vector<1x1x64xf32>
    %565 = vector.shape_cast %564 : vector<1x1x64xf32> to vector<1x64xf32>
    %566 = vector.broadcast %565 : vector<1x64xf32> to vector<8x64xf32>
    %567 = arith.addf %563, %566 : vector<8x64xf32>
    %cst_521 = arith.constant 0.000000e+00 : f32
    %568 = vector.broadcast %cst_521 : f32 to vector<8x64xf32>
    %569 = arith.maximumf %567, %568 : vector<8x64xf32>
    %c1_522 = arith.constant 1 : index
    %c0_523 = arith.constant 0 : index
    %c0_524 = arith.constant 0 : index
    %570 = vector.load %arg14[%c1_522, %c0_523, %c0_524] : memref<2x64x32xf32, #tpu.memory_space<vmem>>, vector<1x64x32xf32>
    %571 = vector.shape_cast %570 : vector<1x64x32xf32> to vector<64x32xf32>
    %cst_525 = arith.constant dense<0.000000e+00> : vector<8x32xf32>
    %572 = tpu.matmul %569, %571, %cst_525 {dimension_numbers = #tpu.dot_dimension_numbers<[1], [0], [0], [1], [0, 0, 1, 1], [], []>} : vector<8x64xf32>, vector<64x32xf32>, vector<8x32xf32> -> vector<8x32xf32>
    %c1_526 = arith.constant 1 : index
    %c0_527 = arith.constant 0 : index
    %c0_528 = arith.constant 0 : index
    %573 = vector.load %arg15[%c1_526, %c0_527, %c0_528] : memref<2x1x32xf32, #tpu.memory_space<vmem>>, vector<1x1x32xf32>
    %574 = vector.shape_cast %573 : vector<1x1x32xf32> to vector<1x32xf32>
    %575 = vector.broadcast %574 : vector<1x32xf32> to vector<8x32xf32>
    %576 = arith.addf %572, %575 : vector<8x32xf32>
    %577 = arith.addf %560, %576 : vector<8x32xf32>
    %c1_529 = arith.constant 1 : index
    %c0_530 = arith.constant 0 : index
    %c0_531 = arith.constant 0 : index
    %578 = vector.load %arg16[%c1_529, %c0_530, %c0_531] : memref<2x1x32xf32, #tpu.memory_space<vmem>>, vector<1x1x32xf32>
    %579 = vector.shape_cast %578 : vector<1x1x32xf32> to vector<1x32xf32>
    %580 = vector.broadcast %579 : vector<1x32xf32> to vector<8x32xf32>
    %581 = arith.mulf %577, %580 : vector<8x32xf32>
    %c1_532 = arith.constant 1 : index
    %c0_533 = arith.constant 0 : index
    %c0_534 = arith.constant 0 : index
    %582 = vector.load %arg17[%c1_532, %c0_533, %c0_534] : memref<2x1x32xf32, #tpu.memory_space<vmem>>, vector<1x1x32xf32>
    %583 = vector.shape_cast %582 : vector<1x1x32xf32> to vector<1x32xf32>
    %584 = vector.broadcast %583 : vector<1x32xf32> to vector<8x32xf32>
    %585 = arith.addf %581, %584 : vector<8x32xf32>
    %cst_535 = arith.constant 1.250000e-01 : f32
    %586 = vector.broadcast %cst_535 : f32 to vector<1x8xf32>
    %cst_536 = arith.constant dense<0.000000e+00> : vector<1x32xf32>
    %587 = tpu.matmul %586, %442, %cst_536 {dimension_numbers = #tpu.dot_dimension_numbers<[1], [0], [0], [1], [0, 0, 1, 1], [], []>} : vector<1x8xf32>, vector<8x32xf32>, vector<1x32xf32> -> vector<1x32xf32>
    %c0_537 = arith.constant 0 : index
    %c0_538 = arith.constant 0 : index
    %c0_539 = arith.constant 0 : index
    %588 = vector.load %arg1[%c0_537, %c0_538, %c0_539] : memref<2x8x1xf32, #tpu.memory_space<vmem>>, vector<1x8x1xf32>
    %589 = vector.shape_cast %588 : vector<1x8x1xf32> to vector<8x1xf32>
    %c0_540 = arith.constant 0 : index
    %c0_541 = arith.constant 0 : index
    %c0_542 = arith.constant 0 : index
    %590 = vector.load %arg2[%c0_540, %c0_541, %c0_542] : memref<2x8x8xf32, #tpu.memory_space<vmem>>, vector<1x8x8xf32>
    %591 = vector.shape_cast %590 : vector<1x8x8xf32> to vector<8x8xf32>
    %cst_543 = arith.constant 0.000000e+00 : f32
    %592 = vector.broadcast %cst_543 : f32 to vector<8x32xf32>
    %c0_544 = arith.constant 0 : index
    %c0_545 = arith.constant 0 : index
    %c0_546 = arith.constant 0 : index
    %593 = vector.load %arg18[%c0_544, %c0_545, %c0_546] : memref<4x32x8xf32, #tpu.memory_space<vmem>>, vector<1x32x8xf32>
    %594 = vector.shape_cast %593 : vector<1x32x8xf32> to vector<32x8xf32>
    %cst_547 = arith.constant dense<0.000000e+00> : vector<1x8xf32>
    %595 = tpu.matmul %587, %594, %cst_547 {dimension_numbers = #tpu.dot_dimension_numbers<[1], [0], [0], [1], [0, 0, 1, 1], [], []>} : vector<1x32xf32>, vector<32x8xf32>, vector<1x8xf32> -> vector<1x8xf32>
    %c0_548 = arith.constant 0 : index
    %c0_549 = arith.constant 0 : index
    %c0_550 = arith.constant 0 : index
    %596 = vector.load %arg19[%c0_548, %c0_549, %c0_550] : memref<4x1x8xf32, #tpu.memory_space<vmem>>, vector<1x1x8xf32>
    %597 = vector.shape_cast %596 : vector<1x1x8xf32> to vector<1x8xf32>
    %598 = vector.broadcast %589 : vector<8x1xf32> to vector<8x8xf32>
    %599 = vector.broadcast %597 : vector<1x8xf32> to vector<8x8xf32>
    %600 = arith.mulf %598, %599 : vector<8x8xf32>
    %601 = vector.broadcast %595 : vector<1x8xf32> to vector<8x8xf32>
    %602 = arith.addf %601, %600 : vector<8x8xf32>
    %c0_551 = arith.constant 0 : index
    %c0_552 = arith.constant 0 : index
    %c0_553 = arith.constant 0 : index
    %603 = vector.load %arg20[%c0_551, %c0_552, %c0_553] : memref<4x32x8xf32, #tpu.memory_space<vmem>>, vector<1x32x8xf32>
    %604 = vector.shape_cast %603 : vector<1x32x8xf32> to vector<32x8xf32>
    %cst_554 = arith.constant dense<0.000000e+00> : vector<8x8xf32>
    %605 = tpu.matmul %442, %604, %cst_554 {dimension_numbers = #tpu.dot_dimension_numbers<[1], [0], [0], [1], [0, 0, 1, 1], [], []>} : vector<8x32xf32>, vector<32x8xf32>, vector<8x8xf32> -> vector<8x8xf32>
    %c0_555 = arith.constant 0 : index
    %c0_556 = arith.constant 0 : index
    %c0_557 = arith.constant 0 : index
    %606 = vector.load %arg21[%c0_555, %c0_556, %c0_557] : memref<4x32x8xf32, #tpu.memory_space<vmem>>, vector<1x32x8xf32>
    %607 = vector.shape_cast %606 : vector<1x32x8xf32> to vector<32x8xf32>
    %cst_558 = arith.constant dense<0.000000e+00> : vector<8x8xf32>
    %608 = tpu.matmul %442, %607, %cst_558 {dimension_numbers = #tpu.dot_dimension_numbers<[1], [0], [0], [1], [0, 0, 1, 1], [], []>} : vector<8x32xf32>, vector<32x8xf32>, vector<8x8xf32> -> vector<8x8xf32>
    %cst_559 = arith.constant dense<0.000000e+00> : vector<8x8xf32>
    %609 = tpu.matmul %602, %605, %cst_559 {dimension_numbers = #tpu.dot_dimension_numbers<[1], [1], [0], [0], [0, 0, 1, 0], [], []>} : vector<8x8xf32>, vector<8x8xf32>, vector<8x8xf32> -> vector<8x8xf32>
    %cst_560 = arith.constant 0.353553385 : f32
    %610 = vector.broadcast %cst_560 : f32 to vector<8x8xf32>
    %611 = arith.mulf %609, %610 : vector<8x8xf32>
    %612 = arith.addf %611, %591 : vector<8x8xf32>
    %cst_561 = arith.constant dense<0xFF800000> : vector<8xf32>
    %613 = vector.multi_reduction <maximumf>, %612, %cst_561 [1] : vector<8x8xf32> to vector<8xf32>
    %614 = vector.shape_cast %613 : vector<8xf32> to vector<8x1xf32>
    %615 = vector.broadcast %614 : vector<8x1xf32> to vector<8x8xf32>
    %616 = arith.subf %612, %615 : vector<8x8xf32>
    %617 = math.exp %616 : vector<8x8xf32>
    %cst_562 = arith.constant dense<0.000000e+00> : vector<8xf32>
    %618 = vector.multi_reduction <add>, %617, %cst_562 [1] : vector<8x8xf32> to vector<8xf32>
    %619 = vector.shape_cast %618 : vector<8xf32> to vector<8x1xf32>
    %620 = vector.broadcast %619 : vector<8x1xf32> to vector<8x8xf32>
    %621 = arith.divf %617, %620 : vector<8x8xf32>
    %cst_563 = arith.constant dense<0.000000e+00> : vector<8x8xf32>
    %622 = tpu.matmul %621, %608, %cst_563 {dimension_numbers = #tpu.dot_dimension_numbers<[1], [0], [0], [1], [0, 0, 1, 1], [], []>} : vector<8x8xf32>, vector<8x8xf32>, vector<8x8xf32> -> vector<8x8xf32>
    %c0_564 = arith.constant 0 : index
    %c0_565 = arith.constant 0 : index
    %c0_566 = arith.constant 0 : index
    %623 = vector.load %arg22[%c0_564, %c0_565, %c0_566] : memref<4x8x32xf32, #tpu.memory_space<vmem>>, vector<1x8x32xf32>
    %624 = vector.shape_cast %623 : vector<1x8x32xf32> to vector<8x32xf32>
    %cst_567 = arith.constant dense<0.000000e+00> : vector<8x32xf32>
    %625 = tpu.matmul %622, %624, %cst_567 {dimension_numbers = #tpu.dot_dimension_numbers<[1], [0], [0], [1], [0, 0, 1, 1], [], []>} : vector<8x8xf32>, vector<8x32xf32>, vector<8x32xf32> -> vector<8x32xf32>
    %626 = arith.addf %592, %625 : vector<8x32xf32>
    %c1_568 = arith.constant 1 : index
    %c0_569 = arith.constant 0 : index
    %c0_570 = arith.constant 0 : index
    %627 = vector.load %arg18[%c1_568, %c0_569, %c0_570] : memref<4x32x8xf32, #tpu.memory_space<vmem>>, vector<1x32x8xf32>
    %628 = vector.shape_cast %627 : vector<1x32x8xf32> to vector<32x8xf32>
    %cst_571 = arith.constant dense<0.000000e+00> : vector<1x8xf32>
    %629 = tpu.matmul %587, %628, %cst_571 {dimension_numbers = #tpu.dot_dimension_numbers<[1], [0], [0], [1], [0, 0, 1, 1], [], []>} : vector<1x32xf32>, vector<32x8xf32>, vector<1x8xf32> -> vector<1x8xf32>
    %c1_572 = arith.constant 1 : index
    %c0_573 = arith.constant 0 : index
    %c0_574 = arith.constant 0 : index
    %630 = vector.load %arg19[%c1_572, %c0_573, %c0_574] : memref<4x1x8xf32, #tpu.memory_space<vmem>>, vector<1x1x8xf32>
    %631 = vector.shape_cast %630 : vector<1x1x8xf32> to vector<1x8xf32>
    %632 = vector.broadcast %589 : vector<8x1xf32> to vector<8x8xf32>
    %633 = vector.broadcast %631 : vector<1x8xf32> to vector<8x8xf32>
    %634 = arith.mulf %632, %633 : vector<8x8xf32>
    %635 = vector.broadcast %629 : vector<1x8xf32> to vector<8x8xf32>
    %636 = arith.addf %635, %634 : vector<8x8xf32>
    %c1_575 = arith.constant 1 : index
    %c0_576 = arith.constant 0 : index
    %c0_577 = arith.constant 0 : index
    %637 = vector.load %arg20[%c1_575, %c0_576, %c0_577] : memref<4x32x8xf32, #tpu.memory_space<vmem>>, vector<1x32x8xf32>
    %638 = vector.shape_cast %637 : vector<1x32x8xf32> to vector<32x8xf32>
    %cst_578 = arith.constant dense<0.000000e+00> : vector<8x8xf32>
    %639 = tpu.matmul %442, %638, %cst_578 {dimension_numbers = #tpu.dot_dimension_numbers<[1], [0], [0], [1], [0, 0, 1, 1], [], []>} : vector<8x32xf32>, vector<32x8xf32>, vector<8x8xf32> -> vector<8x8xf32>
    %c1_579 = arith.constant 1 : index
    %c0_580 = arith.constant 0 : index
    %c0_581 = arith.constant 0 : index
    %640 = vector.load %arg21[%c1_579, %c0_580, %c0_581] : memref<4x32x8xf32, #tpu.memory_space<vmem>>, vector<1x32x8xf32>
    %641 = vector.shape_cast %640 : vector<1x32x8xf32> to vector<32x8xf32>
    %cst_582 = arith.constant dense<0.000000e+00> : vector<8x8xf32>
    %642 = tpu.matmul %442, %641, %cst_582 {dimension_numbers = #tpu.dot_dimension_numbers<[1], [0], [0], [1], [0, 0, 1, 1], [], []>} : vector<8x32xf32>, vector<32x8xf32>, vector<8x8xf32> -> vector<8x8xf32>
    %cst_583 = arith.constant dense<0.000000e+00> : vector<8x8xf32>
    %643 = tpu.matmul %636, %639, %cst_583 {dimension_numbers = #tpu.dot_dimension_numbers<[1], [1], [0], [0], [0, 0, 1, 0], [], []>} : vector<8x8xf32>, vector<8x8xf32>, vector<8x8xf32> -> vector<8x8xf32>
    %cst_584 = arith.constant 0.353553385 : f32
    %644 = vector.broadcast %cst_584 : f32 to vector<8x8xf32>
    %645 = arith.mulf %643, %644 : vector<8x8xf32>
    %646 = arith.addf %645, %591 : vector<8x8xf32>
    %cst_585 = arith.constant dense<0xFF800000> : vector<8xf32>
    %647 = vector.multi_reduction <maximumf>, %646, %cst_585 [1] : vector<8x8xf32> to vector<8xf32>
    %648 = vector.shape_cast %647 : vector<8xf32> to vector<8x1xf32>
    %649 = vector.broadcast %648 : vector<8x1xf32> to vector<8x8xf32>
    %650 = arith.subf %646, %649 : vector<8x8xf32>
    %651 = math.exp %650 : vector<8x8xf32>
    %cst_586 = arith.constant dense<0.000000e+00> : vector<8xf32>
    %652 = vector.multi_reduction <add>, %651, %cst_586 [1] : vector<8x8xf32> to vector<8xf32>
    %653 = vector.shape_cast %652 : vector<8xf32> to vector<8x1xf32>
    %654 = vector.broadcast %653 : vector<8x1xf32> to vector<8x8xf32>
    %655 = arith.divf %651, %654 : vector<8x8xf32>
    %cst_587 = arith.constant dense<0.000000e+00> : vector<8x8xf32>
    %656 = tpu.matmul %655, %642, %cst_587 {dimension_numbers = #tpu.dot_dimension_numbers<[1], [0], [0], [1], [0, 0, 1, 1], [], []>} : vector<8x8xf32>, vector<8x8xf32>, vector<8x8xf32> -> vector<8x8xf32>
    %c1_588 = arith.constant 1 : index
    %c0_589 = arith.constant 0 : index
    %c0_590 = arith.constant 0 : index
    %657 = vector.load %arg22[%c1_588, %c0_589, %c0_590] : memref<4x8x32xf32, #tpu.memory_space<vmem>>, vector<1x8x32xf32>
    %658 = vector.shape_cast %657 : vector<1x8x32xf32> to vector<8x32xf32>
    %cst_591 = arith.constant dense<0.000000e+00> : vector<8x32xf32>
    %659 = tpu.matmul %656, %658, %cst_591 {dimension_numbers = #tpu.dot_dimension_numbers<[1], [0], [0], [1], [0, 0, 1, 1], [], []>} : vector<8x8xf32>, vector<8x32xf32>, vector<8x32xf32> -> vector<8x32xf32>
    %660 = arith.addf %626, %659 : vector<8x32xf32>
    %c2_592 = arith.constant 2 : index
    %c0_593 = arith.constant 0 : index
    %c0_594 = arith.constant 0 : index
    %661 = vector.load %arg18[%c2_592, %c0_593, %c0_594] : memref<4x32x8xf32, #tpu.memory_space<vmem>>, vector<1x32x8xf32>
    %662 = vector.shape_cast %661 : vector<1x32x8xf32> to vector<32x8xf32>
    %cst_595 = arith.constant dense<0.000000e+00> : vector<1x8xf32>
    %663 = tpu.matmul %587, %662, %cst_595 {dimension_numbers = #tpu.dot_dimension_numbers<[1], [0], [0], [1], [0, 0, 1, 1], [], []>} : vector<1x32xf32>, vector<32x8xf32>, vector<1x8xf32> -> vector<1x8xf32>
    %c2_596 = arith.constant 2 : index
    %c0_597 = arith.constant 0 : index
    %c0_598 = arith.constant 0 : index
    %664 = vector.load %arg19[%c2_596, %c0_597, %c0_598] : memref<4x1x8xf32, #tpu.memory_space<vmem>>, vector<1x1x8xf32>
    %665 = vector.shape_cast %664 : vector<1x1x8xf32> to vector<1x8xf32>
    %666 = vector.broadcast %589 : vector<8x1xf32> to vector<8x8xf32>
    %667 = vector.broadcast %665 : vector<1x8xf32> to vector<8x8xf32>
    %668 = arith.mulf %666, %667 : vector<8x8xf32>
    %669 = vector.broadcast %663 : vector<1x8xf32> to vector<8x8xf32>
    %670 = arith.addf %669, %668 : vector<8x8xf32>
    %c2_599 = arith.constant 2 : index
    %c0_600 = arith.constant 0 : index
    %c0_601 = arith.constant 0 : index
    %671 = vector.load %arg20[%c2_599, %c0_600, %c0_601] : memref<4x32x8xf32, #tpu.memory_space<vmem>>, vector<1x32x8xf32>
    %672 = vector.shape_cast %671 : vector<1x32x8xf32> to vector<32x8xf32>
    %cst_602 = arith.constant dense<0.000000e+00> : vector<8x8xf32>
    %673 = tpu.matmul %442, %672, %cst_602 {dimension_numbers = #tpu.dot_dimension_numbers<[1], [0], [0], [1], [0, 0, 1, 1], [], []>} : vector<8x32xf32>, vector<32x8xf32>, vector<8x8xf32> -> vector<8x8xf32>
    %c2_603 = arith.constant 2 : index
    %c0_604 = arith.constant 0 : index
    %c0_605 = arith.constant 0 : index
    %674 = vector.load %arg21[%c2_603, %c0_604, %c0_605] : memref<4x32x8xf32, #tpu.memory_space<vmem>>, vector<1x32x8xf32>
    %675 = vector.shape_cast %674 : vector<1x32x8xf32> to vector<32x8xf32>
    %cst_606 = arith.constant dense<0.000000e+00> : vector<8x8xf32>
    %676 = tpu.matmul %442, %675, %cst_606 {dimension_numbers = #tpu.dot_dimension_numbers<[1], [0], [0], [1], [0, 0, 1, 1], [], []>} : vector<8x32xf32>, vector<32x8xf32>, vector<8x8xf32> -> vector<8x8xf32>
    %cst_607 = arith.constant dense<0.000000e+00> : vector<8x8xf32>
    %677 = tpu.matmul %670, %673, %cst_607 {dimension_numbers = #tpu.dot_dimension_numbers<[1], [1], [0], [0], [0, 0, 1, 0], [], []>} : vector<8x8xf32>, vector<8x8xf32>, vector<8x8xf32> -> vector<8x8xf32>
    %cst_608 = arith.constant 0.353553385 : f32
    %678 = vector.broadcast %cst_608 : f32 to vector<8x8xf32>
    %679 = arith.mulf %677, %678 : vector<8x8xf32>
    %680 = arith.addf %679, %591 : vector<8x8xf32>
    %cst_609 = arith.constant dense<0xFF800000> : vector<8xf32>
    %681 = vector.multi_reduction <maximumf>, %680, %cst_609 [1] : vector<8x8xf32> to vector<8xf32>
    %682 = vector.shape_cast %681 : vector<8xf32> to vector<8x1xf32>
    %683 = vector.broadcast %682 : vector<8x1xf32> to vector<8x8xf32>
    %684 = arith.subf %680, %683 : vector<8x8xf32>
    %685 = math.exp %684 : vector<8x8xf32>
    %cst_610 = arith.constant dense<0.000000e+00> : vector<8xf32>
    %686 = vector.multi_reduction <add>, %685, %cst_610 [1] : vector<8x8xf32> to vector<8xf32>
    %687 = vector.shape_cast %686 : vector<8xf32> to vector<8x1xf32>
    %688 = vector.broadcast %687 : vector<8x1xf32> to vector<8x8xf32>
    %689 = arith.divf %685, %688 : vector<8x8xf32>
    %cst_611 = arith.constant dense<0.000000e+00> : vector<8x8xf32>
    %690 = tpu.matmul %689, %676, %cst_611 {dimension_numbers = #tpu.dot_dimension_numbers<[1], [0], [0], [1], [0, 0, 1, 1], [], []>} : vector<8x8xf32>, vector<8x8xf32>, vector<8x8xf32> -> vector<8x8xf32>
    %c2_612 = arith.constant 2 : index
    %c0_613 = arith.constant 0 : index
    %c0_614 = arith.constant 0 : index
    %691 = vector.load %arg22[%c2_612, %c0_613, %c0_614] : memref<4x8x32xf32, #tpu.memory_space<vmem>>, vector<1x8x32xf32>
    %692 = vector.shape_cast %691 : vector<1x8x32xf32> to vector<8x32xf32>
    %cst_615 = arith.constant dense<0.000000e+00> : vector<8x32xf32>
    %693 = tpu.matmul %690, %692, %cst_615 {dimension_numbers = #tpu.dot_dimension_numbers<[1], [0], [0], [1], [0, 0, 1, 1], [], []>} : vector<8x8xf32>, vector<8x32xf32>, vector<8x32xf32> -> vector<8x32xf32>
    %694 = arith.addf %660, %693 : vector<8x32xf32>
    %c3_616 = arith.constant 3 : index
    %c0_617 = arith.constant 0 : index
    %c0_618 = arith.constant 0 : index
    %695 = vector.load %arg18[%c3_616, %c0_617, %c0_618] : memref<4x32x8xf32, #tpu.memory_space<vmem>>, vector<1x32x8xf32>
    %696 = vector.shape_cast %695 : vector<1x32x8xf32> to vector<32x8xf32>
    %cst_619 = arith.constant dense<0.000000e+00> : vector<1x8xf32>
    %697 = tpu.matmul %587, %696, %cst_619 {dimension_numbers = #tpu.dot_dimension_numbers<[1], [0], [0], [1], [0, 0, 1, 1], [], []>} : vector<1x32xf32>, vector<32x8xf32>, vector<1x8xf32> -> vector<1x8xf32>
    %c3_620 = arith.constant 3 : index
    %c0_621 = arith.constant 0 : index
    %c0_622 = arith.constant 0 : index
    %698 = vector.load %arg19[%c3_620, %c0_621, %c0_622] : memref<4x1x8xf32, #tpu.memory_space<vmem>>, vector<1x1x8xf32>
    %699 = vector.shape_cast %698 : vector<1x1x8xf32> to vector<1x8xf32>
    %700 = vector.broadcast %589 : vector<8x1xf32> to vector<8x8xf32>
    %701 = vector.broadcast %699 : vector<1x8xf32> to vector<8x8xf32>
    %702 = arith.mulf %700, %701 : vector<8x8xf32>
    %703 = vector.broadcast %697 : vector<1x8xf32> to vector<8x8xf32>
    %704 = arith.addf %703, %702 : vector<8x8xf32>
    %c3_623 = arith.constant 3 : index
    %c0_624 = arith.constant 0 : index
    %c0_625 = arith.constant 0 : index
    %705 = vector.load %arg20[%c3_623, %c0_624, %c0_625] : memref<4x32x8xf32, #tpu.memory_space<vmem>>, vector<1x32x8xf32>
    %706 = vector.shape_cast %705 : vector<1x32x8xf32> to vector<32x8xf32>
    %cst_626 = arith.constant dense<0.000000e+00> : vector<8x8xf32>
    %707 = tpu.matmul %442, %706, %cst_626 {dimension_numbers = #tpu.dot_dimension_numbers<[1], [0], [0], [1], [0, 0, 1, 1], [], []>} : vector<8x32xf32>, vector<32x8xf32>, vector<8x8xf32> -> vector<8x8xf32>
    %c3_627 = arith.constant 3 : index
    %c0_628 = arith.constant 0 : index
    %c0_629 = arith.constant 0 : index
    %708 = vector.load %arg21[%c3_627, %c0_628, %c0_629] : memref<4x32x8xf32, #tpu.memory_space<vmem>>, vector<1x32x8xf32>
    %709 = vector.shape_cast %708 : vector<1x32x8xf32> to vector<32x8xf32>
    %cst_630 = arith.constant dense<0.000000e+00> : vector<8x8xf32>
    %710 = tpu.matmul %442, %709, %cst_630 {dimension_numbers = #tpu.dot_dimension_numbers<[1], [0], [0], [1], [0, 0, 1, 1], [], []>} : vector<8x32xf32>, vector<32x8xf32>, vector<8x8xf32> -> vector<8x8xf32>
    %cst_631 = arith.constant dense<0.000000e+00> : vector<8x8xf32>
    %711 = tpu.matmul %704, %707, %cst_631 {dimension_numbers = #tpu.dot_dimension_numbers<[1], [1], [0], [0], [0, 0, 1, 0], [], []>} : vector<8x8xf32>, vector<8x8xf32>, vector<8x8xf32> -> vector<8x8xf32>
    %cst_632 = arith.constant 0.353553385 : f32
    %712 = vector.broadcast %cst_632 : f32 to vector<8x8xf32>
    %713 = arith.mulf %711, %712 : vector<8x8xf32>
    %714 = arith.addf %713, %591 : vector<8x8xf32>
    %cst_633 = arith.constant dense<0xFF800000> : vector<8xf32>
    %715 = vector.multi_reduction <maximumf>, %714, %cst_633 [1] : vector<8x8xf32> to vector<8xf32>
    %716 = vector.shape_cast %715 : vector<8xf32> to vector<8x1xf32>
    %717 = vector.broadcast %716 : vector<8x1xf32> to vector<8x8xf32>
    %718 = arith.subf %714, %717 : vector<8x8xf32>
    %719 = math.exp %718 : vector<8x8xf32>
    %cst_634 = arith.constant dense<0.000000e+00> : vector<8xf32>
    %720 = vector.multi_reduction <add>, %719, %cst_634 [1] : vector<8x8xf32> to vector<8xf32>
    %721 = vector.shape_cast %720 : vector<8xf32> to vector<8x1xf32>
    %722 = vector.broadcast %721 : vector<8x1xf32> to vector<8x8xf32>
    %723 = arith.divf %719, %722 : vector<8x8xf32>
    %cst_635 = arith.constant dense<0.000000e+00> : vector<8x8xf32>
    %724 = tpu.matmul %723, %710, %cst_635 {dimension_numbers = #tpu.dot_dimension_numbers<[1], [0], [0], [1], [0, 0, 1, 1], [], []>} : vector<8x8xf32>, vector<8x8xf32>, vector<8x8xf32> -> vector<8x8xf32>
    %c3_636 = arith.constant 3 : index
    %c0_637 = arith.constant 0 : index
    %c0_638 = arith.constant 0 : index
    %725 = vector.load %arg22[%c3_636, %c0_637, %c0_638] : memref<4x8x32xf32, #tpu.memory_space<vmem>>, vector<1x8x32xf32>
    %726 = vector.shape_cast %725 : vector<1x8x32xf32> to vector<8x32xf32>
    %cst_639 = arith.constant dense<0.000000e+00> : vector<8x32xf32>
    %727 = tpu.matmul %724, %726, %cst_639 {dimension_numbers = #tpu.dot_dimension_numbers<[1], [0], [0], [1], [0, 0, 1, 1], [], []>} : vector<8x8xf32>, vector<8x32xf32>, vector<8x32xf32> -> vector<8x32xf32>
    %728 = arith.addf %694, %727 : vector<8x32xf32>
    %c0_640 = arith.constant 0 : index
    %c0_641 = arith.constant 0 : index
    %729 = vector.load %arg23[%c0_640, %c0_641] : memref<1x32xf32, #tpu.memory_space<vmem>>, vector<1x32xf32>
    %730 = vector.broadcast %729 : vector<1x32xf32> to vector<8x32xf32>
    %731 = arith.addf %728, %730 : vector<8x32xf32>
    %cst_642 = arith.constant dense<0.000000e+00> : vector<8x8xf32>
    %732 = tpu.matmul %731, %442, %cst_642 {dimension_numbers = #tpu.dot_dimension_numbers<[1], [1], [0], [0], [0, 0, 1, 0], [], []>} : vector<8x32xf32>, vector<8x32xf32>, vector<8x8xf32> -> vector<8x8xf32>
    %cst_643 = arith.constant 0.176776692 : f32
    %733 = vector.broadcast %cst_643 : f32 to vector<8x8xf32>
    %734 = arith.mulf %732, %733 : vector<8x8xf32>
    %735 = math.tanh %734 : vector<8x8xf32>
    %cst_644 = arith.constant 1.000000e+01 : f32
    %736 = vector.broadcast %cst_644 : f32 to vector<8x8xf32>
    %737 = arith.mulf %736, %735 : vector<8x8xf32>
    %738 = arith.addf %737, %591 : vector<8x8xf32>
    %cst_645 = arith.constant dense<0xFF800000> : vector<8xf32>
    %739 = vector.multi_reduction <maximumf>, %738, %cst_645 [1] : vector<8x8xf32> to vector<8xf32>
    %740 = vector.shape_cast %739 : vector<8xf32> to vector<8x1xf32>
    %741 = vector.broadcast %740 : vector<8x1xf32> to vector<8x8xf32>
    %742 = arith.subf %738, %741 : vector<8x8xf32>
    %743 = math.exp %742 : vector<8x8xf32>
    %cst_646 = arith.constant dense<0.000000e+00> : vector<8xf32>
    %744 = vector.multi_reduction <add>, %743, %cst_646 [1] : vector<8x8xf32> to vector<8xf32>
    %745 = vector.shape_cast %744 : vector<8xf32> to vector<8x1xf32>
    %746 = vector.broadcast %745 : vector<8x1xf32> to vector<8x8xf32>
    %747 = arith.divf %743, %746 : vector<8x8xf32>
    %c0_647 = arith.constant 0 : index
    %c0_648 = arith.constant 0 : index
    %c0_649 = arith.constant 0 : index
    %748 = vector.load %arg24[%c0_647, %c0_648, %c0_649] : memref<2x8x8xf32, #tpu.memory_space<vmem>>, vector<1x8x8xf32>
    %749 = vector.shape_cast %748 : vector<1x8x8xf32> to vector<8x8xf32>
    %750 = vector.shape_cast %747 : vector<8x8xf32> to vector<1x8x8xf32>
    tpu.vector_store %arg24[%c0_647, %c0_648, %c0_649], %750 {strides = array<i32>} : memref<2x8x8xf32, #tpu.memory_space<vmem>>, vector<1x8x8xf32>,
    %751 = tpu.iota {dimensions = array<i32: 1>} : vector<8x8xi32>
    %752 = arith.sitofp %751 : vector<8x8xi32> to vector<8x8xf32>
    %cst_650 = arith.constant dense<0xFF800000> : vector<8xf32>
    %753 = vector.multi_reduction <maximumf>, %747, %cst_650 [1] : vector<8x8xf32> to vector<8xf32>
    %754 = vector.shape_cast %753 : vector<8xf32> to vector<8x1xf32>
    %755 = vector.broadcast %754 : vector<8x1xf32> to vector<8x8xf32>
    %756 = arith.cmpf oge, %747, %755 : vector<8x8xf32>
    %cst_651 = arith.constant 8.000000e+00 : f32
    %757 = vector.broadcast %cst_651 : f32 to vector<8x8xf32>
    %758 = arith.select %756, %752, %757 : vector<8x8xi1>, vector<8x8xf32>
    %cst_652 = arith.constant dense<0x7F800000> : vector<8xf32>
    %759 = vector.multi_reduction <minimumf>, %758, %cst_652 [1] : vector<8x8xf32> to vector<8xf32>
    %760 = vector.shape_cast %759 : vector<8xf32> to vector<8x1xf32>
    %761 = arith.fptosi %760 : vector<8x1xf32> to vector<8x1xi32>
    %c0_653 = arith.constant 0 : index
    %c0_654 = arith.constant 0 : index
    %c0_655 = arith.constant 0 : index
    %762 = vector.load %arg25[%c0_653, %c0_654, %c0_655] : memref<2x8x1xi32, #tpu.memory_space<vmem>>, vector<1x8x1xi32>
    %763 = vector.shape_cast %762 : vector<1x8x1xi32> to vector<8x1xi32>
    %764 = vector.shape_cast %761 : vector<8x1xi32> to vector<1x8x1xi32>
    tpu.vector_store %arg25[%c0_653, %c0_654, %c0_655], %764 {strides = array<i32>} : memref<2x8x1xi32, #tpu.memory_space<vmem>>, vector<1x8x1xi32>,
    %cst_656 = arith.constant dense<0.000000e+00> : vector<1x32xf32>
    %765 = tpu.matmul %586, %585, %cst_656 {dimension_numbers = #tpu.dot_dimension_numbers<[1], [0], [0], [1], [0, 0, 1, 1], [], []>} : vector<1x8xf32>, vector<8x32xf32>, vector<1x32xf32> -> vector<1x32xf32>
    %c1_657 = arith.constant 1 : index
    %c0_658 = arith.constant 0 : index
    %c0_659 = arith.constant 0 : index
    %766 = vector.load %arg1[%c1_657, %c0_658, %c0_659] : memref<2x8x1xf32, #tpu.memory_space<vmem>>, vector<1x8x1xf32>
    %767 = vector.shape_cast %766 : vector<1x8x1xf32> to vector<8x1xf32>
    %c1_660 = arith.constant 1 : index
    %c0_661 = arith.constant 0 : index
    %c0_662 = arith.constant 0 : index
    %768 = vector.load %arg2[%c1_660, %c0_661, %c0_662] : memref<2x8x8xf32, #tpu.memory_space<vmem>>, vector<1x8x8xf32>
    %769 = vector.shape_cast %768 : vector<1x8x8xf32> to vector<8x8xf32>
    %cst_663 = arith.constant 0.000000e+00 : f32
    %770 = vector.broadcast %cst_663 : f32 to vector<8x32xf32>
    %c0_664 = arith.constant 0 : index
    %c0_665 = arith.constant 0 : index
    %c0_666 = arith.constant 0 : index
    %771 = vector.load %arg18[%c0_664, %c0_665, %c0_666] : memref<4x32x8xf32, #tpu.memory_space<vmem>>, vector<1x32x8xf32>
    %772 = vector.shape_cast %771 : vector<1x32x8xf32> to vector<32x8xf32>
    %cst_667 = arith.constant dense<0.000000e+00> : vector<1x8xf32>
    %773 = tpu.matmul %765, %772, %cst_667 {dimension_numbers = #tpu.dot_dimension_numbers<[1], [0], [0], [1], [0, 0, 1, 1], [], []>} : vector<1x32xf32>, vector<32x8xf32>, vector<1x8xf32> -> vector<1x8xf32>
    %c0_668 = arith.constant 0 : index
    %c0_669 = arith.constant 0 : index
    %c0_670 = arith.constant 0 : index
    %774 = vector.load %arg19[%c0_668, %c0_669, %c0_670] : memref<4x1x8xf32, #tpu.memory_space<vmem>>, vector<1x1x8xf32>
    %775 = vector.shape_cast %774 : vector<1x1x8xf32> to vector<1x8xf32>
    %776 = vector.broadcast %767 : vector<8x1xf32> to vector<8x8xf32>
    %777 = vector.broadcast %775 : vector<1x8xf32> to vector<8x8xf32>
    %778 = arith.mulf %776, %777 : vector<8x8xf32>
    %779 = vector.broadcast %773 : vector<1x8xf32> to vector<8x8xf32>
    %780 = arith.addf %779, %778 : vector<8x8xf32>
    %c0_671 = arith.constant 0 : index
    %c0_672 = arith.constant 0 : index
    %c0_673 = arith.constant 0 : index
    %781 = vector.load %arg20[%c0_671, %c0_672, %c0_673] : memref<4x32x8xf32, #tpu.memory_space<vmem>>, vector<1x32x8xf32>
    %782 = vector.shape_cast %781 : vector<1x32x8xf32> to vector<32x8xf32>
    %cst_674 = arith.constant dense<0.000000e+00> : vector<8x8xf32>
    %783 = tpu.matmul %585, %782, %cst_674 {dimension_numbers = #tpu.dot_dimension_numbers<[1], [0], [0], [1], [0, 0, 1, 1], [], []>} : vector<8x32xf32>, vector<32x8xf32>, vector<8x8xf32> -> vector<8x8xf32>
    %c0_675 = arith.constant 0 : index
    %c0_676 = arith.constant 0 : index
    %c0_677 = arith.constant 0 : index
    %784 = vector.load %arg21[%c0_675, %c0_676, %c0_677] : memref<4x32x8xf32, #tpu.memory_space<vmem>>, vector<1x32x8xf32>
    %785 = vector.shape_cast %784 : vector<1x32x8xf32> to vector<32x8xf32>
    %cst_678 = arith.constant dense<0.000000e+00> : vector<8x8xf32>
    %786 = tpu.matmul %585, %785, %cst_678 {dimension_numbers = #tpu.dot_dimension_numbers<[1], [0], [0], [1], [0, 0, 1, 1], [], []>} : vector<8x32xf32>, vector<32x8xf32>, vector<8x8xf32> -> vector<8x8xf32>
    %cst_679 = arith.constant dense<0.000000e+00> : vector<8x8xf32>
    %787 = tpu.matmul %780, %783, %cst_679 {dimension_numbers = #tpu.dot_dimension_numbers<[1], [1], [0], [0], [0, 0, 1, 0], [], []>} : vector<8x8xf32>, vector<8x8xf32>, vector<8x8xf32> -> vector<8x8xf32>
    %cst_680 = arith.constant 0.353553385 : f32
    %788 = vector.broadcast %cst_680 : f32 to vector<8x8xf32>
    %789 = arith.mulf %787, %788 : vector<8x8xf32>
    %790 = arith.addf %789, %769 : vector<8x8xf32>
    %cst_681 = arith.constant dense<0xFF800000> : vector<8xf32>
    %791 = vector.multi_reduction <maximumf>, %790, %cst_681 [1] : vector<8x8xf32> to vector<8xf32>
    %792 = vector.shape_cast %791 : vector<8xf32> to vector<8x1xf32>
    %793 = vector.broadcast %792 : vector<8x1xf32> to vector<8x8xf32>
    %794 = arith.subf %790, %793 : vector<8x8xf32>
    %795 = math.exp %794 : vector<8x8xf32>
    %cst_682 = arith.constant dense<0.000000e+00> : vector<8xf32>
    %796 = vector.multi_reduction <add>, %795, %cst_682 [1] : vector<8x8xf32> to vector<8xf32>
    %797 = vector.shape_cast %796 : vector<8xf32> to vector<8x1xf32>
    %798 = vector.broadcast %797 : vector<8x1xf32> to vector<8x8xf32>
    %799 = arith.divf %795, %798 : vector<8x8xf32>
    %cst_683 = arith.constant dense<0.000000e+00> : vector<8x8xf32>
    %800 = tpu.matmul %799, %786, %cst_683 {dimension_numbers = #tpu.dot_dimension_numbers<[1], [0], [0], [1], [0, 0, 1, 1], [], []>} : vector<8x8xf32>, vector<8x8xf32>, vector<8x8xf32> -> vector<8x8xf32>
    %c0_684 = arith.constant 0 : index
    %c0_685 = arith.constant 0 : index
    %c0_686 = arith.constant 0 : index
    %801 = vector.load %arg22[%c0_684, %c0_685, %c0_686] : memref<4x8x32xf32, #tpu.memory_space<vmem>>, vector<1x8x32xf32>
    %802 = vector.shape_cast %801 : vector<1x8x32xf32> to vector<8x32xf32>
    %cst_687 = arith.constant dense<0.000000e+00> : vector<8x32xf32>
    %803 = tpu.matmul %800, %802, %cst_687 {dimension_numbers = #tpu.dot_dimension_numbers<[1], [0], [0], [1], [0, 0, 1, 1], [], []>} : vector<8x8xf32>, vector<8x32xf32>, vector<8x32xf32> -> vector<8x32xf32>
    %804 = arith.addf %770, %803 : vector<8x32xf32>
    %c1_688 = arith.constant 1 : index
    %c0_689 = arith.constant 0 : index
    %c0_690 = arith.constant 0 : index
    %805 = vector.load %arg18[%c1_688, %c0_689, %c0_690] : memref<4x32x8xf32, #tpu.memory_space<vmem>>, vector<1x32x8xf32>
    %806 = vector.shape_cast %805 : vector<1x32x8xf32> to vector<32x8xf32>
    %cst_691 = arith.constant dense<0.000000e+00> : vector<1x8xf32>
    %807 = tpu.matmul %765, %806, %cst_691 {dimension_numbers = #tpu.dot_dimension_numbers<[1], [0], [0], [1], [0, 0, 1, 1], [], []>} : vector<1x32xf32>, vector<32x8xf32>, vector<1x8xf32> -> vector<1x8xf32>
    %c1_692 = arith.constant 1 : index
    %c0_693 = arith.constant 0 : index
    %c0_694 = arith.constant 0 : index
    %808 = vector.load %arg19[%c1_692, %c0_693, %c0_694] : memref<4x1x8xf32, #tpu.memory_space<vmem>>, vector<1x1x8xf32>
    %809 = vector.shape_cast %808 : vector<1x1x8xf32> to vector<1x8xf32>
    %810 = vector.broadcast %767 : vector<8x1xf32> to vector<8x8xf32>
    %811 = vector.broadcast %809 : vector<1x8xf32> to vector<8x8xf32>
    %812 = arith.mulf %810, %811 : vector<8x8xf32>
    %813 = vector.broadcast %807 : vector<1x8xf32> to vector<8x8xf32>
    %814 = arith.addf %813, %812 : vector<8x8xf32>
    %c1_695 = arith.constant 1 : index
    %c0_696 = arith.constant 0 : index
    %c0_697 = arith.constant 0 : index
    %815 = vector.load %arg20[%c1_695, %c0_696, %c0_697] : memref<4x32x8xf32, #tpu.memory_space<vmem>>, vector<1x32x8xf32>
    %816 = vector.shape_cast %815 : vector<1x32x8xf32> to vector<32x8xf32>
    %cst_698 = arith.constant dense<0.000000e+00> : vector<8x8xf32>
    %817 = tpu.matmul %585, %816, %cst_698 {dimension_numbers = #tpu.dot_dimension_numbers<[1], [0], [0], [1], [0, 0, 1, 1], [], []>} : vector<8x32xf32>, vector<32x8xf32>, vector<8x8xf32> -> vector<8x8xf32>
    %c1_699 = arith.constant 1 : index
    %c0_700 = arith.constant 0 : index
    %c0_701 = arith.constant 0 : index
    %818 = vector.load %arg21[%c1_699, %c0_700, %c0_701] : memref<4x32x8xf32, #tpu.memory_space<vmem>>, vector<1x32x8xf32>
    %819 = vector.shape_cast %818 : vector<1x32x8xf32> to vector<32x8xf32>
    %cst_702 = arith.constant dense<0.000000e+00> : vector<8x8xf32>
    %820 = tpu.matmul %585, %819, %cst_702 {dimension_numbers = #tpu.dot_dimension_numbers<[1], [0], [0], [1], [0, 0, 1, 1], [], []>} : vector<8x32xf32>, vector<32x8xf32>, vector<8x8xf32> -> vector<8x8xf32>
    %cst_703 = arith.constant dense<0.000000e+00> : vector<8x8xf32>
    %821 = tpu.matmul %814, %817, %cst_703 {dimension_numbers = #tpu.dot_dimension_numbers<[1], [1], [0], [0], [0, 0, 1, 0], [], []>} : vector<8x8xf32>, vector<8x8xf32>, vector<8x8xf32> -> vector<8x8xf32>
    %cst_704 = arith.constant 0.353553385 : f32
    %822 = vector.broadcast %cst_704 : f32 to vector<8x8xf32>
    %823 = arith.mulf %821, %822 : vector<8x8xf32>
    %824 = arith.addf %823, %769 : vector<8x8xf32>
    %cst_705 = arith.constant dense<0xFF800000> : vector<8xf32>
    %825 = vector.multi_reduction <maximumf>, %824, %cst_705 [1] : vector<8x8xf32> to vector<8xf32>
    %826 = vector.shape_cast %825 : vector<8xf32> to vector<8x1xf32>
    %827 = vector.broadcast %826 : vector<8x1xf32> to vector<8x8xf32>
    %828 = arith.subf %824, %827 : vector<8x8xf32>
    %829 = math.exp %828 : vector<8x8xf32>
    %cst_706 = arith.constant dense<0.000000e+00> : vector<8xf32>
    %830 = vector.multi_reduction <add>, %829, %cst_706 [1] : vector<8x8xf32> to vector<8xf32>
    %831 = vector.shape_cast %830 : vector<8xf32> to vector<8x1xf32>
    %832 = vector.broadcast %831 : vector<8x1xf32> to vector<8x8xf32>
    %833 = arith.divf %829, %832 : vector<8x8xf32>
    %cst_707 = arith.constant dense<0.000000e+00> : vector<8x8xf32>
    %834 = tpu.matmul %833, %820, %cst_707 {dimension_numbers = #tpu.dot_dimension_numbers<[1], [0], [0], [1], [0, 0, 1, 1], [], []>} : vector<8x8xf32>, vector<8x8xf32>, vector<8x8xf32> -> vector<8x8xf32>
    %c1_708 = arith.constant 1 : index
    %c0_709 = arith.constant 0 : index
    %c0_710 = arith.constant 0 : index
    %835 = vector.load %arg22[%c1_708, %c0_709, %c0_710] : memref<4x8x32xf32, #tpu.memory_space<vmem>>, vector<1x8x32xf32>
    %836 = vector.shape_cast %835 : vector<1x8x32xf32> to vector<8x32xf32>
    %cst_711 = arith.constant dense<0.000000e+00> : vector<8x32xf32>
    %837 = tpu.matmul %834, %836, %cst_711 {dimension_numbers = #tpu.dot_dimension_numbers<[1], [0], [0], [1], [0, 0, 1, 1], [], []>} : vector<8x8xf32>, vector<8x32xf32>, vector<8x32xf32> -> vector<8x32xf32>
    %838 = arith.addf %804, %837 : vector<8x32xf32>
    %c2_712 = arith.constant 2 : index
    %c0_713 = arith.constant 0 : index
    %c0_714 = arith.constant 0 : index
    %839 = vector.load %arg18[%c2_712, %c0_713, %c0_714] : memref<4x32x8xf32, #tpu.memory_space<vmem>>, vector<1x32x8xf32>
    %840 = vector.shape_cast %839 : vector<1x32x8xf32> to vector<32x8xf32>
    %cst_715 = arith.constant dense<0.000000e+00> : vector<1x8xf32>
    %841 = tpu.matmul %765, %840, %cst_715 {dimension_numbers = #tpu.dot_dimension_numbers<[1], [0], [0], [1], [0, 0, 1, 1], [], []>} : vector<1x32xf32>, vector<32x8xf32>, vector<1x8xf32> -> vector<1x8xf32>
    %c2_716 = arith.constant 2 : index
    %c0_717 = arith.constant 0 : index
    %c0_718 = arith.constant 0 : index
    %842 = vector.load %arg19[%c2_716, %c0_717, %c0_718] : memref<4x1x8xf32, #tpu.memory_space<vmem>>, vector<1x1x8xf32>
    %843 = vector.shape_cast %842 : vector<1x1x8xf32> to vector<1x8xf32>
    %844 = vector.broadcast %767 : vector<8x1xf32> to vector<8x8xf32>
    %845 = vector.broadcast %843 : vector<1x8xf32> to vector<8x8xf32>
    %846 = arith.mulf %844, %845 : vector<8x8xf32>
    %847 = vector.broadcast %841 : vector<1x8xf32> to vector<8x8xf32>
    %848 = arith.addf %847, %846 : vector<8x8xf32>
    %c2_719 = arith.constant 2 : index
    %c0_720 = arith.constant 0 : index
    %c0_721 = arith.constant 0 : index
    %849 = vector.load %arg20[%c2_719, %c0_720, %c0_721] : memref<4x32x8xf32, #tpu.memory_space<vmem>>, vector<1x32x8xf32>
    %850 = vector.shape_cast %849 : vector<1x32x8xf32> to vector<32x8xf32>
    %cst_722 = arith.constant dense<0.000000e+00> : vector<8x8xf32>
    %851 = tpu.matmul %585, %850, %cst_722 {dimension_numbers = #tpu.dot_dimension_numbers<[1], [0], [0], [1], [0, 0, 1, 1], [], []>} : vector<8x32xf32>, vector<32x8xf32>, vector<8x8xf32> -> vector<8x8xf32>
    %c2_723 = arith.constant 2 : index
    %c0_724 = arith.constant 0 : index
    %c0_725 = arith.constant 0 : index
    %852 = vector.load %arg21[%c2_723, %c0_724, %c0_725] : memref<4x32x8xf32, #tpu.memory_space<vmem>>, vector<1x32x8xf32>
    %853 = vector.shape_cast %852 : vector<1x32x8xf32> to vector<32x8xf32>
    %cst_726 = arith.constant dense<0.000000e+00> : vector<8x8xf32>
    %854 = tpu.matmul %585, %853, %cst_726 {dimension_numbers = #tpu.dot_dimension_numbers<[1], [0], [0], [1], [0, 0, 1, 1], [], []>} : vector<8x32xf32>, vector<32x8xf32>, vector<8x8xf32> -> vector<8x8xf32>
    %cst_727 = arith.constant dense<0.000000e+00> : vector<8x8xf32>
    %855 = tpu.matmul %848, %851, %cst_727 {dimension_numbers = #tpu.dot_dimension_numbers<[1], [1], [0], [0], [0, 0, 1, 0], [], []>} : vector<8x8xf32>, vector<8x8xf32>, vector<8x8xf32> -> vector<8x8xf32>
    %cst_728 = arith.constant 0.353553385 : f32
    %856 = vector.broadcast %cst_728 : f32 to vector<8x8xf32>
    %857 = arith.mulf %855, %856 : vector<8x8xf32>
    %858 = arith.addf %857, %769 : vector<8x8xf32>
    %cst_729 = arith.constant dense<0xFF800000> : vector<8xf32>
    %859 = vector.multi_reduction <maximumf>, %858, %cst_729 [1] : vector<8x8xf32> to vector<8xf32>
    %860 = vector.shape_cast %859 : vector<8xf32> to vector<8x1xf32>
    %861 = vector.broadcast %860 : vector<8x1xf32> to vector<8x8xf32>
    %862 = arith.subf %858, %861 : vector<8x8xf32>
    %863 = math.exp %862 : vector<8x8xf32>
    %cst_730 = arith.constant dense<0.000000e+00> : vector<8xf32>
    %864 = vector.multi_reduction <add>, %863, %cst_730 [1] : vector<8x8xf32> to vector<8xf32>
    %865 = vector.shape_cast %864 : vector<8xf32> to vector<8x1xf32>
    %866 = vector.broadcast %865 : vector<8x1xf32> to vector<8x8xf32>
    %867 = arith.divf %863, %866 : vector<8x8xf32>
    %cst_731 = arith.constant dense<0.000000e+00> : vector<8x8xf32>
    %868 = tpu.matmul %867, %854, %cst_731 {dimension_numbers = #tpu.dot_dimension_numbers<[1], [0], [0], [1], [0, 0, 1, 1], [], []>} : vector<8x8xf32>, vector<8x8xf32>, vector<8x8xf32> -> vector<8x8xf32>
    %c2_732 = arith.constant 2 : index
    %c0_733 = arith.constant 0 : index
    %c0_734 = arith.constant 0 : index
    %869 = vector.load %arg22[%c2_732, %c0_733, %c0_734] : memref<4x8x32xf32, #tpu.memory_space<vmem>>, vector<1x8x32xf32>
    %870 = vector.shape_cast %869 : vector<1x8x32xf32> to vector<8x32xf32>
    %cst_735 = arith.constant dense<0.000000e+00> : vector<8x32xf32>
    %871 = tpu.matmul %868, %870, %cst_735 {dimension_numbers = #tpu.dot_dimension_numbers<[1], [0], [0], [1], [0, 0, 1, 1], [], []>} : vector<8x8xf32>, vector<8x32xf32>, vector<8x32xf32> -> vector<8x32xf32>
    %872 = arith.addf %838, %871 : vector<8x32xf32>
    %c3_736 = arith.constant 3 : index
    %c0_737 = arith.constant 0 : index
    %c0_738 = arith.constant 0 : index
    %873 = vector.load %arg18[%c3_736, %c0_737, %c0_738] : memref<4x32x8xf32, #tpu.memory_space<vmem>>, vector<1x32x8xf32>
    %874 = vector.shape_cast %873 : vector<1x32x8xf32> to vector<32x8xf32>
    %cst_739 = arith.constant dense<0.000000e+00> : vector<1x8xf32>
    %875 = tpu.matmul %765, %874, %cst_739 {dimension_numbers = #tpu.dot_dimension_numbers<[1], [0], [0], [1], [0, 0, 1, 1], [], []>} : vector<1x32xf32>, vector<32x8xf32>, vector<1x8xf32> -> vector<1x8xf32>
    %c3_740 = arith.constant 3 : index
    %c0_741 = arith.constant 0 : index
    %c0_742 = arith.constant 0 : index
    %876 = vector.load %arg19[%c3_740, %c0_741, %c0_742] : memref<4x1x8xf32, #tpu.memory_space<vmem>>, vector<1x1x8xf32>
    %877 = vector.shape_cast %876 : vector<1x1x8xf32> to vector<1x8xf32>
    %878 = vector.broadcast %767 : vector<8x1xf32> to vector<8x8xf32>
    %879 = vector.broadcast %877 : vector<1x8xf32> to vector<8x8xf32>
    %880 = arith.mulf %878, %879 : vector<8x8xf32>
    %881 = vector.broadcast %875 : vector<1x8xf32> to vector<8x8xf32>
    %882 = arith.addf %881, %880 : vector<8x8xf32>
    %c3_743 = arith.constant 3 : index
    %c0_744 = arith.constant 0 : index
    %c0_745 = arith.constant 0 : index
    %883 = vector.load %arg20[%c3_743, %c0_744, %c0_745] : memref<4x32x8xf32, #tpu.memory_space<vmem>>, vector<1x32x8xf32>
    %884 = vector.shape_cast %883 : vector<1x32x8xf32> to vector<32x8xf32>
    %cst_746 = arith.constant dense<0.000000e+00> : vector<8x8xf32>
    %885 = tpu.matmul %585, %884, %cst_746 {dimension_numbers = #tpu.dot_dimension_numbers<[1], [0], [0], [1], [0, 0, 1, 1], [], []>} : vector<8x32xf32>, vector<32x8xf32>, vector<8x8xf32> -> vector<8x8xf32>
    %c3_747 = arith.constant 3 : index
    %c0_748 = arith.constant 0 : index
    %c0_749 = arith.constant 0 : index
    %886 = vector.load %arg21[%c3_747, %c0_748, %c0_749] : memref<4x32x8xf32, #tpu.memory_space<vmem>>, vector<1x32x8xf32>
    %887 = vector.shape_cast %886 : vector<1x32x8xf32> to vector<32x8xf32>
    %cst_750 = arith.constant dense<0.000000e+00> : vector<8x8xf32>
    %888 = tpu.matmul %585, %887, %cst_750 {dimension_numbers = #tpu.dot_dimension_numbers<[1], [0], [0], [1], [0, 0, 1, 1], [], []>} : vector<8x32xf32>, vector<32x8xf32>, vector<8x8xf32> -> vector<8x8xf32>
    %cst_751 = arith.constant dense<0.000000e+00> : vector<8x8xf32>
    %889 = tpu.matmul %882, %885, %cst_751 {dimension_numbers = #tpu.dot_dimension_numbers<[1], [1], [0], [0], [0, 0, 1, 0], [], []>} : vector<8x8xf32>, vector<8x8xf32>, vector<8x8xf32> -> vector<8x8xf32>
    %cst_752 = arith.constant 0.353553385 : f32
    %890 = vector.broadcast %cst_752 : f32 to vector<8x8xf32>
    %891 = arith.mulf %889, %890 : vector<8x8xf32>
    %892 = arith.addf %891, %769 : vector<8x8xf32>
    %cst_753 = arith.constant dense<0xFF800000> : vector<8xf32>
    %893 = vector.multi_reduction <maximumf>, %892, %cst_753 [1] : vector<8x8xf32> to vector<8xf32>
    %894 = vector.shape_cast %893 : vector<8xf32> to vector<8x1xf32>
    %895 = vector.broadcast %894 : vector<8x1xf32> to vector<8x8xf32>
    %896 = arith.subf %892, %895 : vector<8x8xf32>
    %897 = math.exp %896 : vector<8x8xf32>
    %cst_754 = arith.constant dense<0.000000e+00> : vector<8xf32>
    %898 = vector.multi_reduction <add>, %897, %cst_754 [1] : vector<8x8xf32> to vector<8xf32>
    %899 = vector.shape_cast %898 : vector<8xf32> to vector<8x1xf32>
    %900 = vector.broadcast %899 : vector<8x1xf32> to vector<8x8xf32>
    %901 = arith.divf %897, %900 : vector<8x8xf32>
    %cst_755 = arith.constant dense<0.000000e+00> : vector<8x8xf32>
    %902 = tpu.matmul %901, %888, %cst_755 {dimension_numbers = #tpu.dot_dimension_numbers<[1], [0], [0], [1], [0, 0, 1, 1], [], []>} : vector<8x8xf32>, vector<8x8xf32>, vector<8x8xf32> -> vector<8x8xf32>
    %c3_756 = arith.constant 3 : index
    %c0_757 = arith.constant 0 : index
    %c0_758 = arith.constant 0 : index
    %903 = vector.load %arg22[%c3_756, %c0_757, %c0_758] : memref<4x8x32xf32, #tpu.memory_space<vmem>>, vector<1x8x32xf32>
    %904 = vector.shape_cast %903 : vector<1x8x32xf32> to vector<8x32xf32>
    %cst_759 = arith.constant dense<0.000000e+00> : vector<8x32xf32>
    %905 = tpu.matmul %902, %904, %cst_759 {dimension_numbers = #tpu.dot_dimension_numbers<[1], [0], [0], [1], [0, 0, 1, 1], [], []>} : vector<8x8xf32>, vector<8x32xf32>, vector<8x32xf32> -> vector<8x32xf32>
    %906 = arith.addf %872, %905 : vector<8x32xf32>
    %c0_760 = arith.constant 0 : index
    %c0_761 = arith.constant 0 : index
    %907 = vector.load %arg23[%c0_760, %c0_761] : memref<1x32xf32, #tpu.memory_space<vmem>>, vector<1x32xf32>
    %908 = vector.broadcast %907 : vector<1x32xf32> to vector<8x32xf32>
    %909 = arith.addf %906, %908 : vector<8x32xf32>
    %cst_762 = arith.constant dense<0.000000e+00> : vector<8x8xf32>
    %910 = tpu.matmul %909, %585, %cst_762 {dimension_numbers = #tpu.dot_dimension_numbers<[1], [1], [0], [0], [0, 0, 1, 0], [], []>} : vector<8x32xf32>, vector<8x32xf32>, vector<8x8xf32> -> vector<8x8xf32>
    %cst_763 = arith.constant 0.176776692 : f32
    %911 = vector.broadcast %cst_763 : f32 to vector<8x8xf32>
    %912 = arith.mulf %910, %911 : vector<8x8xf32>
    %913 = math.tanh %912 : vector<8x8xf32>
    %cst_764 = arith.constant 1.000000e+01 : f32
    %914 = vector.broadcast %cst_764 : f32 to vector<8x8xf32>
    %915 = arith.mulf %914, %913 : vector<8x8xf32>
    %916 = arith.addf %915, %769 : vector<8x8xf32>
    %cst_765 = arith.constant dense<0xFF800000> : vector<8xf32>
    %917 = vector.multi_reduction <maximumf>, %916, %cst_765 [1] : vector<8x8xf32> to vector<8xf32>
    %918 = vector.shape_cast %917 : vector<8xf32> to vector<8x1xf32>
    %919 = vector.broadcast %918 : vector<8x1xf32> to vector<8x8xf32>
    %920 = arith.subf %916, %919 : vector<8x8xf32>
    %921 = math.exp %920 : vector<8x8xf32>
    %cst_766 = arith.constant dense<0.000000e+00> : vector<8xf32>
    %922 = vector.multi_reduction <add>, %921, %cst_766 [1] : vector<8x8xf32> to vector<8xf32>
    %923 = vector.shape_cast %922 : vector<8xf32> to vector<8x1xf32>
    %924 = vector.broadcast %923 : vector<8x1xf32> to vector<8x8xf32>
    %925 = arith.divf %921, %924 : vector<8x8xf32>
    %c1_767 = arith.constant 1 : index
    %c0_768 = arith.constant 0 : index
    %c0_769 = arith.constant 0 : index
    %926 = vector.load %arg24[%c1_767, %c0_768, %c0_769] : memref<2x8x8xf32, #tpu.memory_space<vmem>>, vector<1x8x8xf32>
    %927 = vector.shape_cast %926 : vector<1x8x8xf32> to vector<8x8xf32>
    %928 = vector.shape_cast %925 : vector<8x8xf32> to vector<1x8x8xf32>
    tpu.vector_store %arg24[%c1_767, %c0_768, %c0_769], %928 {strides = array<i32>} : memref<2x8x8xf32, #tpu.memory_space<vmem>>, vector<1x8x8xf32>,
    %929 = tpu.iota {dimensions = array<i32: 1>} : vector<8x8xi32>
    %930 = arith.sitofp %929 : vector<8x8xi32> to vector<8x8xf32>
    %cst_770 = arith.constant dense<0xFF800000> : vector<8xf32>
    %931 = vector.multi_reduction <maximumf>, %925, %cst_770 [1] : vector<8x8xf32> to vector<8xf32>
    %932 = vector.shape_cast %931 : vector<8xf32> to vector<8x1xf32>
    %933 = vector.broadcast %932 : vector<8x1xf32> to vector<8x8xf32>
    %934 = arith.cmpf oge, %925, %933 : vector<8x8xf32>
    %cst_771 = arith.constant 8.000000e+00 : f32
    %935 = vector.broadcast %cst_771 : f32 to vector<8x8xf32>
    %936 = arith.select %934, %930, %935 : vector<8x8xi1>, vector<8x8xf32>
    %cst_772 = arith.constant dense<0x7F800000> : vector<8xf32>
    %937 = vector.multi_reduction <minimumf>, %936, %cst_772 [1] : vector<8x8xf32> to vector<8xf32>
    %938 = vector.shape_cast %937 : vector<8xf32> to vector<8x1xf32>
    %939 = arith.fptosi %938 : vector<8x1xf32> to vector<8x1xi32>
    %c1_773 = arith.constant 1 : index
    %c0_774 = arith.constant 0 : index
    %c0_775 = arith.constant 0 : index
    %940 = vector.load %arg25[%c1_773, %c0_774, %c0_775] : memref<2x8x1xi32, #tpu.memory_space<vmem>>, vector<1x8x1xi32>
    %941 = vector.shape_cast %940 : vector<1x8x1xi32> to vector<8x1xi32>
    %942 = vector.shape_cast %939 : vector<8x1xi32> to vector<1x8x1xi32>
    tpu.vector_store %arg25[%c1_773, %c0_774, %c0_775], %942 {strides = array<i32>} : memref<2x8x1xi32, #tpu.memory_space<vmem>>, vector<1x8x1xi32>,
    return
  }
}

</mosaic_0001>

<bundles_post_ra>
// kernel: kp_model_forward.1
= control target key start
LH: loop header
LB: loop body
LE: loop exit
PB: predicated region body
PF: predicated region fallthrough
CT: control target
= control target key end

     0   :  { %s7349_s0 = inlined_call_operand.vmem [shape: f32[2,8,2], index: 0, kind: input, shape index: {}]   ;;  %s7350_s1 = inlined_call_operand.vmem [shape: f32[2,8,1], index: 1, kind: input, shape index: {}]   ;;  %s7351_s2 = inlined_call_operand.vmem [shape: f32[2,8,8], index: 2, kind: input, shape index: {}]   ;;  %s7352_s3 = inlined_call_operand.vmem [shape: f32[2,32], index: 3, kind: input, shape index: {}]   ;;  %s7353_s4 = inlined_call_operand.vmem [shape: f32[1,32], index: 4, kind: input, shape index: {}]   ;;  %s7354_s5 = inlined_call_operand.vmem [shape: f32[2,4,32,8], index: 5, kind: input, shape index: {}]   ;;  %s7355_s6 = inlined_call_operand.vmem [shape: f32[2,4,32,8], index: 6, kind: input, shape index: {}]   ;;  %s7356_s7 = inlined_call_operand.vmem [shape: f32[2,4,32,8], index: 7, kind: input, shape index: {}]   ;;  %s7357_s8 = inlined_call_operand.vmem [shape: f32[2,4,8,32], index: 8, kind: input, shape index: {}]   ;;  %s7358_s9 = inlined_call_operand.vmem [shape: f32[2,1,32], index: 9, kind: input, shape index: {}]   ;;  %s7359_s10 = inlined_call_operand.vmem [shape: f32[2,1,32], index: 10, kind: input, shape index: {}]   ;;  %s7360_s11 = inlined_call_operand.vmem [shape: f32[2,1,32], index: 11, kind: input, shape index: {}]   ;;  %s7361_s12 = inlined_call_operand.vmem [shape: f32[2,32,64], index: 12, kind: input, shape index: {}]   ;;  %s7362_s13 = inlined_call_operand.vmem [shape: f32[2,1,64], index: 13, kind: input, shape index: {}]   ;;  %s7363_s14 = inlined_call_operand.vmem [shape: f32[2,64,32], index: 14, kind: input, shape index: {}]   ;;  %s7364_s15 = inlined_call_operand.vmem [shape: f32[2,1,32], index: 15, kind: input, shape index: {}]   ;;  %s7365_s16 = inlined_call_operand.vmem [shape: f32[2,1,32], index: 16, kind: input, shape index: {}]   ;;  %s7366_s17 = inlined_call_operand.vmem [shape: f32[2,1,32], index: 17, kind: input, shape index: {}]   ;;  %s7367_s18 = inlined_call_operand.vmem [shape: f32[4,32,8], index: 18, kind: input, shape index: {}]   ;;  %s7368_s19 = inlined_call_operand.vmem [shape: f32[4,1,8], index: 19, kind: input, shape index: {}]   ;;  %s7369_s20 = inlined_call_operand.vmem [shape: f32[4,32,8], index: 20, kind: input, shape index: {}]   ;;  %s7370_s21 = inlined_call_operand.vmem [shape: f32[4,32,8], index: 21, kind: input, shape index: {}]   ;;  %s7371_s22 = inlined_call_operand.vmem [shape: f32[4,8,32], index: 22, kind: input, shape index: {}]   ;;  %s7372_s23 = inlined_call_operand.vmem [shape: f32[1,32], index: 23, kind: input, shape index: {}]   ;;  %s7373_s24 = inlined_call_operand.hbm [shape: f32[2,8,8], index: 24, kind: output, shape index: {0}]   ;;  %s7374_s25 = inlined_call_operand.vmem [shape: s32[2,8,1], index: 25, kind: output, shape index: {1}]  }
   0x1   :  { %7407 = sst [smem:[#allocation14_spill]] %s7349_s0 }
   0x2   :  { %7408 = sst [smem:[#allocation15_spill]] %s7350_s1 }
   0x3   :  { %7409 = sst [smem:[#allocation16_spill]] %s7351_s2 }
   0x4   :  { %7410 = sst [smem:[#allocation17_spill]] %s7352_s3 }
   0x5   :  { %7411 = sst [smem:[#allocation18_spill]] %s7353_s4 }
   0x6   :  { %7412 = sst [smem:[#allocation19_spill]] %s7354_s5 }
   0x7   :  { %7413 = sst [smem:[#allocation20_spill]] %s7355_s6 }
   0x8   :  { %7414 = sst [smem:[#allocation21_spill]] %s7356_s7 }
   0x9   :  { %7415 = sst [smem:[#allocation22_spill]] %s7357_s8 }
   0xa   :  { %7416 = sst [smem:[#allocation23_spill]] %s7358_s9 }
   0xb   :  { %s7417_s6 = sld [smem:[#allocation17_spill]]  ;;  %vm90_vm0 = vcmask 1041408   ;;  %vm86_vm1 = vcmask 15360  }
   0xc   :  { %s7418_s3 = sld [smem:[#allocation14_spill]] }
   0xd   :  { %s7419_s8 = sld [smem:[#allocation19_spill]] }
   0xe   :  { %s7420_s28 = sld [smem:[#allocation20_spill]] }
   0xf   :  { %s7421_s0 = sld [smem:[#allocation21_spill]] }
  0x11   :  { %v81_v0 = vld [vmem:[%s7417_s6] sm:$0x3] }
  0x12   :  { %v80_v1 = vld [vmem:[%s7418_s3] sm:$0xff]  ;;  %4787 = vmatpush.msk.msra.mxu0 %vm90_vm0, %v81_v0  ;;  %4790 = vmatpush.msk.msra.mxu1 %vm90_vm0, %v81_v0 }
  0x13   :  { %v5492_v2 = vld [vmem:[%s7419_s8 + $0x18] sm:$0xff]  ;;  %v5509_v5 = vld [vmem:[%s7419_s8 + $0x10] sm:$0xff]  ;;  %4788 = vmatmul.msk.f32.vlgmr.msra.gmra.mxu0 %vm86_vm1, %v80_v1 }
  0x14   :  { %159 = vmatpush.msra.mxu2 %v5492_v2  ;;  %v5499_v3 = vld [vmem:[%s7420_s28 + $0x18] sm:$0xff]  ;;  %v5516_v6 = vld [vmem:[%s7420_s28 + $0x10] sm:$0xff] }
  0x15   :  { %v5504_v4 = vld [vmem:[%s7421_s0 + $0x18] sm:$0xff]  ;;  %183 = vmatpush.msra.mxu3 %v5499_v3  ;;  %v5521_v7 = vld [vmem:[%s7421_s0 + $0x10] sm:$0xff] }
  0x16   :  { %207 = vmatpush.msrb.mxu0 %v5504_v4  ;;  %160 = vmatpush.msra.mxu2 %v5509_v5 }
  0x17   :  { %184 = vmatpush.msra.mxu3 %v5516_v6 }
  0x18   :  { %208 = vmatpush.msrb.mxu0 %v5521_v7 }
  0x19   :  { %31 = vsyncpa [#allocation3], 0  ;;  %v5531_v8 = vld [vmem:[%s7419_s8 + $0x8] sm:$0xff]  ;;  %v5549_v11 = vld [vmem:[%s7419_s8] sm:$0xff]  ;;  %s7422_s30 = sld [smem:[#allocation18_spill]]  ;;  %vm143_vm2 = vcmask 261120  }
  0x1a   :  { %v5536_v9 = vld [vmem:[%s7420_s28 + $0x8] sm:$0xff]  ;;  %161 = vmatpush.msra.mxu2 %v5531_v8  ;;  %v5554_v12 = vld [vmem:[%s7420_s28] sm:$0xff]  ;;  %v5567_v14 = vld [vmem:[%s7419_s8 + $0x38] sm:$0xff]  ;;  %vm215_vm3 = vcmask 64512   ;;  %s7423_s29 = sld [smem:[#allocation22_spill]] }
  0x1b   :  { %v5541_v10 = vld [vmem:[%s7421_s0 + $0x8] sm:$0xff]  ;;  %185 = vmatpush.msra.mxu3 %v5536_v9  ;;  %v5559_v13 = vld [vmem:[%s7421_s0] sm:$0xff]  ;;  %v5572_v15 = vld [vmem:[%s7420_s28 + $0x38] sm:$0xff]  ;;  %s7430_s4 = sld [smem:[#allocation23_spill]] }
  0x1c   :  { %209 = vmatpush.msrb.mxu0 %v5541_v10  ;;  %162 = vmatpush.msra.mxu2 %v5549_v11  ;;  %v5577_v16 = vld [vmem:[%s7419_s8 + $0x30] sm:$0xff]  ;;  %v5589_v18 = vld [vmem:[%s7419_s8 + $0x28] sm:$0xff]  ;;  %v5601_v20 = vld [vmem:[%s7419_s8 + $0x20] sm:$0xff]  ;;  %s7453_s1 = sld [smem:[#allocation15_spill]] }
  0x1d   :  { %186 = vmatpush.msra.mxu3 %v5554_v12  ;;  %v5584_v17 = vld [vmem:[%s7420_s28 + $0x30] sm:$0xff]  ;;  %v5594_v19 = vld [vmem:[%s7420_s28 + $0x28] sm:$0xff]  ;;  %v5606_v21 = vld [vmem:[%s7420_s28 + $0x20] sm:$0xff] }
  0x1e   :  { %210 = vmatpush.msrb.mxu0 %v5559_v13  ;;  %v4789_v25 = vld [vmem:[%s7418_s3 + $0x8] sm:$0xff]  ;;  %v5637_v27 = vld [vmem:[%s7421_s0 + $0x38] sm:$0xff]  ;;  %v5644_v29 = vld [vmem:[%s7421_s0 + $0x30] sm:$0xff] }
  0x1f   :  { %308 = vmatpush.msrb.mxu3 %v5567_v14  ;;  %v5615_v22 = vld [vmem:[%s7422_s30] ss:$0 sm:$0xff]  ;;  %4791 = vmatmul.msk.f32.vlgmr.msra.gmra.mxu1 %vm86_vm1, %v4789_v25  ;;  %v5651_v32 = vld [vmem:[%s7421_s0 + $0x28] sm:$0xff]  ;;  %v5670_v56 = vld [vmem:[%s7419_s8 + $0x58] sm:$0xff] }
  0x20   :  { %333 = vmatpush.msra.mxu0 %v5572_v15  ;;  %v5657_v33 = vld [vmem:[%s7421_s0 + $0x20] sm:$0xff]  ;;  %v5676_v57 = vld [vmem:[%s7419_s8 + $0x50] sm:$0xff]  ;;  %v5682_v58 = vld [vmem:[%s7419_s8 + $0x48] sm:$0xff] }
  0x21   :  { %309 = vmatpush.msrb.mxu3 %v5577_v16  ;;  %v5688_v59 = vld [vmem:[%s7419_s8 + $0x40] sm:$0xff] }
  0x22   :  { %334 = vmatpush.msra.mxu0 %v5584_v17  ;;  %v5698_v61 = vld [vmem:[%s7423_s29] sm:$0xff] }
  0x23   :  { %310 = vmatpush.msrb.mxu3 %v5589_v18 }
  0x24   :  { %335 = vmatpush.msra.mxu0 %v5594_v19 }
  0x25   :  { %311 = vmatpush.msrb.mxu3 %v5601_v20 }
  0x26   :  { %336 = vmatpush.msra.mxu0 %v5606_v21 }
  0x90   :  { %v111_v23 = vpop.f32.mrf.mxu0 }
  0x91   :  { %v5618_v24 = vadd.f32 %v5615_v22, %v111_v23 }
  0x93   :  { %4792 = vmatmul.msk.f32.vlgmr.msra.gmra.mxu2 %vm143_vm2, %v5618_v24  ;;  %4793 = vmatmul.msk.f32.vlgmr.msra.gmra.mxu3 %vm143_vm2, %v5618_v24 }
  0x94   :  { %4794 = vmatmul.msk.f32.vlgmr.msrb.gmra.mxu0 %vm143_vm2, %v5618_v24 }
  0x9b   :  { %4802 = vmatmul.msk.f32.vlgmr.msrb.gmra.mxu3 %vm143_vm2, %v5618_v24 }
  0x9c   :  { %4807 = vmatmul.msk.f32.vlgmr.msra.gmra.mxu0 %vm143_vm2, %v5618_v24  ;;  %v5663_v34 = vpop.f32.mrf.mxu1 }
 0x111   :  { %v212_v26 = vpop.f32.mrf.mxu0 }
 0x112   :  { %285 = vmatpush.msrb.mxu2 %v212_v26 }
 0x116   :  { %v188_v28 = vpop.f32.mrf.mxu3  ;;  %v164_v30 = vpop.f32.mrf.mxu2 }
 0x117   :  { %4795 = vmatpush.xpose.msk.msrb.mxu1 %vm215_vm3, %v188_v28 }
 0x119   :  { %v338_v31 = vpop.f32.mrf.mxu0 }
 0x11a   :  { %4813 = vmatpush.xpose.msk.msra.mxu2 %vm215_vm3, %v338_v31  ;;  %4796 = vmatmul.msk.f32.vlgmr.msrb.gmra.mxu1 %vm215_vm3, %v164_v30  ;;  %v5707_v31 = vld [vmem:[%s7420_s28 + $0x58] sm:$0xff] }
 0x11b   :  { %358 = vmatpush.msra.mxu1 %v5637_v27 }
 0x11d   :  { %359 = vmatpush.msra.mxu1 %v5644_v29 }
 0x11e   :  { %v313_v60 = vpop.f32.mrf.mxu3 }
 0x11f   :  { %360 = vmatpush.msra.mxu1 %v5651_v32 }
 0x121   :  { %361 = vmatpush.msra.mxu1 %v5657_v33 }
 0x122   :  { %4812 = vmatmul.msk.f32.vlgmr.msra.gmra.mxu1 %vm143_vm2, %v5618_v24 }
 0x123   :  { %483 = vmatpush.msrb.mxu1 %v5698_v61 }
 0x197   :  { %v239_v35 = vpop.f32.mrf.mxu1 }
 0x198   :  { %v242_v36 = vmul.f32 0.35355338, %v239_v35  ;;  %v5712_v35 = vld [vmem:[%s7420_s28 + $0x50] sm:$0xff] }
 0x19a   :  { %v243_v37 = vsel %vm215_vm3, %v242_v36, -inf }
 0x19b   :  { %244 = vmax.xlane.f32.xlu0 %v243_v37  ;;  %v5724_v37 = vld [vmem:[%s7420_s28 + $0x40] sm:$0xff] }
 0x19f   :  { %v363_v38 = vpop.f32.mrf.mxu1 }
 0x1a0   :  { %435 = vmatpush.msra.mxu3 %v363_v38 }
 0x1a2   :  { %530 = vmatpush.msrb.mxu3 %v5707_v31 }
 0x1a4   :  { %531 = vmatpush.msrb.mxu3 %v5712_v35 }
 0x20e   :  { %v245_v39 = vpop.xlane.xlu0 %244 }
 0x20f   :  { %v246_v40 = vsub.f32 %v242_v36, %v245_v39  ;;  %v5718_v36 = vld [vmem:[%s7420_s28 + $0x48] sm:$0xff] }
 0x210   :  { %532 = vmatpush.msrb.mxu3 %v5718_v36 }
 0x211   :  { %v247_v41 = vmul.f32 1.442695, %v246_v40 }
 0x212   :  { %533 = vmatpush.msrb.mxu3 %v5724_v37 }
 0x213   :  { %5214 = vpow2.f32 %v247_v41 }
 0x219   :  { %v5215_v42 = vpop.eup %5214 }
 0x21a   :  { %v249_v43 = vsel %vm215_vm3, %v5215_v42, 0.0 }
 0x21b   :  { %250 = vadd.xlane.f32.xlu0 %v249_v43 }
 0x28e   :  { %v251_v44 = vpop.xlane.xlu0 %250 }
 0x28f   :  { %5216 = vrcp.f32 %v251_v44  ;;  %v263_v48 = vand.u32 2147483648, %v251_v44  ;;  %v261_v50 = vand.u32 2147483647, %v251_v44  ;;  %vm257_vm5 = vweird.f32 %v251_v44 }
 0x291   :  { %v264_v52 = vor.u32 1.1754944e-38, %v263_v48  ;;  %vm262_vm7 = vcmp.eq.f32.partialorder %v261_v50, 8.507059e+37  ;;  %v5734_v50 = vld [vmem:[%s7423_s29 + $0x8] sm:$0xff] }
 0x292   :  { %460 = vmatpush.msrb.mxu0 %v5734_v50 }
 0x295   :  { %v5217_v45 = vpop.eup %5216 }
 0x296   :  { %v253_v46 = vmul.f32 %v5217_v45, %v251_v44  ;;  %vm258_vm4 = vweird.f32 %v5217_v45 }
 0x297   :  { %vm259_vm6 = vmor %vm257_vm5, %vm258_vm4 }
 0x298   :  { %v254_v47 = vsub.f32 1.0, %v253_v46 }
 0x29a   :  { %v255_v49 = vmul.f32 %v5217_v45, %v254_v47 }
 0x29c   :  { %v256_v51 = vadd.f32 %v5217_v45, %v255_v49 }
 0x29e   :  { %v260_v53 = vsel %vm259_vm6, %v5217_v45, %v256_v51  ;;  %v5740_v51 = vld [vmem:[%s7421_s0 + $0x58] sm:$0xff]  ;;  %vm898_vm6 = vcmask 523264  }
 0x29f   :  { %v265_v54 = vsel %vm262_vm7, %v264_v52, %v260_v53  ;;  %v5745_v52 = vld [vmem:[%s7421_s0 + $0x50] sm:$0xff]  ;;  %555 = vmatpush.msra.mxu0 %v5740_v51  ;;  %v5751_v53 = vld [vmem:[%s7421_s0 + $0x48] sm:$0xff] }
 0x2a0   :  { %v266_v55 = vmul.f32 %v5215_v42, %v265_v54  ;;  %v5758_v54 = vld [vmem:[%s7421_s0 + $0x40] sm:$0xff] }
 0x2a1   :  { %556 = vmatpush.msra.mxu0 %v5745_v52 }
 0x2a2   :  { %4797 = vmatmul.msk.f32.vlgmr.msrb.gmra.mxu2 %vm215_vm3, %v266_v55  ;;  %v5764_v55 = vld [vmem:[%s7419_s8 + $0x78] sm:$0xff] }
 0x2a3   :  { %505 = vmatpush.msrb.mxu2 %v5670_v56  ;;  %557 = vmatpush.msra.mxu0 %v5751_v53 }
 0x2a5   :  { %506 = vmatpush.msrb.mxu2 %v5676_v57  ;;  %558 = vmatpush.msra.mxu0 %v5758_v54 }
 0x2a7   :  { %507 = vmatpush.msrb.mxu2 %v5682_v58 }
 0x2a9   :  { %508 = vmatpush.msrb.mxu2 %v5688_v59 }
 0x2aa   :  { %4814 = vmatmul.msk.f32.vlgmr.msra.gmra.mxu2 %vm215_vm3, %v313_v60 }
 0x2b2   :  { %4823 = vmatmul.msk.f32.vlgmr.msrb.gmra.mxu2 %vm143_vm2, %v5618_v24 }
 0x325   :  { %v287_v62 = vpop.f32.mrf.mxu2 }
 0x326   :  { %4818 = vmatmul.msk.f32.vlgmr.msrb.gmra.mxu1 %vm215_vm3, %v287_v62  ;;  %v5770_v62 = vld [vmem:[%s7419_s8 + $0x70] sm:$0xff] }
 0x32d   :  { %v389_v63 = vpop.f32.mrf.mxu2 }
 0x32e   :  { %v392_v0 = vmul.f32 0.35355338, %v389_v63  ;;  %v5776_v63 = vld [vmem:[%s7419_s8 + $0x68] sm:$0xff] }
 0x330   :  { %v393_v1 = vsel %vm215_vm3, %v392_v0, -inf }
 0x331   :  { %394 = vmax.xlane.f32.xlu1 %v393_v1  ;;  %v5788_v1 = vld [vmem:[%s7420_s28 + $0x78] sm:$0xff] }
 0x3a4   :  { %v395_v23 = vpop.xlane.xlu1 %394 }
 0x3a5   :  { %v396_v25 = vsub.f32 %v392_v0, %v395_v23  ;;  %v5782_v0 = vld [vmem:[%s7419_s8 + $0x60] sm:$0xff] }
 0x3a7   :  { %v397_v26 = vmul.f32 1.442695, %v396_v25  ;;  %v5798_v25 = vld [vmem:[%s7420_s28 + $0x70] sm:$0xff] }
 0x3a8   :  { %7424 = vst [vmem:[#allocation5_spill] sm:$0xff] %v5798_v25 }
 0x3a9   :  { %5218 = vpow2.f32 %v397_v26  ;;  %v510_v26 = vpop.f32.mrf.mxu2 }
 0x3af   :  { %v5219_v28 = vpop.eup %5218 }
 0x3b0   :  { %v399_v30 = vsel %vm215_vm3, %v5219_v28, 0.0 }
 0x3b1   :  { %400 = vadd.xlane.f32.xlu1 %v399_v30  ;;  %v5810_v30 = vld [vmem:[%s7420_s28 + $0x60] sm:$0xff] }
 0x3b2   :  { %7426 = vst [vmem:[#allocation7_spill] sm:$0xff] %v5810_v30 }
 0x424   :  { %v401_v38 = vpop.xlane.xlu1 %400 }
 0x425   :  { %5220 = vrcp.f32 %v401_v38  ;;  %v413_v42 = vand.u32 2147483648, %v401_v38  ;;  %v411_v44 = vand.u32 2147483647, %v401_v38  ;;  %vm407_vm9 = vweird.f32 %v401_v38 }
 0x427   :  { %v414_v46 = vor.u32 1.1754944e-38, %v413_v42  ;;  %vm412_vm11 = vcmp.eq.f32.partialorder %v411_v44, 8.507059e+37 }
 0x42b   :  { %v5221_v39 = vpop.eup %5220 }
 0x42c   :  { %v403_v40 = vmul.f32 %v5221_v39, %v401_v38  ;;  %vm408_vm8 = vweird.f32 %v5221_v39  ;;  %v5821_v38 = vld [vmem:[%s7423_s29 + $0x10] sm:$0xff] }
 0x42d   :  { %vm409_vm10 = vmor %vm407_vm9, %vm408_vm8 }
 0x42e   :  { %v404_v41 = vsub.f32 1.0, %v403_v40  ;;  %v5826_v40 = vpop.f32.mrf.mxu1 }
 0x430   :  { %v405_v43 = vmul.f32 %v5221_v39, %v404_v41 }
 0x432   :  { %v406_v45 = vadd.f32 %v5221_v39, %v405_v43 }
 0x434   :  { %v410_v47 = vsel %vm409_vm10, %v5221_v39, %v406_v45 }
 0x435   :  { %v415_v48 = vsel %vm412_vm11, %v414_v46, %v410_v47 }
 0x436   :  { %v416_v49 = vmul.f32 %v5219_v28, %v415_v48  ;;  %v5804_v28 = vld [vmem:[%s7420_s28 + $0x68] sm:$0xff] }
 0x437   :  { %7425 = vst [vmem:[#allocation6_spill] sm:$0xff] %v5804_v28 }
 0x438   :  { %4815 = vmatmul.msk.f32.vlgmr.msra.gmra.mxu3 %vm215_vm3, %v416_v49 }
 0x439   :  { %657 = vmatpush.msra.mxu3 %v5821_v38 }
 0x440   :  { %4828 = vmatmul.msk.f32.vlgmr.msrb.gmra.mxu3 %vm143_vm2, %v5618_v24 }
 0x4bb   :  { %v437_v60 = vpop.f32.mrf.mxu3 }
 0x4bc   :  { %4817 = vmatmul.msk.f32.vlgmr.msrb.gmra.mxu0 %vm215_vm3, %v437_v60 }
 0x4bd   :  { %680 = vmatpush.msrb.mxu0 %v5764_v55 }
 0x4bf   :  { %681 = vmatpush.msrb.mxu0 %v5770_v62 }
 0x4c1   :  { %682 = vmatpush.msrb.mxu0 %v5776_v63 }
 0x4c3   :  { %v535_v23 = vpop.f32.mrf.mxu3  ;;  %683 = vmatpush.msrb.mxu0 %v5782_v0 }
 0x4c4   :  { %4833 = vmatmul.msk.f32.vlgmr.msra.gmra.mxu0 %vm143_vm2, %v5618_v24  ;;  %4834 = vmatpush.xpose.msk.msra.mxu1 %vm215_vm3, %v535_v23  ;;  %v5834_v23 = vld [vmem:[%s7421_s0 + $0x78] sm:$0xff] }
 0x4c5   :  { %7427 = vst [vmem:[#allocation8_spill] sm:$0xff] %v5834_v23 }
 0x4c7   :  { %4835 = vmatmul.msk.f32.vlgmr.msra.gmra.mxu1 %vm215_vm3, %v510_v26  ;;  %v5839_v26 = vld [vmem:[%s7421_s0 + $0x70] sm:$0xff] }
 0x4c8   :  { %705 = vmatpush.msrb.mxu1 %v5788_v1  ;;  %7428 = vst [vmem:[#allocation9_spill] sm:$0xff] %v5839_v26 }
 0x4ca   :  { %706 = vmatpush.msrb.mxu1 %v5798_v25 }
 0x4cc   :  { %707 = vmatpush.msrb.mxu1 %v5804_v28  ;;  %4843 = vmatmul.msk.f32.vlgmr.msrb.gmra.mxu0 %vm143_vm2, %v5618_v24 }
 0x4ce   :  { %708 = vmatpush.msrb.mxu1 %v5810_v30 }
 0x4cf   :  { %4848 = vmatmul.msk.f32.vlgmr.msrb.gmra.mxu1 %vm143_vm2, %v5618_v24 }
 0x539   :  { %v5824_v39 = vpop.f32.mrf.mxu0 }
 0x541   :  { %v560_v41 = vpop.f32.mrf.mxu0 }
 0x542   :  { %632 = vmatpush.msra.mxu2 %v560_v41  ;;  %v5845_v41 = vld [vmem:[%s7421_s0 + $0x68] sm:$0xff] }
 0x544   :  { %v586_v42 = vpop.f32.mrf.mxu1  ;;  %730 = vmatpush.msrb.mxu2 %v5834_v23 }
 0x545   :  { %v589_v43 = vmul.f32 0.35355338, %v586_v42  ;;  %v5851_v42 = vld [vmem:[%s7421_s0 + $0x60] sm:$0xff] }
 0x546   :  { %731 = vmatpush.msrb.mxu2 %v5839_v26  ;;  %7429 = vst [vmem:[#allocation10_spill] sm:$0xff] %v5851_v42 }
 0x547   :  { %v590_v44 = vsel %vm215_vm3, %v589_v43, -inf }
 0x548   :  { %591 = vmax.xlane.f32.xlu2 %v590_v44  ;;  %732 = vmatpush.msrb.mxu2 %v5845_v41 }
 0x54a   :  { %733 = vmatpush.msrb.mxu2 %v5851_v42 }
 0x54c   :  { %v710_v45 = vpop.f32.mrf.mxu1 }
 0x54d   :  { %4854 = vmatpush.xpose.msk.msrb.mxu3 %vm215_vm3, %v710_v45 }
 0x5bb   :  { %v592_v46 = vpop.xlane.xlu2 %591 }
 0x5bc   :  { %v593_v47 = vsub.f32 %v589_v43, %v592_v46 }
 0x5be   :  { %v594_v48 = vmul.f32 1.442695, %v593_v47 }
 0x5c0   :  { %5222 = vpow2.f32 %v594_v48 }
 0x5c6   :  { %v5223_v49 = vpop.eup %5222 }
 0x5c7   :  { %v596_v60 = vsel %vm215_vm3, %v5223_v49, 0.0 }
 0x5c8   :  { %597 = vadd.xlane.f32.xlu2 %v596_v60 }
 0x63b   :  { %v598_v43 = vpop.xlane.xlu2 %597 }
 0x63c   :  { %5224 = vrcp.f32 %v598_v43  ;;  %v610_v47 = vand.u32 2147483648, %v598_v43  ;;  %v608_v60 = vand.u32 2147483647, %v598_v43  ;;  %vm604_vm13 = vweird.f32 %v598_v43 }
 0x63e   :  { %v611_v26 = vor.u32 1.1754944e-38, %v610_v47  ;;  %vm609_vm15 = vcmp.eq.f32.partialorder %v608_v60, 8.507059e+37 }
 0x642   :  { %v5225_v44 = vpop.eup %5224 }
 0x643   :  { %v600_v45 = vmul.f32 %v5225_v44, %v598_v43  ;;  %vm605_vm12 = vweird.f32 %v5225_v44 }
 0x644   :  { %vm606_vm14 = vmor %vm604_vm13, %vm605_vm12 }
 0x645   :  { %v601_v46 = vsub.f32 1.0, %v600_v45  ;;  %v685_v45 = vpop.f32.mrf.mxu0 }
 0x647   :  { %v602_v48 = vmul.f32 %v5225_v44, %v601_v46 }
 0x649   :  { %v603_v23 = vadd.f32 %v5225_v44, %v602_v48 }
 0x64b   :  { %v607_v30 = vsel %vm606_vm14, %v5225_v44, %v603_v23 }
 0x64c   :  { %v612_v28 = vsel %vm609_vm15, %v611_v26, %v607_v30 }
 0x64d   :  { %v613_v25 = vmul.f32 %v5223_v49, %v612_v28 }
 0x64f   :  { %4836 = vmatmul.msk.f32.vlgmr.msra.gmra.mxu2 %vm215_vm3, %v613_v25 }
 0x657   :  { %4853 = vmatmul.msk.f32.vlgmr.msrb.gmra.mxu2 %vm143_vm2, %v5618_v24 }
 0x6d2   :  { %v634_v42 = vpop.f32.mrf.mxu2 }
 0x6d3   :  { %4838 = vmatmul.msk.f32.vlgmr.msra.gmra.mxu3 %vm215_vm3, %v634_v42 }
 0x6da   :  { %v735_v46 = vpop.f32.mrf.mxu2 }
 0x6db   :  { %4855 = vmatmul.msk.f32.vlgmr.msrb.gmra.mxu3 %vm215_vm3, %v685_v45  ;;  %807 = vmatpush.msra.mxu0 %v735_v46 }
 0x6dd   :  { %948 = vmatpush.msrb.mxu0 %v5492_v2  ;;  %v5869_v2 = vld [vmem:[%s7423_s29 + $0x18] sm:$0xff] }
 0x6de   :  { %832 = vmatpush.msra.mxu1 %v5869_v2 }
 0x6df   :  { %949 = vmatpush.msrb.mxu0 %v5509_v5 }
 0x6e0   :  { %968 = vmatpush.msrb.mxu1 %v5499_v3 }
 0x6e1   :  { %950 = vmatpush.msrb.mxu0 %v5531_v8 }
 0x6e2   :  { %969 = vmatpush.msrb.mxu1 %v5516_v6 }
 0x6e3   :  { %951 = vmatpush.msrb.mxu0 %v5549_v11 }
 0x6e4   :  { %970 = vmatpush.msrb.mxu1 %v5536_v9  ;;  %v5879_v9 = vadd.f32 %v5615_v22, %v5663_v34  ;;  %v5895_v22 = vld [vmem:[%s7361_s12 + $0x10] sm:$0xff]  ;;  %v5901_v34 = vld [vmem:[%s7361_s12 + $0x8] sm:$0xff] }
 0x6e6   :  { %971 = vmatpush.msrb.mxu1 %v5554_v12 }
 0x756   :  { %v659_v25 = vpop.f32.mrf.mxu3 }
 0x75e   :  { %v761_v28 = vpop.f32.mrf.mxu3 }
 0x75f   :  { %v764_v30 = vmul.f32 0.35355338, %v761_v28 }
 0x761   :  { %v765_v49 = vsel %vm215_vm3, %v764_v30, -inf }
 0x762   :  { %766 = vmax.xlane.f32.xlu0 %v765_v49  ;;  %v5889_v49 = vld [vmem:[%s7361_s12 + $0x18] sm:$0xff] }
 0x763   :  { %877 = vmatpush.msra.mxu2 %v5889_v49 }
 0x765   :  { %878 = vmatpush.msra.mxu2 %v5895_v22 }
 0x767   :  { %879 = vmatpush.msra.mxu2 %v5901_v34 }
 0x7d5   :  { %v767_v23 = vpop.xlane.xlu0 %766 }
 0x7d6   :  { %v768_v26 = vsub.f32 %v764_v30, %v767_v23  ;;  %v5907_v23 = vld [vmem:[%s7361_s12] sm:$0xff] }
 0x7d7   :  { %880 = vmatpush.msra.mxu2 %v5907_v23 }
 0x7d8   :  { %v769_v42 = vmul.f32 1.442695, %v768_v26  ;;  %v5917_v26 = vld [vmem:[%s7363_s14 + $0x38] sm:$0xff] }
 0x7d9   :  { %988 = vmatpush.msrb.mxu2 %v5504_v4  ;;  %910 = vmatpush.msra.mxu3 %v5917_v26  ;;  %v486_v4 = vadd.f32 %v5826_v40, %v5824_v39  ;;  %v5943_v39 = vld [vmem:[%s7359_s10] ss:$0 sm:$0xff] }
 0x7da   :  { %5226 = vpow2.f32 %v769_v42  ;;  %v5922_v42 = vld [vmem:[%s7363_s14 + $0x30] sm:$0xff] }
 0x7db   :  { %989 = vmatpush.msrb.mxu2 %v5521_v7  ;;  %v5930_v7 = vld [vmem:[%s7363_s14 + $0x28] sm:$0xff]  ;;  %911 = vmatpush.msra.mxu3 %v5922_v42 }
 0x7dd   :  { %990 = vmatpush.msrb.mxu2 %v5541_v10  ;;  %v662_v10 = vadd.f32 %v659_v25, %v486_v4  ;;  %912 = vmatpush.msra.mxu3 %v5930_v7  ;;  %v5949_v25 = vld [vmem:[%s7360_s11] ss:$0 sm:$0xff] }
 0x7df   :  { %991 = vmatpush.msrb.mxu2 %v5559_v13  ;;  %v5936_v13 = vld [vmem:[%s7430_s4] ss:$0 sm:$0xff] }
 0x7e0   :  { %v5227_v43 = vpop.eup %5226 }
 0x7e1   :  { %v771_v44 = vsel %vm215_vm3, %v5227_v43, 0.0 }
 0x7e2   :  { %772 = vadd.xlane.f32.xlu1 %v771_v44 }
 0x855   :  { %v773_v5 = vpop.xlane.xlu1 %772 }
 0x856   :  { %5228 = vrcp.f32 %v773_v5  ;;  %v785_v48 = vand.u32 2147483648, %v773_v5  ;;  %v783_v45 = vand.u32 2147483647, %v773_v5  ;;  %vm779_vm1 = vweird.f32 %v773_v5 }
 0x858   :  { %v786_v28 = vor.u32 1.1754944e-38, %v785_v48  ;;  %vm784_vm5 = vcmp.eq.f32.partialorder %v783_v45, 8.507059e+37 }
 0x85c   :  { %v5229_v8 = vpop.eup %5228 }
 0x85d   :  { %v775_v11 = vmul.f32 %v5229_v8, %v773_v5  ;;  %vm780_vm0 = vweird.f32 %v5229_v8 }
 0x85e   :  { %vm781_vm4 = vmor %vm779_vm1, %vm780_vm0 }
 0x85f   :  { %v776_v47 = vsub.f32 1.0, %v775_v11 }
 0x861   :  { %v777_v60 = vmul.f32 %v5229_v8, %v776_v47 }
 0x863   :  { %v778_v46 = vadd.f32 %v5229_v8, %v777_v60 }
 0x865   :  { %v782_v3 = vsel %vm781_vm4, %v5229_v8, %v778_v46 }
 0x866   :  { %v787_v30 = vsel %vm784_vm5, %v786_v28, %v782_v3 }
 0x867   :  { %v788_v6 = vmul.f32 %v5227_v43, %v787_v30 }
 0x869   :  { %4856 = vmatmul.msk.f32.vlgmr.msra.gmra.mxu0 %vm215_vm3, %v788_v6 }
 0x871   :  { %4861 = vmatmul.msk.f32.vlgmr.msrb.gmra.mxu0 %vm143_vm2, %v5879_v9 }
 0x8e6   :  { %v809_v12 = vpop.f32.mrf.mxu0 }
 0x8e7   :  { %4858 = vmatmul.msk.f32.vlgmr.msra.gmra.mxu1 %vm215_vm3, %v809_v12 }
 0x8ee   :  { %v953_v48 = vpop.f32.mrf.mxu0 }
 0x8ef   :  { %4862 = vmatmul.msk.f32.vlgmr.msrb.gmra.mxu1 %vm143_vm2, %v5879_v9 }
 0x964   :  { %v834_v43 = vpop.f32.mrf.mxu1 }
 0x965   :  { %v837_v44 = vadd.f32 %v834_v43, %v662_v10 }
 0x967   :  { %v842_v5 = vadd.f32 %v5936_v13, %v837_v44 }
 0x969   :  { %v843_v40 = vadd.f32 %v842_v5, %v5618_v24  ;;  %v6001_v24 = vld [vmem:[%s7363_s14] sm:$0xff] }
 0x96b   :  { %v848_v8 = vmul.f32 %v5943_v39, %v843_v40 }
 0x96c   :  { %v973_v11 = vpop.f32.mrf.mxu1 }
 0x96d   :  { %v5953_v47 = vadd.f32 %v5949_v25, %v848_v8  ;;  %4864 = vmatpush.xpose.msk.msra.mxu0 %vm215_vm3, %v973_v11 }
 0x96f   :  { %4859 = vmatmul.msk.f32.vlgmr.msra.gmra.mxu2 %vm143_vm2, %v5953_v47 }
 0x970   :  { %4865 = vmatmul.msk.f32.vlgmr.msra.gmra.mxu0 %vm215_vm3, %v953_v48  ;;  %1082 = vmatpush.msra.mxu2 %v5567_v14  ;;  %v5977_v14 = vld [vmem:[%s7363_s14 + $0x20] sm:$0xff] }
 0x971   :  { %1122 = vmatpush.msrb.mxu0 %v5637_v27  ;;  %913 = vmatpush.msra.mxu3 %v5977_v14 }
 0x972   :  { %1083 = vmatpush.msra.mxu2 %v5577_v16  ;;  %v5982_v16 = vld [vmem:[%s7363_s14 + $0x18] sm:$0xff] }
 0x973   :  { %1123 = vmatpush.msrb.mxu0 %v5644_v29  ;;  %914 = vmatpush.msra.mxu3 %v5982_v16 }
 0x974   :  { %1084 = vmatpush.msra.mxu2 %v5589_v18  ;;  %v5989_v18 = vld [vmem:[%s7363_s14 + $0x10] sm:$0xff] }
 0x975   :  { %1124 = vmatpush.msrb.mxu0 %v5651_v32  ;;  %915 = vmatpush.msra.mxu3 %v5989_v18  ;;  %v6011_v32 = vld [vmem:[%s7362_s13] ss:$0 sm:$0xff] }
 0x976   :  { %1085 = vmatpush.msra.mxu2 %v5601_v20  ;;  %v5995_v20 = vld [vmem:[%s7363_s14 + $0x8] sm:$0xff] }
 0x977   :  { %1125 = vmatpush.msrb.mxu0 %v5657_v33  ;;  %4863 = vmatmul.msk.f32.vlgmr.msrb.gmra.mxu2 %vm143_vm2, %v5879_v9 }
 0x978   :  { %4869 = vmatmul.msk.f32.vlgmr.msrb.gmra.mxu0 %vm143_vm2, %v5879_v9  ;;  %916 = vmatpush.msra.mxu3 %v5995_v20 }
 0x979   :  { %1245 = vmatpush.msra.mxu0 %v5698_v61 }
 0x97a   :  { %917 = vmatpush.msra.mxu3 %v6001_v24 }
 0x97c   :  { %1102 = vmatpush.msrb.mxu3 %v5572_v15 }
 0x97e   :  { %1103 = vmatpush.msrb.mxu3 %v5584_v17 }
 0x97f   :  { %4867 = vmatmul.msk.f32.vlgmr.msra.gmra.mxu2 %vm143_vm2, %v5879_v9 }
 0x980   :  { %1104 = vmatpush.msrb.mxu3 %v5594_v19 }
 0x982   :  { %1105 = vmatpush.msrb.mxu3 %v5606_v21 }
 0x9ed   :  { %v1019_v27 = vpop.f32.mrf.mxu0 }
 0x9ee   :  { %v1022_v29 = vmul.f32 0.35355338, %v1019_v27 }
 0x9f0   :  { %v1023_v33 = vsel %vm215_vm3, %v1022_v29, -inf }
 0x9f1   :  { %1024 = vmax.xlane.f32.xlu2 %v1023_v33 }
 0x9f2   :  { %v882_v61 = vpop.f32.mrf.mxu2 }
 0x9f3   :  { %v883_v60 = vadd.f32 %v6011_v32, %v882_v61 }
 0x9f5   :  { %v885_v15 = vmax.f32 %v883_v60, 0.0  ;;  %v1127_v17 = vpop.f32.mrf.mxu0 }
 0x9f6   :  { %1199 = vmatpush.msrb.mxu2 %v1127_v17 }
 0x9f7   :  { %4860 = vmatmul.msk.f32.vlgmr.msra.gmra.mxu3 %vm898_vm6, %v885_v15 }
 0x9f8   :  { %1282 = vmatpush.msra.mxu2 %v5707_v31  ;;  %1222 = vmatpush.msra.mxu3 %v5734_v50 }
 0x9fa   :  { %1283 = vmatpush.msra.mxu2 %v5712_v35  ;;  %v993_v19 = vpop.f32.mrf.mxu2 }
 0x9fb   :  { %1065 = vmatpush.msra.mxu1 %v993_v19 }
 0x9fc   :  { %1284 = vmatpush.msra.mxu2 %v5718_v36 }
 0x9fe   :  { %1285 = vmatpush.msra.mxu2 %v5724_v37 }
 0x9ff   :  { %4868 = vmatmul.msk.f32.vlgmr.msrb.gmra.mxu3 %vm143_vm2, %v5879_v9 }
 0xa00   :  { %1302 = vmatpush.msrb.mxu3 %v5740_v51 }
 0xa02   :  { %1303 = vmatpush.msrb.mxu3 %v5745_v52  ;;  %v1087_v43 = vpop.f32.mrf.mxu2 }
 0xa04   :  { %1304 = vmatpush.msrb.mxu3 %v5751_v53 }
 0xa06   :  { %1305 = vmatpush.msrb.mxu3 %v5758_v54 }
 0xa64   :  { %v1025_v21 = vpop.xlane.xlu2 %1024 }
 0xa65   :  { %v1026_v31 = vsub.f32 %v1022_v29, %v1025_v21 }
 0xa67   :  { %v1027_v35 = vmul.f32 1.442695, %v1026_v31 }
 0xa69   :  { %5230 = vpow2.f32 %v1027_v35 }
 0xa6f   :  { %v5231_v50 = vpop.eup %5230 }
 0xa70   :  { %v1029_v36 = vsel %vm215_vm3, %v5231_v50, 0.0 }
 0xa71   :  { %1030 = vadd.xlane.f32.xlu0 %v1029_v36 }
 0xa7a   :  { %v6028_v37 = vpop.f32.mrf.mxu3 }
 0xa82   :  { %v1107_v45 = vpop.f32.mrf.mxu3 }
 0xa83   :  { %4870 = vmatpush.xpose.msk.msrb.mxu1 %vm215_vm3, %v1107_v45  ;;  %v7431_v45 = vld [vmem:[#allocation5_spill] sm:$0xff] }
 0xae4   :  { %v1031_v51 = vpop.xlane.xlu0 %1030 }
 0xae5   :  { %5232 = vrcp.f32 %v1031_v51  ;;  %v1043_v28 = vand.u32 2147483648, %v1031_v51  ;;  %v1041_v3 = vand.u32 2147483647, %v1031_v51  ;;  %vm1037_vm8 = vweird.f32 %v1031_v51 }
 0xae7   :  { %v1044_v6 = vor.u32 1.1754944e-38, %v1043_v28  ;;  %vm1042_vm10 = vcmp.eq.f32.partialorder %v1041_v3, 8.507059e+37  ;;  %v7435_v28 = vld [vmem:[#allocation9_spill] sm:$0xff] }
 0xaeb   :  { %v5233_v52 = vpop.eup %5232 }
 0xaec   :  { %v1033_v46 = vmul.f32 %v5233_v52, %v1031_v51  ;;  %vm1038_vm7 = vweird.f32 %v5233_v52 }
 0xaed   :  { %vm1039_vm9 = vmor %vm1037_vm8, %vm1038_vm7 }
 0xaee   :  { %v1034_v53 = vsub.f32 1.0, %v1033_v46 }
 0xaf0   :  { %v1035_v54 = vmul.f32 %v5233_v52, %v1034_v53  ;;  %v7434_v53 = vld [vmem:[#allocation8_spill] sm:$0xff] }
 0xaf2   :  { %v1036_v30 = vadd.f32 %v5233_v52, %v1035_v54 }
 0xaf4   :  { %v1040_v12 = vsel %vm1039_vm9, %v5233_v52, %v1036_v30 }
 0xaf5   :  { %v1045_v4 = vsel %vm1042_vm10, %v1044_v6, %v1040_v12 }
 0xaf6   :  { %v1046_v10 = vmul.f32 %v5231_v50, %v1045_v4 }
 0xaf8   :  { %4866 = vmatmul.msk.f32.vlgmr.msra.gmra.mxu1 %vm215_vm3, %v1046_v10 }
 0xaf9   :  { %1262 = vmatpush.msra.mxu1 %v5670_v56 }
 0xafb   :  { %1263 = vmatpush.msra.mxu1 %v5676_v57 }
 0xafd   :  { %1264 = vmatpush.msra.mxu1 %v5682_v58 }
 0xaff   :  { %1265 = vmatpush.msra.mxu1 %v5688_v59 }
 0xb00   :  { %4871 = vmatmul.msk.f32.vlgmr.msrb.gmra.mxu1 %vm215_vm3, %v1087_v43 }
 0xb08   :  { %4875 = vmatmul.msk.f32.vlgmr.msra.gmra.mxu1 %vm143_vm2, %v5879_v9 }
 0xb75   :  { %v1067_v44 = vpop.f32.mrf.mxu1 }
 0xb76   :  { %4874 = vmatmul.msk.f32.vlgmr.msra.gmra.mxu0 %vm215_vm3, %v1067_v44 }
 0xb7d   :  { %v1153_v5 = vpop.f32.mrf.mxu1 }
 0xb7e   :  { %v1156_v40 = vmul.f32 0.35355338, %v1153_v5 }
 0xb80   :  { %v1157_v8 = vsel %vm215_vm3, %v1156_v40, -inf }
 0xb81   :  { %1158 = vmax.xlane.f32.xlu1 %v1157_v8 }
 0xbf4   :  { %v1159_v56 = vpop.xlane.xlu1 %1158 }
 0xbf5   :  { %v1160_v57 = vsub.f32 %v1156_v40, %v1159_v56 }
 0xbf7   :  { %v1161_v11 = vmul.f32 1.442695, %v1160_v57 }
 0xbf9   :  { %5234 = vpow2.f32 %v1161_v11 }
 0xbff   :  { %v5235_v58 = vpop.eup %5234 }
 0xc00   :  { %v1163_v59 = vsel %vm215_vm3, %v5235_v58, 0.0 }
 0xc01   :  { %1164 = vadd.xlane.f32.xlu2 %v1163_v59 }
 0xc74   :  { %v1165_v48 = vpop.xlane.xlu2 %1164 }
 0xc75   :  { %5236 = vrcp.f32 %v1165_v48  ;;  %v1177_v61 = vand.u32 2147483648, %v1165_v48  ;;  %v1175_v15 = vand.u32 2147483647, %v1165_v48  ;;  %vm1171_vm12 = vweird.f32 %v1165_v48 }
 0xc77   :  { %v1178_v19 = vor.u32 1.1754944e-38, %v1177_v61  ;;  %vm1176_vm14 = vcmp.eq.f32.partialorder %v1175_v15, 8.507059e+37 }
 0xc7b   :  { %v5237_v27 = vpop.eup %5236 }
 0xc7c   :  { %v1167_v29 = vmul.f32 %v5237_v27, %v1165_v48  ;;  %vm1172_vm11 = vweird.f32 %v5237_v27 }
 0xc7d   :  { %vm1173_vm13 = vmor %vm1171_vm12, %vm1172_vm11 }
 0xc7e   :  { %v1168_v33 = vsub.f32 1.0, %v1167_v29 }
 0xc80   :  { %v1169_v60 = vmul.f32 %v5237_v27, %v1168_v33  ;;  %v6116_v33 = vld [vmem:[%s7419_s8 + $0x80] sm:$0xff] }
 0xc82   :  { %v1170_v17 = vadd.f32 %v5237_v27, %v1169_v60 }
 0xc84   :  { %v1174_v21 = vsel %vm1173_vm13, %v5237_v27, %v1170_v17  ;;  %v6123_v17 = vld [vmem:[%s7364_s15] ss:$0 sm:$0xff] }
 0xc85   :  { %v1179_v31 = vsel %vm1176_vm14, %v1178_v19, %v1174_v21 }
 0xc86   :  { %v1180_v35 = vmul.f32 %v5235_v58, %v1179_v31 }
 0xc88   :  { %4872 = vmatmul.msk.f32.vlgmr.msrb.gmra.mxu2 %vm215_vm3, %v1180_v35 }
 0xc89   :  { %1402 = vmatpush.msrb.mxu2 %v5821_v38  ;;  %v1267_v38 = vpop.f32.mrf.mxu1 }
 0xc90   :  { %4876 = vmatmul.msk.f32.vlgmr.msra.gmra.mxu2 %vm143_vm2, %v5879_v9 }
 0xd0b   :  { %v1201_v50 = vpop.f32.mrf.mxu2 }
 0xd0c   :  { %4873 = vmatmul.msk.f32.vlgmr.msra.gmra.mxu3 %vm215_vm3, %v1201_v50  ;;  %v920_v50 = vadd.f32 %v6123_v17, %v6028_v37  ;;  %v6138_v37 = vld [vmem:[%s7366_s17] ss:$0 sm:$0xff] }
 0xd0d   :  { %1420 = vmatpush.msra.mxu3 %v5764_v55  ;;  %v7432_v55 = vld [vmem:[#allocation6_spill] sm:$0xff] }
 0xd0f   :  { %1421 = vmatpush.msra.mxu3 %v5770_v62  ;;  %v7433_v62 = vld [vmem:[#allocation7_spill] sm:$0xff] }
 0xd11   :  { %1422 = vmatpush.msra.mxu3 %v5776_v63  ;;  %v6064_v63 = vpop.f32.mrf.mxu0 }
 0xd13   :  { %v1287_v36 = vpop.f32.mrf.mxu2  ;;  %1423 = vmatpush.msra.mxu3 %v5782_v0 }
 0xd14   :  { %4877 = vmatmul.msk.f32.vlgmr.msrb.gmra.mxu3 %vm143_vm2, %v5879_v9  ;;  %4878 = vmatpush.xpose.msk.msrb.mxu0 %vm215_vm3, %v1287_v36 }
 0xd17   :  { %4879 = vmatmul.msk.f32.vlgmr.msrb.gmra.mxu0 %vm215_vm3, %v1267_v38 }
 0xd18   :  { %1440 = vmatpush.msra.mxu0 %v5788_v1 }
 0xd1a   :  { %1441 = vmatpush.msra.mxu0 %v7431_v45 }
 0xd1c   :  { %1442 = vmatpush.msra.mxu0 %v7432_v55  ;;  %4882 = vmatmul.msk.f32.vlgmr.msra.gmra.mxu3 %vm143_vm2, %v5879_v9 }
 0xd1e   :  { %1443 = vmatpush.msra.mxu0 %v7433_v62  ;;  %v922_v62 = vadd.f32 %v920_v50, %v5953_v47  ;;  %v6148_v47 = vld [vmem:[%s7420_s28 + $0x98] sm:$0xff] }
 0xd1f   :  { %4883 = vmatmul.msk.f32.vlgmr.msra.gmra.mxu0 %vm143_vm2, %v5879_v9 }
 0xd20   :  { %1560 = vmatpush.msrb.mxu0 %v5869_v2  ;;  %v7436_v2 = vld [vmem:[#allocation10_spill] sm:$0xff] }
 0xd22   :  { %1665 = vmatpush.msra.mxu0 %v6148_v47 }
 0xd8f   :  { %v6066_v0 = vpop.f32.mrf.mxu3 }
 0xd94   :  { %v1333_v1 = vpop.f32.mrf.mxu0 }
 0xd95   :  { %v1336_v51 = vmul.f32 0.35355338, %v1333_v1  ;;  %v6131_v1 = vld [vmem:[%s7365_s16] ss:$0 sm:$0xff] }
 0xd97   :  { %v1307_v52 = vpop.f32.mrf.mxu3  ;;  %v1337_v46 = vsel %vm215_vm3, %v1336_v51, -inf }
 0xd98   :  { %1338 = vmax.xlane.f32.xlu0 %v1337_v46  ;;  %1379 = vmatpush.msrb.mxu1 %v1307_v52  ;;  %v927_v52 = vmul.f32 %v6131_v1, %v922_v62 }
 0xd9a   :  { %1460 = vmatpush.msra.mxu1 %v7434_v53  ;;  %v6141_v46 = vadd.f32 %v6138_v37, %v927_v52  ;;  %v6153_v53 = vld [vmem:[%s7420_s28 + $0x90] sm:$0xff] }
 0xd9b   :  { %1666 = vmatpush.msra.mxu0 %v6153_v53 }
 0xd9c   :  { %1461 = vmatpush.msra.mxu1 %v7435_v28  ;;  %v1445_v54 = vpop.f32.mrf.mxu0  ;;  %v6159_v28 = vld [vmem:[%s7420_s28 + $0x88] sm:$0xff] }
 0xd9d   :  { %4885 = vmatpush.xpose.msk.msra.mxu2 %vm215_vm3, %v1445_v54  ;;  %1667 = vmatpush.msra.mxu0 %v6159_v28  ;;  %v6166_v54 = vld [vmem:[%s7420_s28 + $0x80] sm:$0xff] }
 0xd9e   :  { %1462 = vmatpush.msra.mxu1 %v5845_v41 }
 0xd9f   :  { %v1425_v27 = vpop.f32.mrf.mxu3  ;;  %1668 = vmatpush.msra.mxu0 %v6166_v54 }
 0xda0   :  { %1463 = vmatpush.msra.mxu1 %v7436_v2 }
 0xe0b   :  { %v1339_v3 = vpop.xlane.xlu0 %1338 }
 0xe0c   :  { %v1340_v30 = vsub.f32 %v1336_v51, %v1339_v3  ;;  %v6175_v3 = vld [vmem:[%s7421_s0 + $0x98] sm:$0xff] }
 0xe0e   :  { %v1341_v6 = vmul.f32 1.442695, %v1340_v30  ;;  %v6181_v30 = vld [vmem:[%s7421_s0 + $0x90] sm:$0xff] }
 0xe10   :  { %5238 = vpow2.f32 %v1341_v6  ;;  %v6186_v6 = vld [vmem:[%s7421_s0 + $0x88] sm:$0xff] }
 0xe16   :  { %v5239_v12 = vpop.eup %5238 }
 0xe17   :  { %v1343_v4 = vsel %vm215_vm3, %v5239_v12, 0.0 }
 0xe18   :  { %1344 = vadd.xlane.f32.xlu1 %v1343_v4  ;;  %v1248_v4 = vadd.f32 %v6064_v63, %v6066_v0  ;;  %v6214_v63 = vld [vmem:[%s7419_s8 + $0xb8] sm:$0xff]  ;;  %v6240_v0 = vld [vmem:[%s7419_s8 + $0xa8] sm:$0xff] }
 0xe8b   :  { %v1345_v10 = vpop.xlane.xlu1 %1344 }
 0xe8c   :  { %5240 = vrcp.f32 %v1345_v10  ;;  %v1357_v40 = vand.u32 2147483648, %v1345_v10  ;;  %v1355_v56 = vand.u32 2147483647, %v1345_v10  ;;  %vm1351_vm0 = vweird.f32 %v1345_v10 }
 0xe8e   :  { %v1358_v57 = vor.u32 1.1754944e-38, %v1357_v40  ;;  %vm1356_vm4 = vcmp.eq.f32.partialorder %v1355_v56, 8.507059e+37  ;;  %v6205_v56 = vld [vmem:[%s7421_s0 + $0xb8] sm:$0xff] }
 0xe92   :  { %v5241_v43 = vpop.eup %5240 }
 0xe93   :  { %v1347_v44 = vmul.f32 %v5241_v43, %v1345_v10  ;;  %vm1352_vm15 = vweird.f32 %v5241_v43 }
 0xe94   :  { %vm1353_vm1 = vmor %vm1351_vm0, %vm1352_vm15 }
 0xe95   :  { %v1348_v5 = vsub.f32 1.0, %v1347_v44 }
 0xe97   :  { %v1349_v8 = vmul.f32 %v5241_v43, %v1348_v5 }
 0xe99   :  { %v1350_v41 = vadd.f32 %v5241_v43, %v1349_v8 }
 0xe9b   :  { %v1354_v11 = vsel %vm1353_vm1, %v5241_v43, %v1350_v41 }
 0xe9c   :  { %v1359_v58 = vsel %vm1356_vm4, %v1358_v57, %v1354_v11  ;;  %v6245_v11 = vld [vmem:[%s7421_s0 + $0xa0] sm:$0xff] }
 0xe9d   :  { %v1360_v59 = vmul.f32 %v5239_v12, %v1359_v58  ;;  %v6192_v12 = vld [vmem:[%s7421_s0 + $0x80] sm:$0xff] }
 0xe9e   :  { %v6252_v58 = vld [vmem:[%s7419_s8 + $0xa0] sm:$0xff] }
 0xe9f   :  { %4880 = vmatmul.msk.f32.vlgmr.msrb.gmra.mxu1 %vm215_vm3, %v1360_v59  ;;  %v6266_v59 = vld [vmem:[%s7420_s28 + $0xb8] sm:$0xff] }
 0xea0   :  { %1585 = vmatpush.msrb.mxu1 %v5889_v49 }
 0xea2   :  { %1586 = vmatpush.msrb.mxu1 %v5895_v22 }
 0xea4   :  { %1587 = vmatpush.msrb.mxu1 %v5901_v34 }
 0xea6   :  { %1588 = vmatpush.msrb.mxu1 %v5907_v23 }
 0xea7   :  { %4884 = vmatmul.msk.f32.vlgmr.msra.gmra.mxu1 %vm143_vm2, %v5879_v9 }
 0xea8   :  { %1690 = vmatpush.msra.mxu1 %v6175_v3 }
 0xeaa   :  { %1691 = vmatpush.msra.mxu1 %v6181_v30 }
 0xeac   :  { %1692 = vmatpush.msra.mxu1 %v6186_v6 }
 0xeae   :  { %1693 = vmatpush.msra.mxu1 %v6192_v12 }
 0xf1c   :  { %v1381_v48 = vpop.f32.mrf.mxu1 }
 0xf1d   :  { %4881 = vmatmul.msk.f32.vlgmr.msrb.gmra.mxu2 %vm215_vm3, %v1381_v48  ;;  %v6272_v48 = vld [vmem:[%s7420_s28 + $0xb0] sm:$0xff] }
 0xf1e   :  { %1605 = vmatpush.msrb.mxu2 %v5917_v26 }
 0xf20   :  { %1606 = vmatpush.msrb.mxu2 %v5922_v42 }
 0xf22   :  { %1607 = vmatpush.msrb.mxu2 %v5930_v7 }
 0xf24   :  { %v1465_v49 = vpop.f32.mrf.mxu1  ;;  %1608 = vmatpush.msrb.mxu2 %v5977_v14 }
 0xf25   :  { %4886 = vmatmul.msk.f32.vlgmr.msra.gmra.mxu2 %vm215_vm3, %v1425_v27  ;;  %1537 = vmatpush.msrb.mxu3 %v1465_v49  ;;  %v6278_v27 = vld [vmem:[%s7420_s28 + $0xa8] sm:$0xff]  ;;  %v6284_v49 = vld [vmem:[%s7420_s28 + $0xa0] sm:$0xff] }
 0xf26   :  { %1609 = vmatpush.msrb.mxu2 %v5982_v16 }
 0xf28   :  { %1610 = vmatpush.msrb.mxu2 %v5989_v18  ;;  %v6099_v18 = vld [vmem:[%s7419_s8 + $0x98] sm:$0xff] }
 0xf29   :  { %1640 = vmatpush.msra.mxu3 %v6099_v18 }
 0xf2a   :  { %1611 = vmatpush.msrb.mxu2 %v5995_v20  ;;  %v6104_v20 = vld [vmem:[%s7419_s8 + $0x90] sm:$0xff] }
 0xf2b   :  { %1641 = vmatpush.msra.mxu3 %v6104_v20 }
 0xf2c   :  { %1612 = vmatpush.msrb.mxu2 %v6001_v24  ;;  %v6110_v24 = vld [vmem:[%s7419_s8 + $0x88] sm:$0xff] }
 0xf2d   :  { %1642 = vmatpush.msra.mxu3 %v6110_v24 }
 0xf2e   :  { %1816 = vmatpush.msra.mxu2 %v6266_v59 }
 0xf2f   :  { %1643 = vmatpush.msra.mxu3 %v6116_v33 }
 0xf30   :  { %1817 = vmatpush.msra.mxu2 %v6272_v48 }
 0xf32   :  { %1818 = vmatpush.msra.mxu2 %v6278_v27 }
 0xf34   :  { %1819 = vmatpush.msra.mxu2 %v6284_v49 }
 0xfa0   :  { %v6092_v22 = vpop.f32.mrf.mxu2 }
 0xfa1   :  { %v1407_v10 = vadd.f32 %v6092_v22, %v1248_v4 }
 0xfa8   :  { %v1491_v34 = vpop.f32.mrf.mxu2 }
 0xfa9   :  { %v1494_v23 = vmul.f32 0.35355338, %v1491_v34 }
 0xfab   :  { %v1495_v26 = vsel %vm215_vm3, %v1494_v23, -inf }
 0xfac   :  { %1496 = vmax.xlane.f32.xlu2 %v1495_v26 }
0x101f   :  { %v1497_v42 = vpop.xlane.xlu2 %1496 }
0x1020   :  { %v1498_v7 = vsub.f32 %v1494_v23, %v1497_v42 }
0x1022   :  { %v1499_v14 = vmul.f32 1.442695, %v1498_v7 }
0x1024   :  { %5242 = vpow2.f32 %v1499_v14 }
0x102a   :  { %v5243_v29 = vpop.eup %5242 }
0x102b   :  { %v1501_v16 = vsel %vm215_vm3, %v5243_v29, 0.0 }
0x102c   :  { %1502 = vadd.xlane.f32.xlu0 %v1501_v16 }
0x109f   :  { %v1503_v61 = vpop.xlane.xlu0 %1502 }
0x10a0   :  { %5244 = vrcp.f32 %v1503_v61  ;;  %v1515_v21 = vand.u32 2147483648, %v1503_v61  ;;  %v1513_v35 = vand.u32 2147483647, %v1503_v61  ;;  %vm1509_vm7 = vweird.f32 %v1503_v61 }
0x10a2   :  { %v1516_v38 = vor.u32 1.1754944e-38, %v1515_v21  ;;  %vm1514_vm9 = vcmp.eq.f32.partialorder %v1513_v35, 8.507059e+37 }
0x10a6   :  { %v5245_v60 = vpop.eup %5244 }
0x10a7   :  { %v1505_v15 = vmul.f32 %v5245_v60, %v1503_v61  ;;  %vm1510_vm5 = vweird.f32 %v5245_v60 }
0x10a8   :  { %vm1511_vm8 = vmor %vm1509_vm7, %vm1510_vm5 }
0x10a9   :  { %v1506_v19 = vsub.f32 1.0, %v1505_v15 }
0x10ab   :  { %v1507_v31 = vmul.f32 %v5245_v60, %v1506_v19 }
0x10ad   :  { %v1508_v36 = vadd.f32 %v5245_v60, %v1507_v31 }
0x10af   :  { %v1512_v45 = vsel %vm1511_vm8, %v5245_v60, %v1508_v36 }
0x10b0   :  { %v1517_v55 = vsel %vm1514_vm9, %v1516_v38, %v1512_v45 }
0x10b1   :  { %v1518_v51 = vmul.f32 %v5243_v29, %v1517_v55 }
0x10b3   :  { %4887 = vmatmul.msk.f32.vlgmr.msrb.gmra.mxu3 %vm215_vm3, %v1518_v51 }
0x10bb   :  { %4895 = vmatmul.msk.f32.vlgmr.msra.gmra.mxu3 %vm143_vm2, %v6141_v46 }
0x1136   :  { %v1539_v2 = vpop.f32.mrf.mxu3 }
0x1137   :  { %4888 = vmatmul.msk.f32.vlgmr.msrb.gmra.mxu0 %vm215_vm3, %v1539_v2 }
0x113f   :  { %4900 = vmatmul.msk.f32.vlgmr.msra.gmra.mxu0 %vm143_vm2, %v6141_v46 }
0x11b4   :  { %v1562_v43 = vpop.f32.mrf.mxu0 }
0x11b5   :  { %v1565_v44 = vadd.f32 %v1562_v43, %v1407_v10  ;;  %v6299_v10 = vld [vmem:[%s7419_s8 + $0xd8] sm:$0xff]  ;;  %v6305_v43 = vld [vmem:[%s7419_s8 + $0xd0] sm:$0xff] }
0x11b7   :  { %v1566_v5 = vadd.f32 %v5936_v13, %v1565_v44  ;;  %v1645_v13 = vpop.f32.mrf.mxu3  ;;  %v6311_v44 = vld [vmem:[%s7419_s8 + $0xc8] sm:$0xff] }
0x11b9   :  { %v1567_v40 = vadd.f32 %v1566_v5, %v5879_v9  ;;  %v6220_v9 = vld [vmem:[%s7421_s0 + $0xb0] sm:$0xff]  ;;  %v6317_v5 = vld [vmem:[%s7419_s8 + $0xc0] sm:$0xff] }
0x11bb   :  { %v1568_v8 = vmul.f32 %v5943_v39, %v1567_v40  ;;  %v6227_v39 = vld [vmem:[%s7419_s8 + $0xb0] sm:$0xff] }
0x11bc   :  { %v1670_v41 = vpop.f32.mrf.mxu0 }
0x11bd   :  { %v6208_v57 = vadd.f32 %v5949_v25, %v1568_v8  ;;  %4906 = vmatpush.xpose.msk.msrb.mxu3 %vm215_vm3, %v1670_v41  ;;  %v6233_v25 = vld [vmem:[%s7421_s0 + $0xa8] sm:$0xff]  ;;  %v6327_v8 = vld [vmem:[%s7423_s29 + $0x20] sm:$0xff] }
0x11bf   :  { %4889 = vmatmul.msk.f32.vlgmr.msrb.gmra.mxu1 %vm143_vm2, %v6208_v57 }
0x11c0   :  { %4907 = vmatmul.msk.f32.vlgmr.msrb.gmra.mxu3 %vm215_vm3, %v1645_v13  ;;  %1791 = vmatpush.msrb.mxu1 %v6214_v63 }
0x11c1   :  { %1841 = vmatpush.msra.mxu3 %v6205_v56 }
0x11c2   :  { %1792 = vmatpush.msrb.mxu1 %v6227_v39 }
0x11c3   :  { %1842 = vmatpush.msra.mxu3 %v6220_v9 }
0x11c4   :  { %1793 = vmatpush.msrb.mxu1 %v6240_v0 }
0x11c5   :  { %1843 = vmatpush.msra.mxu3 %v6233_v25 }
0x11c6   :  { %1794 = vmatpush.msrb.mxu1 %v6252_v58 }
0x11c7   :  { %1844 = vmatpush.msra.mxu3 %v6245_v11  ;;  %4905 = vmatmul.msk.f32.vlgmr.msra.gmra.mxu1 %vm143_vm2, %v6141_v46 }
0x11c8   :  { %4924 = vmatmul.msk.f32.vlgmr.msra.gmra.mxu3 %vm143_vm2, %v6141_v46 }
0x11c9   :  { %1966 = vmatpush.msrb.mxu3 %v6327_v8 }
0x11cf   :  { %4914 = vmatmul.msk.f32.vlgmr.msrb.gmra.mxu1 %vm143_vm2, %v6141_v46 }
0x123c   :  { %v1590_v22 = vpop.f32.mrf.mxu1 }
0x123d   :  { %v1591_v34 = vadd.f32 %v6011_v32, %v1590_v22 }
0x123f   :  { %v1593_v23 = vmax.f32 %v1591_v34, 0.0 }
0x1241   :  { %4890 = vmatmul.msk.f32.vlgmr.msrb.gmra.mxu2 %vm898_vm6, %v1593_v23 }
0x1243   :  { %v1721_v26 = vpop.f32.mrf.mxu3 }
0x1244   :  { %v1724_v42 = vmul.f32 0.35355338, %v1721_v26  ;;  %v1695_v7 = vpop.f32.mrf.mxu1 }
0x1245   :  { %1767 = vmatpush.msrb.mxu0 %v1695_v7 }
0x1246   :  { %v1725_v14 = vsel %vm215_vm3, %v1724_v42, -inf }
0x1247   :  { %1726 = vmax.xlane.f32.xlu1 %v1725_v14 }
0x1249   :  { %4919 = vmatmul.msk.f32.vlgmr.msra.gmra.mxu2 %vm143_vm2, %v6141_v46 }
0x124b   :  { %v1846_v29 = vpop.f32.mrf.mxu3 }
0x124c   :  { %1918 = vmatpush.msra.mxu1 %v1846_v29  ;;  %v1796_v40 = vpop.f32.mrf.mxu1  ;;  %v6336_v29 = vld [vmem:[%s7420_s28 + $0xd8] sm:$0xff] }
0x124e   :  { %2013 = vmatpush.msrb.mxu1 %v6336_v29 }
0x12ba   :  { %v1727_v16 = vpop.xlane.xlu1 %1726 }
0x12bb   :  { %v1728_v61 = vsub.f32 %v1724_v42, %v1727_v16  ;;  %v6341_v16 = vld [vmem:[%s7420_s28 + $0xd0] sm:$0xff] }
0x12bc   :  { %2014 = vmatpush.msrb.mxu1 %v6341_v16 }
0x12bd   :  { %v1729_v60 = vmul.f32 1.442695, %v1728_v61  ;;  %v6347_v61 = vld [vmem:[%s7420_s28 + $0xc8] sm:$0xff] }
0x12be   :  { %2015 = vmatpush.msrb.mxu1 %v6347_v61 }
0x12bf   :  { %5246 = vpow2.f32 %v1729_v60  ;;  %v6353_v60 = vld [vmem:[%s7420_s28 + $0xc0] sm:$0xff] }
0x12c0   :  { %2016 = vmatpush.msrb.mxu1 %v6353_v60 }
0x12c4   :  { %v6292_v32 = vpop.f32.mrf.mxu2 }
0x12c5   :  { %v5247_v15 = vpop.eup %5246 }
0x12c6   :  { %v1731_v19 = vsel %vm215_vm3, %v5247_v15, 0.0 }
0x12c7   :  { %1732 = vadd.xlane.f32.xlu2 %v1731_v19 }
0x12cc   :  { %v1821_v21 = vpop.f32.mrf.mxu2 }
0x12cd   :  { %4925 = vmatpush.xpose.msk.msra.mxu0 %vm215_vm3, %v1821_v21 }
0x133a   :  { %v1733_v31 = vpop.xlane.xlu2 %1732 }
0x133b   :  { %5248 = vrcp.f32 %v1733_v31  ;;  %v1745_v38 = vand.u32 2147483648, %v1733_v31  ;;  %v1743_v55 = vand.u32 2147483647, %v1733_v31  ;;  %vm1739_vm11 = vweird.f32 %v1733_v31 }
0x133d   :  { %v1746_v51 = vor.u32 1.1754944e-38, %v1745_v38  ;;  %vm1744_vm13 = vcmp.eq.f32.partialorder %v1743_v55, 8.507059e+37 }
0x1341   :  { %v5249_v35 = vpop.eup %5248 }
0x1342   :  { %v1735_v50 = vmul.f32 %v5249_v35, %v1733_v31  ;;  %vm1740_vm10 = vweird.f32 %v5249_v35 }
0x1343   :  { %vm1741_vm12 = vmor %vm1739_vm11, %vm1740_vm10 }
0x1344   :  { %v1736_v36 = vsub.f32 1.0, %v1735_v50 }
0x1346   :  { %v1737_v45 = vmul.f32 %v5249_v35, %v1736_v36 }
0x1348   :  { %v1738_v62 = vadd.f32 %v5249_v35, %v1737_v45 }
0x134a   :  { %v1742_v52 = vsel %vm1741_vm12, %v5249_v35, %v1738_v62 }
0x134b   :  { %v1747_v2 = vsel %vm1744_vm13, %v1746_v51, %v1742_v52  ;;  %v6363_v52 = vld [vmem:[%s7423_s29 + $0x28] sm:$0xff] }
0x134c   :  { %v1748_v4 = vmul.f32 %v5247_v15, %v1747_v2  ;;  %1943 = vmatpush.msrb.mxu2 %v6363_v52  ;;  %v6369_v2 = vld [vmem:[%s7421_s0 + $0xd8] sm:$0xff] }
0x134e   :  { %4908 = vmatmul.msk.f32.vlgmr.msrb.gmra.mxu0 %vm215_vm3, %v1748_v4  ;;  %v6374_v4 = vld [vmem:[%s7421_s0 + $0xd0] sm:$0xff]  ;;  %2038 = vmatpush.msra.mxu2 %v6369_v2 }
0x134f   :  { %1988 = vmatpush.msrb.mxu0 %v6299_v10 }
0x1350   :  { %2039 = vmatpush.msra.mxu2 %v6374_v4 }
0x1351   :  { %1989 = vmatpush.msrb.mxu0 %v6305_v43 }
0x1353   :  { %1990 = vmatpush.msrb.mxu0 %v6311_v44 }
0x1355   :  { %1991 = vmatpush.msrb.mxu0 %v6317_v5 }
0x1356   :  { %4926 = vmatmul.msk.f32.vlgmr.msra.gmra.mxu0 %vm215_vm3, %v1796_v40  ;;  %v6380_v40 = vld [vmem:[%s7421_s0 + $0xc8] sm:$0xff] }
0x1357   :  { %2040 = vmatpush.msra.mxu2 %v6380_v40 }
0x135e   :  { %4935 = vmatmul.msk.f32.vlgmr.msrb.gmra.mxu0 %vm143_vm2, %v6141_v46 }
0x13cb   :  { %v1769_v41 = vpop.f32.mrf.mxu0 }
0x13cc   :  { %4930 = vmatmul.msk.f32.vlgmr.msrb.gmra.mxu3 %vm215_vm3, %v1769_v41  ;;  %v6387_v41 = vld [vmem:[%s7421_s0 + $0xc0] sm:$0xff] }
0x13cd   :  { %2041 = vmatpush.msra.mxu2 %v6387_v41 }
0x13d3   :  { %v1872_v13 = vpop.f32.mrf.mxu0 }
0x13d4   :  { %v1875_v22 = vmul.f32 0.35355338, %v1872_v13  ;;  %v6393_v13 = vld [vmem:[%s7419_s8 + $0xf8] sm:$0xff] }
0x13d6   :  { %v1876_v34 = vsel %vm215_vm3, %v1875_v22, -inf }
0x13d7   :  { %1877 = vmax.xlane.f32.xlu0 %v1876_v34  ;;  %v6399_v34 = vld [vmem:[%s7419_s8 + $0xf0] sm:$0xff] }
0x144a   :  { %v1878_v23 = vpop.xlane.xlu0 %1877 }
0x144b   :  { %v1879_v26 = vsub.f32 %v1875_v22, %v1878_v23  ;;  %v6405_v23 = vld [vmem:[%s7419_s8 + $0xe8] sm:$0xff] }
0x144d   :  { %v1880_v42 = vmul.f32 1.442695, %v1879_v26  ;;  %v6411_v26 = vld [vmem:[%s7419_s8 + $0xe0] sm:$0xff] }
0x144e   :  { %7437 = vst [vmem:[#allocation5_spill] sm:$0xff] %v6411_v26 }
0x144f   :  { %5250 = vpow2.f32 %v1880_v42  ;;  %v6417_v42 = vld [vmem:[%s7420_s28 + $0xf8] sm:$0xff] }
0x1450   :  { %7438 = vst [vmem:[#allocation6_spill] sm:$0xff] %v6417_v42 }
0x1455   :  { %v5251_v7 = vpop.eup %5250 }
0x1456   :  { %v1882_v14 = vsel %vm215_vm3, %v5251_v7, 0.0 }
0x1457   :  { %1883 = vadd.xlane.f32.xlu1 %v1882_v14  ;;  %v6427_v14 = vld [vmem:[%s7420_s28 + $0xf0] sm:$0xff] }
0x1458   :  { %7439 = vst [vmem:[#allocation7_spill] sm:$0xff] %v6427_v14 }
0x14ca   :  { %v1884_v15 = vpop.xlane.xlu1 %1883 }
0x14cb   :  { %5252 = vrcp.f32 %v1884_v15  ;;  %v1896_v35 = vand.u32 2147483648, %v1884_v15  ;;  %v1894_v36 = vand.u32 2147483647, %v1884_v15  ;;  %vm1890_vm15 = vweird.f32 %v1884_v15 }
0x14cd   :  { %v1897_v45 = vor.u32 1.1754944e-38, %v1896_v35  ;;  %vm1895_vm1 = vcmp.eq.f32.partialorder %v1894_v36, 8.507059e+37  ;;  %v1968_v35 = vpop.f32.mrf.mxu3 }
0x14d1   :  { %v5253_v19 = vpop.eup %5252 }
0x14d2   :  { %v1886_v21 = vmul.f32 %v5253_v19, %v1884_v15  ;;  %vm1891_vm14 = vweird.f32 %v5253_v19  ;;  %v1993_v15 = vpop.f32.mrf.mxu0 }
0x14d3   :  { %vm1892_vm0 = vmor %vm1890_vm15, %vm1891_vm14 }
0x14d4   :  { %v1887_v31 = vsub.f32 1.0, %v1886_v21  ;;  %v6439_v21 = vld [vmem:[%s7420_s28 + $0xe0] sm:$0xff] }
0x14d5   :  { %7441 = vst [vmem:[#allocation9_spill] sm:$0xff] %v6439_v21 }
0x14d6   :  { %v1888_v50 = vmul.f32 %v5253_v19, %v1887_v31  ;;  %v6450_v31 = vld [vmem:[%s7423_s29 + $0x30] sm:$0xff] }
0x14d8   :  { %v1889_v38 = vadd.f32 %v5253_v19, %v1888_v50 }
0x14da   :  { %v1893_v55 = vsel %vm1892_vm0, %v5253_v19, %v1889_v38  ;;  %v6433_v19 = vld [vmem:[%s7420_s28 + $0xe8] sm:$0xff] }
0x14db   :  { %v1898_v62 = vsel %vm1895_vm1, %v1897_v45, %v1893_v55  ;;  %7440 = vst [vmem:[#allocation8_spill] sm:$0xff] %v6433_v19 }
0x14dc   :  { %v1899_v51 = vmul.f32 %v5251_v7, %v1898_v62 }
0x14de   :  { %4927 = vmatmul.msk.f32.vlgmr.msra.gmra.mxu1 %vm215_vm3, %v1899_v51 }
0x14df   :  { %2140 = vmatpush.msra.mxu1 %v6450_v31 }
0x14e6   :  { %4940 = vmatmul.msk.f32.vlgmr.msrb.gmra.mxu1 %vm143_vm2, %v6141_v46 }
0x155b   :  { %v1920_v22 = vpop.f32.mrf.mxu1 }
0x155c   :  { %4929 = vmatmul.msk.f32.vlgmr.msrb.gmra.mxu2 %vm215_vm3, %v1920_v22 }
0x155d   :  { %2163 = vmatpush.msrb.mxu2 %v6393_v13 }
0x155f   :  { %2164 = vmatpush.msrb.mxu2 %v6399_v34 }
0x1561   :  { %2165 = vmatpush.msrb.mxu2 %v6405_v23 }
0x1563   :  { %v2018_v7 = vpop.f32.mrf.mxu1  ;;  %2166 = vmatpush.msrb.mxu2 %v6411_v26 }
0x1564   :  { %4945 = vmatmul.msk.f32.vlgmr.msra.gmra.mxu2 %vm143_vm2, %v6141_v46  ;;  %4946 = vmatpush.xpose.msk.msra.mxu3 %vm215_vm3, %v2018_v7 }
0x1567   :  { %4947 = vmatmul.msk.f32.vlgmr.msra.gmra.mxu3 %vm215_vm3, %v1993_v15 }
0x1568   :  { %2188 = vmatpush.msrb.mxu3 %v6417_v42 }
0x156a   :  { %2189 = vmatpush.msrb.mxu3 %v6427_v14 }
0x156c   :  { %2190 = vmatpush.msrb.mxu3 %v6433_v19  ;;  %4955 = vmatmul.msk.f32.vlgmr.msrb.gmra.mxu2 %vm143_vm2, %v6141_v46 }
0x156e   :  { %2191 = vmatpush.msrb.mxu3 %v6439_v21 }
0x156f   :  { %4960 = vmatmul.msk.f32.vlgmr.msrb.gmra.mxu3 %vm143_vm2, %v6141_v46 }
0x15df   :  { %v1945_v50 = vpop.f32.mrf.mxu2 }
0x15e0   :  { %v1969_v36 = vadd.f32 %v1968_v35, %v1945_v50  ;;  %v6459_v35 = vld [vmem:[%s7421_s0 + $0xf8] sm:$0xff]  ;;  %v6464_v50 = vld [vmem:[%s7421_s0 + $0xf0] sm:$0xff] }
0x15e1   :  { %7442 = vst [vmem:[#allocation10_spill] sm:$0xff] %v6459_v35 }
0x15e2   :  { %7443 = vst [vmem:[#allocation11_spill] sm:$0xff] %v6464_v50 }
0x15e7   :  { %v2043_v38 = vpop.f32.mrf.mxu2 }
0x15e8   :  { %2115 = vmatpush.msra.mxu0 %v2043_v38  ;;  %v6470_v38 = vld [vmem:[%s7421_s0 + $0xe8] sm:$0xff] }
0x15ea   :  { %v2069_v45 = vpop.f32.mrf.mxu3  ;;  %2213 = vmatpush.msrb.mxu0 %v6459_v35 }
0x15eb   :  { %v2072_v55 = vmul.f32 0.35355338, %v2069_v45 }
0x15ec   :  { %2214 = vmatpush.msrb.mxu0 %v6464_v50 }
0x15ed   :  { %v2073_v62 = vsel %vm215_vm3, %v2072_v55, -inf }
0x15ee   :  { %2074 = vmax.xlane.f32.xlu2 %v2073_v62  ;;  %2215 = vmatpush.msrb.mxu0 %v6470_v38 }
0x15f2   :  { %v2193_v51 = vpop.f32.mrf.mxu3 }
0x15f3   :  { %4966 = vmatpush.xpose.msk.msrb.mxu1 %vm215_vm3, %v2193_v51 }
0x1661   :  { %v2075_v22 = vpop.xlane.xlu2 %2074 }
0x1662   :  { %v2076_v7 = vsub.f32 %v2072_v55, %v2075_v22 }
0x1664   :  { %v2077_v15 = vmul.f32 1.442695, %v2076_v7 }
0x1666   :  { %5254 = vpow2.f32 %v2077_v15 }
0x166c   :  { %v5255_v21 = vpop.eup %5254 }
0x166d   :  { %v2079_v19 = vsel %vm215_vm3, %v5255_v21, 0.0 }
0x166e   :  { %2080 = vadd.xlane.f32.xlu0 %v2079_v19  ;;  %v6476_v19 = vld [vmem:[%s7421_s0 + $0xe0] sm:$0xff] }
0x166f   :  { %7444 = vst [vmem:[#allocation12_spill] sm:$0xff] %v6476_v19  ;;  %2216 = vmatpush.msrb.mxu0 %v6476_v19 }
0x16e1   :  { %v2081_v45 = vpop.xlane.xlu0 %2080 }
0x16e2   :  { %5256 = vrcp.f32 %v2081_v45  ;;  %v2093_v22 = vand.u32 2147483648, %v2081_v45  ;;  %v2091_v15 = vand.u32 2147483647, %v2081_v45  ;;  %vm2087_vm5 = vweird.f32 %v2081_v45 }
0x16e4   :  { %v2094_v50 = vor.u32 1.1754944e-38, %v2093_v22  ;;  %vm2092_vm8 = vcmp.eq.f32.partialorder %v2091_v15, 8.507059e+37 }
0x16e8   :  { %v5257_v55 = vpop.eup %5256 }
0x16e9   :  { %v2083_v62 = vmul.f32 %v5257_v55, %v2081_v45  ;;  %vm2088_vm4 = vweird.f32 %v5257_v55 }
0x16ea   :  { %vm2089_vm7 = vmor %vm2087_vm5, %vm2088_vm4 }
0x16eb   :  { %v2084_v51 = vsub.f32 1.0, %v2083_v62  ;;  %v2168_v62 = vpop.f32.mrf.mxu2 }
0x16ed   :  { %v2085_v7 = vmul.f32 %v5257_v55, %v2084_v51 }
0x16ef   :  { %v2086_v35 = vadd.f32 %v5257_v55, %v2085_v7 }
0x16f1   :  { %v2090_v14 = vsel %vm2089_vm7, %v5257_v55, %v2086_v35 }
0x16f2   :  { %v2095_v42 = vsel %vm2092_vm8, %v2094_v50, %v2090_v14 }
0x16f3   :  { %v2096_v26 = vmul.f32 %v5255_v21, %v2095_v42 }
0x16f5   :  { %4948 = vmatmul.msk.f32.vlgmr.msra.gmra.mxu0 %vm215_vm3, %v2096_v26 }
0x16fd   :  { %4965 = vmatmul.msk.f32.vlgmr.msrb.gmra.mxu0 %vm143_vm2, %v6141_v46 }
0x1772   :  { %v2117_v19 = vpop.f32.mrf.mxu0 }
0x1773   :  { %4950 = vmatmul.msk.f32.vlgmr.msra.gmra.mxu1 %vm215_vm3, %v2117_v19 }
0x177a   :  { %v2218_v51 = vpop.f32.mrf.mxu0 }
0x177b   :  { %4967 = vmatmul.msk.f32.vlgmr.msrb.gmra.mxu1 %vm215_vm3, %v2168_v62  ;;  %2290 = vmatpush.msra.mxu2 %v2218_v51  ;;  %v1615_v51 = vadd.f32 %v6123_v17, %v6292_v32  ;;  %v6537_v32 = vld [vmem:[%s7361_s12 + $0x20] sm:$0xff] }
0x177d   :  { %2439 = vmatpush.msrb.mxu2 %v6099_v18 }
0x177f   :  { %2440 = vmatpush.msrb.mxu2 %v6104_v20  ;;  %v6496_v20 = vld [vmem:[%s7423_s29 + $0x38] sm:$0xff] }
0x1780   :  { %2315 = vmatpush.msra.mxu3 %v6496_v20 }
0x1781   :  { %2441 = vmatpush.msrb.mxu2 %v6110_v24 }
0x1782   :  { %2459 = vmatpush.msrb.mxu3 %v6148_v47 }
0x1783   :  { %2442 = vmatpush.msrb.mxu2 %v6116_v33 }
0x1784   :  { %2460 = vmatpush.msrb.mxu3 %v6153_v53 }
0x1786   :  { %2461 = vmatpush.msrb.mxu3 %v6159_v28  ;;  %v1617_v28 = vadd.f32 %v1615_v51, %v6208_v57  ;;  %v6519_v57 = vld [vmem:[%s7361_s12 + $0x38] sm:$0xff] }
0x1787   :  { %2365 = vmatpush.msra.mxu0 %v6519_v57 }
0x1788   :  { %2462 = vmatpush.msrb.mxu3 %v6166_v54 }
0x17f0   :  { %v2142_v26 = vpop.f32.mrf.mxu1 }
0x17f1   :  { %v6489_v42 = vadd.f32 %v2142_v26, %v1969_v36 }
0x17f8   :  { %v2244_v14 = vpop.f32.mrf.mxu1 }
0x17f9   :  { %v2247_v21 = vmul.f32 0.35355338, %v2244_v14 }
0x17fb   :  { %v2248_v35 = vsel %vm215_vm3, %v2247_v21, -inf }
0x17fc   :  { %2249 = vmax.xlane.f32.xlu1 %v2248_v35 }
0x186f   :  { %v2250_v50 = vpop.xlane.xlu1 %2249 }
0x1870   :  { %v2251_v19 = vsub.f32 %v2247_v21, %v2250_v50  ;;  %v1618_v21 = vmul.f32 %v6131_v1, %v1617_v28  ;;  %v6525_v1 = vld [vmem:[%s7361_s12 + $0x30] sm:$0xff]  ;;  %v6547_v50 = vld [vmem:[%s7363_s14 + $0x78] sm:$0xff] }
0x1871   :  { %2366 = vmatpush.msra.mxu0 %v6525_v1  ;;  %2399 = vmatpush.msra.mxu1 %v6547_v50 }
0x1872   :  { %v2252_v45 = vmul.f32 1.442695, %v2251_v19  ;;  %v6509_v35 = vadd.f32 %v6138_v37, %v1618_v21  ;;  %v6531_v37 = vld [vmem:[%s7361_s12 + $0x28] sm:$0xff]  ;;  %v6552_v19 = vld [vmem:[%s7363_s14 + $0x70] sm:$0xff] }
0x1873   :  { %2367 = vmatpush.msra.mxu0 %v6531_v37  ;;  %2400 = vmatpush.msra.mxu1 %v6552_v19 }
0x1874   :  { %5258 = vpow2.f32 %v2252_v45 }
0x1875   :  { %2368 = vmatpush.msra.mxu0 %v6537_v32 }
0x1877   :  { %2479 = vmatpush.msrb.mxu0 %v6175_v3  ;;  %v6558_v3 = vld [vmem:[%s7363_s14 + $0x68] sm:$0xff] }
0x1878   :  { %2401 = vmatpush.msra.mxu1 %v6558_v3 }
0x1879   :  { %2480 = vmatpush.msrb.mxu0 %v6181_v30  ;;  %v6564_v30 = vld [vmem:[%s7430_s4 + $0x1] ss:$0 sm:$0xff] }
0x187a   :  { %v5259_v55 = vpop.eup %5258 }
0x187b   :  { %v2254_v18 = vsel %vm215_vm3, %v5259_v55, 0.0  ;;  %2481 = vmatpush.msrb.mxu0 %v6186_v6  ;;  %v6569_v6 = vld [vmem:[%s7363_s14 + $0x60] sm:$0xff] }
0x187c   :  { %2255 = vadd.xlane.f32.xlu2 %v2254_v18  ;;  %2402 = vmatpush.msra.mxu1 %v6569_v6 }
0x187d   :  { %2482 = vmatpush.msrb.mxu0 %v6192_v12 }
0x18ef   :  { %v2256_v24 = vpop.xlane.xlu2 %2255 }
0x18f0   :  { %5260 = vrcp.f32 %v2256_v24  ;;  %v2268_v7 = vand.u32 2147483648, %v2256_v24  ;;  %v2266_v62 = vand.u32 2147483647, %v2256_v24  ;;  %vm2262_vm10 = vweird.f32 %v2256_v24 }
0x18f2   :  { %v2269_v47 = vor.u32 1.1754944e-38, %v2268_v7  ;;  %vm2267_vm12 = vcmp.eq.f32.partialorder %v2266_v62, 8.507059e+37 }
0x18f6   :  { %v5261_v33 = vpop.eup %5260 }
0x18f7   :  { %v2258_v36 = vmul.f32 %v5261_v33, %v2256_v24  ;;  %vm2263_vm9 = vweird.f32 %v5261_v33  ;;  %v6583_v24 = vld [vmem:[%s7359_s10 + $0x1] ss:$0 sm:$0xff]  ;;  %s7454_s10 = sld [smem:[#allocation16_spill]] }
0x18f8   :  { %vm2264_vm11 = vmor %vm2262_vm10, %vm2263_vm9 }
0x18f9   :  { %v2259_v22 = vsub.f32 1.0, %v2258_v36 }
0x18fb   :  { %v2260_v15 = vmul.f32 %v5261_v33, %v2259_v22 }
0x18fd   :  { %v2261_v26 = vadd.f32 %v5261_v33, %v2260_v15 }
0x18ff   :  { %v2265_v53 = vsel %vm2264_vm11, %v5261_v33, %v2261_v26 }
0x1900   :  { %v2270_v14 = vsel %vm2267_vm12, %v2269_v47, %v2265_v53 }
0x1901   :  { %v2271_v54 = vmul.f32 %v5259_v55, %v2270_v14  ;;  %v6576_v55 = vld [vmem:[%s7363_s14 + $0x58] sm:$0xff] }
0x1902   :  { %2403 = vmatpush.msra.mxu1 %v6576_v55 }
0x1903   :  { %4968 = vmatmul.msk.f32.vlgmr.msra.gmra.mxu2 %vm215_vm3, %v2271_v54 }
0x190b   :  { %4992 = vmatmul.msk.f32.vlgmr.msrb.gmra.mxu2 %vm143_vm2, %v6509_v35 }
0x1986   :  { %v2292_v17 = vpop.f32.mrf.mxu2 }
0x1987   :  { %4970 = vmatmul.msk.f32.vlgmr.msra.gmra.mxu3 %vm215_vm3, %v2292_v17 }
0x198e   :  { %v2444_v15 = vpop.f32.mrf.mxu2 }
0x198f   :  { %4993 = vmatmul.msk.f32.vlgmr.msrb.gmra.mxu3 %vm143_vm2, %v6509_v35 }
0x1a0a   :  { %v2317_v12 = vpop.f32.mrf.mxu3 }
0x1a0b   :  { %v2320_v45 = vadd.f32 %v2317_v12, %v6489_v42  ;;  %v6590_v42 = vld [vmem:[%s7360_s11 + $0x1] ss:$0 sm:$0xff] }
0x1a0d   :  { %v2326_v18 = vadd.f32 %v6564_v30, %v2320_v45 }
0x1a0f   :  { %v2327_v33 = vadd.f32 %v2326_v18, %v6141_v46  ;;  %v6618_v46 = vld [vmem:[%s7363_s14 + $0x50] sm:$0xff] }
0x1a10   :  { %2404 = vmatpush.msra.mxu1 %v6618_v46 }
0x1a11   :  { %v2333_v36 = vmul.f32 %v6583_v24, %v2327_v33 }
0x1a12   :  { %v2464_v22 = vpop.f32.mrf.mxu3 }
0x1a13   :  { %v6594_v7 = vadd.f32 %v6590_v42, %v2333_v36  ;;  %4995 = vmatpush.xpose.msk.msra.mxu2 %vm215_vm3, %v2464_v22 }
0x1a15   :  { %4979 = vmatmul.msk.f32.vlgmr.msra.gmra.mxu0 %vm143_vm2, %v6594_v7 }
0x1a16   :  { %4996 = vmatmul.msk.f32.vlgmr.msra.gmra.mxu2 %vm215_vm3, %v2444_v15  ;;  %2573 = vmatpush.msra.mxu0 %v6214_v63  ;;  %v6630_v63 = vld [vmem:[%s7363_s14 + $0x40] sm:$0xff] }
0x1a17   :  { %2613 = vmatpush.msrb.mxu2 %v6205_v56  ;;  %v6624_v56 = vld [vmem:[%s7363_s14 + $0x48] sm:$0xff] }
0x1a18   :  { %2574 = vmatpush.msra.mxu0 %v6227_v39  ;;  %2405 = vmatpush.msra.mxu1 %v6624_v56 }
0x1a19   :  { %2614 = vmatpush.msrb.mxu2 %v6220_v9  ;;  %v6640_v9 = vld [vmem:[%s7362_s13 + $0x1] ss:$0 sm:$0xff] }
0x1a1a   :  { %2575 = vmatpush.msra.mxu0 %v6240_v0  ;;  %2406 = vmatpush.msra.mxu1 %v6630_v63 }
0x1a1b   :  { %2615 = vmatpush.msrb.mxu2 %v6233_v25 }
0x1a1c   :  { %2576 = vmatpush.msra.mxu0 %v6252_v58  ;;  %2593 = vmatpush.msrb.mxu1 %v6266_v59 }
0x1a1d   :  { %2616 = vmatpush.msrb.mxu2 %v6245_v11  ;;  %4994 = vmatmul.msk.f32.vlgmr.msrb.gmra.mxu0 %vm143_vm2, %v6509_v35 }
0x1a1e   :  { %5000 = vmatmul.msk.f32.vlgmr.msrb.gmra.mxu2 %vm143_vm2, %v6509_v35  ;;  %2594 = vmatpush.msrb.mxu1 %v6272_v48 }
0x1a1f   :  { %2736 = vmatpush.msra.mxu2 %v6327_v8 }
0x1a20   :  { %2595 = vmatpush.msrb.mxu1 %v6278_v27 }
0x1a22   :  { %2596 = vmatpush.msrb.mxu1 %v6284_v49 }
0x1a25   :  { %4998 = vmatmul.msk.f32.vlgmr.msra.gmra.mxu0 %vm143_vm2, %v6509_v35 }
0x1a92   :  { %v2370_v39 = vpop.f32.mrf.mxu0 }
0x1a93   :  { %v2371_v25 = vadd.f32 %v6640_v9, %v2370_v39 }
0x1a95   :  { %v2373_v0 = vmax.f32 %v2371_v25, 0.0 }
0x1a97   :  { %4989 = vmatmul.msk.f32.vlgmr.msra.gmra.mxu1 %vm898_vm6, %v2373_v0 }
0x1a98   :  { %2713 = vmatpush.msra.mxu1 %v6363_v52 }
0x1a99   :  { %v2510_v11 = vpop.f32.mrf.mxu2 }
0x1a9a   :  { %v2513_v58 = vmul.f32 0.35355338, %v2510_v11  ;;  %v2484_v59 = vpop.f32.mrf.mxu0 }
0x1a9b   :  { %2556 = vmatpush.msra.mxu3 %v2484_v59 }
0x1a9c   :  { %v2514_v48 = vsel %vm215_vm3, %v2513_v58, -inf }
0x1a9d   :  { %2515 = vmax.xlane.f32.xlu0 %v2514_v48 }
0x1a9f   :  { %4999 = vmatmul.msk.f32.vlgmr.msrb.gmra.mxu1 %vm143_vm2, %v6509_v35 }
0x1aa0   :  { %2793 = vmatpush.msrb.mxu1 %v6369_v2 }
0x1aa1   :  { %v2618_v27 = vpop.f32.mrf.mxu2 }
0x1aa2   :  { %2690 = vmatpush.msrb.mxu0 %v2618_v27  ;;  %2794 = vmatpush.msrb.mxu1 %v6374_v4  ;;  %v2578_v21 = vpop.f32.mrf.mxu0 }
0x1aa4   :  { %2773 = vmatpush.msra.mxu0 %v6336_v29  ;;  %2795 = vmatpush.msrb.mxu1 %v6380_v40 }
0x1aa6   :  { %2774 = vmatpush.msra.mxu0 %v6341_v16  ;;  %2796 = vmatpush.msrb.mxu1 %v6387_v41 }
0x1aa8   :  { %2775 = vmatpush.msra.mxu0 %v6347_v61 }
0x1aaa   :  { %2776 = vmatpush.msra.mxu0 %v6353_v60 }
0x1b10   :  { %v2516_v49 = vpop.xlane.xlu0 %2515 }
0x1b11   :  { %v2517_v8 = vsub.f32 %v2513_v58, %v2516_v49 }
0x1b13   :  { %v2518_v52 = vmul.f32 1.442695, %v2517_v8 }
0x1b14   :  { %v6656_v2 = vpop.f32.mrf.mxu1 }
0x1b15   :  { %5262 = vpow2.f32 %v2518_v52 }
0x1b1b   :  { %v5263_v62 = vpop.eup %5262 }
0x1b1c   :  { %v2598_v4 = vpop.f32.mrf.mxu1  ;;  %v2520_v29 = vsel %vm215_vm3, %v5263_v62, 0.0 }
0x1b1d   :  { %2521 = vadd.xlane.f32.xlu1 %v2520_v29  ;;  %5001 = vmatpush.xpose.msk.msrb.mxu3 %vm215_vm3, %v2598_v4  ;;  %v7447_v29 = vld [vmem:[#allocation7_spill] sm:$0xff] }
0x1b90   :  { %v2522_v16 = vpop.xlane.xlu1 %2521 }
0x1b91   :  { %5264 = vrcp.f32 %v2522_v16  ;;  %v2534_v51 = vand.u32 2147483648, %v2522_v16  ;;  %v2532_v26 = vand.u32 2147483647, %v2522_v16  ;;  %vm2528_vm14 = vweird.f32 %v2522_v16 }
0x1b93   :  { %v2535_v53 = vor.u32 1.1754944e-38, %v2534_v51  ;;  %vm2533_vm0 = vcmp.eq.f32.partialorder %v2532_v26, 8.507059e+37  ;;  %v7451_v51 = vld [vmem:[#allocation11_spill] sm:$0xff] }
0x1b97   :  { %v5265_v40 = vpop.eup %5264 }
0x1b98   :  { %v2524_v41 = vmul.f32 %v5265_v40, %v2522_v16  ;;  %vm2529_vm13 = vweird.f32 %v5265_v40 }
0x1b99   :  { %vm2530_vm15 = vmor %vm2528_vm14, %vm2529_vm13 }
0x1b9a   :  { %v2525_v61 = vsub.f32 1.0, %v2524_v41 }
0x1b9c   :  { %v2526_v60 = vmul.f32 %v5265_v40, %v2525_v61  ;;  %v7450_v61 = vld [vmem:[#allocation10_spill] sm:$0xff] }
0x1b9e   :  { %v2527_v47 = vadd.f32 %v5265_v40, %v2526_v60  ;;  %v7452_v60 = vld [vmem:[#allocation12_spill] sm:$0xff] }
0x1ba0   :  { %v2531_v14 = vsel %vm2530_vm15, %v5265_v40, %v2527_v47 }
0x1ba1   :  { %v2536_v28 = vsel %vm2533_vm0, %v2535_v53, %v2531_v14 }
0x1ba2   :  { %v2537_v54 = vmul.f32 %v5263_v62, %v2536_v28  ;;  %v7445_v62 = vld [vmem:[#allocation5_spill] sm:$0xff] }
0x1ba4   :  { %4997 = vmatmul.msk.f32.vlgmr.msra.gmra.mxu3 %vm215_vm3, %v2537_v54 }
0x1ba5   :  { %2753 = vmatpush.msra.mxu3 %v6299_v10 }
0x1ba7   :  { %2754 = vmatpush.msra.mxu3 %v6305_v43 }
0x1ba9   :  { %2755 = vmatpush.msra.mxu3 %v6311_v44 }
0x1bab   :  { %2756 = vmatpush.msra.mxu3 %v6317_v5 }
0x1bac   :  { %5002 = vmatmul.msk.f32.vlgmr.msrb.gmra.mxu3 %vm215_vm3, %v2578_v21 }
0x1bb4   :  { %5006 = vmatmul.msk.f32.vlgmr.msra.gmra.mxu3 %vm143_vm2, %v6509_v35 }
0x1c27   :  { %v2558_v17 = vpop.f32.mrf.mxu3 }
0x1c28   :  { %5005 = vmatmul.msk.f32.vlgmr.msra.gmra.mxu2 %vm215_vm3, %v2558_v17 }
0x1c2f   :  { %v2644_v12 = vpop.f32.mrf.mxu3 }
0x1c30   :  { %v2647_v45 = vmul.f32 0.35355338, %v2644_v12 }
0x1c32   :  { %v2648_v18 = vsel %vm215_vm3, %v2647_v45, -inf }
0x1c33   :  { %2649 = vmax.xlane.f32.xlu2 %v2648_v18 }
0x1c37   :  { %v2758_v4 = vpop.f32.mrf.mxu3 }
0x1ca6   :  { %v2650_v10 = vpop.xlane.xlu2 %2649 }
0x1ca7   :  { %v2651_v43 = vsub.f32 %v2647_v45, %v2650_v10 }
0x1ca9   :  { %v2652_v33 = vmul.f32 1.442695, %v2651_v43 }
0x1cab   :  { %5266 = vpow2.f32 %v2652_v33 }
0x1cb1   :  { %v5267_v44 = vpop.eup %5266 }
0x1cb2   :  { %v2654_v5 = vsel %vm215_vm3, %v5267_v44, 0.0 }
0x1cb3   :  { %2655 = vadd.xlane.f32.xlu0 %v2654_v5 }
0x1d26   :  { %v2656_v36 = vpop.xlane.xlu0 %2655 }
0x1d27   :  { %5268 = vrcp.f32 %v2656_v36  ;;  %v2668_v25 = vand.u32 2147483648, %v2656_v36  ;;  %v2666_v11 = vand.u32 2147483647, %v2656_v36  ;;  %vm2662_vm4 = vweird.f32 %v2656_v36 }
0x1d29   :  { %v2669_v59 = vor.u32 1.1754944e-38, %v2668_v25  ;;  %vm2667_vm7 = vcmp.eq.f32.partialorder %v2666_v11, 8.507059e+37 }
0x1d2d   :  { %v5269_v22 = vpop.eup %5268 }
0x1d2e   :  { %v2658_v15 = vmul.f32 %v5269_v22, %v2656_v36  ;;  %vm2663_vm1 = vweird.f32 %v5269_v22 }
0x1d2f   :  { %vm2664_vm5 = vmor %vm2662_vm4, %vm2663_vm1 }
0x1d30   :  { %v2659_v39 = vsub.f32 1.0, %v2658_v15 }
0x1d32   :  { %v2660_v0 = vmul.f32 %v5269_v22, %v2659_v39  ;;  %v6712_v39 = vld [vmem:[%s7364_s15 + $0x1] ss:$0 sm:$0xff]  ;;  %s4771_s15 = sshll.u32 %s7373_s24, 4  ;;  %s4772_s15 = int_to_ptr.hbm [resolvable:$true] %s4771_s15 }
0x1d33   :  { %v2409_v25 = vadd.f32 %v6712_v39, %v6656_v2 }
0x1d34   :  { %v2661_v58 = vadd.f32 %v5269_v22, %v2660_v0 }
0x1d35   :  { %v2411_v0 = vadd.f32 %v2409_v25, %v6594_v7 }
0x1d36   :  { %v2665_v48 = vsel %vm2664_vm5, %v5269_v22, %v2661_v58 }
0x1d37   :  { %v2670_v27 = vsel %vm2667_vm7, %v2669_v59, %v2665_v48 }
0x1d38   :  { %v2671_v49 = vmul.f32 %v5267_v44, %v2670_v27 }
0x1d3a   :  { %5003 = vmatmul.msk.f32.vlgmr.msrb.gmra.mxu0 %vm215_vm3, %v2671_v49 }
0x1d3b   :  { %2893 = vmatpush.msrb.mxu0 %v6450_v31  ;;  %v7446_v31 = vld [vmem:[#allocation6_spill] sm:$0xff] }
0x1d42   :  { %5007 = vmatmul.msk.f32.vlgmr.msra.gmra.mxu0 %vm143_vm2, %v6509_v35 }
0x1db7   :  { %v2692_v8 = vpop.f32.mrf.mxu0 }
0x1db8   :  { %5004 = vmatmul.msk.f32.vlgmr.msra.gmra.mxu1 %vm215_vm3, %v2692_v8 }
0x1db9   :  { %2911 = vmatpush.msra.mxu1 %v6393_v13  ;;  %v7448_v13 = vld [vmem:[#allocation8_spill] sm:$0xff] }
0x1dbb   :  { %2912 = vmatpush.msra.mxu1 %v6399_v34  ;;  %v7449_v34 = vld [vmem:[#allocation9_spill] sm:$0xff] }
0x1dbd   :  { %2913 = vmatpush.msra.mxu1 %v6405_v23  ;;  %v2738_v23 = vpop.f32.mrf.mxu2 }
0x1dbf   :  { %v2778_v52 = vpop.f32.mrf.mxu0  ;;  %2914 = vmatpush.msra.mxu1 %v7445_v62 }
0x1dc0   :  { %5008 = vmatmul.msk.f32.vlgmr.msrb.gmra.mxu1 %vm143_vm2, %v6509_v35  ;;  %5009 = vmatpush.xpose.msk.msrb.mxu2 %vm215_vm3, %v2778_v52 }
0x1dc3   :  { %5010 = vmatmul.msk.f32.vlgmr.msrb.gmra.mxu2 %vm215_vm3, %v2758_v4 }
0x1dc4   :  { %2931 = vmatpush.msra.mxu2 %v7446_v31 }
0x1dc6   :  { %2932 = vmatpush.msra.mxu2 %v7447_v29 }
0x1dc8   :  { %2933 = vmatpush.msra.mxu2 %v7448_v13  ;;  %5013 = vmatmul.msk.f32.vlgmr.msra.gmra.mxu1 %vm143_vm2, %v6509_v35 }
0x1dca   :  { %2934 = vmatpush.msra.mxu2 %v7449_v34 }
0x1dcb   :  { %5014 = vmatmul.msk.f32.vlgmr.msra.gmra.mxu2 %vm143_vm2, %v6509_v35 }
0x1dcc   :  { %3051 = vmatpush.msrb.mxu2 %v6496_v20 }
0x1e35   :  { %v2715_v16 = vpop.f32.mrf.mxu1 }
0x1e36   :  { %v6693_v40 = vadd.f32 %v2738_v23, %v2715_v16  ;;  %v6750_v16 = vld [vmem:[%s7370_s21 + $0x18] sm:$0xff] }
0x1e3d   :  { %v2798_v41 = vpop.f32.mrf.mxu1 }
0x1e3e   :  { %2870 = vmatpush.msrb.mxu3 %v2798_v41  ;;  %v6762_v41 = vld [vmem:[%s7370_s21 + $0x8] sm:$0xff] }
0x1e40   :  { %2951 = vmatpush.msra.mxu3 %v7450_v61  ;;  %v6768_v61 = vld [vmem:[%s7370_s21] sm:$0xff] }
0x1e42   :  { %2952 = vmatpush.msra.mxu3 %v7451_v51  ;;  %v6774_v51 = vld [vmem:[%s7369_s20 + $0x38] sm:$0xff] }
0x1e44   :  { %2953 = vmatpush.msra.mxu3 %v6470_v38 }
0x1e45   :  { %v2916_v2 = vpop.f32.mrf.mxu1 }
0x1e46   :  { %2954 = vmatpush.msra.mxu3 %v7452_v60  ;;  %v2824_v26 = vpop.f32.mrf.mxu2  ;;  %v7397_v60 = vmov 0.125  }
0x1e47   :  { %v2827_v47 = vmul.f32 0.35355338, %v2824_v26  ;;  %v6782_v26 = vld [vmem:[%s7369_s20 + $0x30] sm:$0xff] }
0x1e49   :  { %v2828_v20 = vsel %vm215_vm3, %v2827_v47, -inf }
0x1e4a   :  { %2829 = vmax.xlane.f32.xlu1 %v2828_v20  ;;  %v6794_v20 = vld [vmem:[%s7369_s20 + $0x20] sm:$0xff] }
0x1e4e   :  { %v2936_v53 = vpop.f32.mrf.mxu2 }
0x1e4f   :  { %5016 = vmatpush.xpose.msk.msra.mxu0 %vm215_vm3, %v2936_v53 }
0x1ebd   :  { %v2830_v14 = vpop.xlane.xlu1 %2829 }
0x1ebe   :  { %v2831_v28 = vsub.f32 %v2827_v47, %v2830_v14  ;;  %v6788_v47 = vld [vmem:[%s7369_s20 + $0x28] sm:$0xff]  ;;  %v6806_v14 = vld [vmem:[%s7369_s20 + $0x18] sm:$0xff] }
0x1ec0   :  { %v2832_v54 = vmul.f32 1.442695, %v2831_v28  ;;  %v6812_v28 = vld [vmem:[%s7369_s20 + $0x10] sm:$0xff] }
0x1ec2   :  { %5270 = vpow2.f32 %v2832_v54  ;;  %v6818_v54 = vld [vmem:[%s7369_s20 + $0x8] sm:$0xff] }
0x1ec8   :  { %v5271_v21 = vpop.eup %5270 }
0x1ec9   :  { %v2834_v17 = vsel %vm215_vm3, %v5271_v21, 0.0 }
0x1eca   :  { %2835 = vadd.xlane.f32.xlu2 %v2834_v17  ;;  %v6830_v17 = vld [vmem:[%s7367_s18 + $0x18] sm:$0xff] }
0x1ecb   :  { %3155 = vmatpush.msra.mxu2 %v6830_v17 }
0x1f3d   :  { %v2836_v12 = vpop.xlane.xlu2 %2835 }
0x1f3e   :  { %5272 = vrcp.f32 %v2836_v12  ;;  %v2848_v10 = vand.u32 2147483648, %v2836_v12  ;;  %v2846_v33 = vand.u32 2147483647, %v2836_v12  ;;  %vm2842_vm9 = vweird.f32 %v2836_v12 }
0x1f40   :  { %v2849_v5 = vor.u32 1.1754944e-38, %v2848_v10  ;;  %vm2847_vm11 = vcmp.eq.f32.partialorder %v2846_v33, 8.507059e+37  ;;  %v3134_v10 = vld [vmem:[%s7453_s1] sm:$0xff] }
0x1f44   :  { %v5273_v38 = vpop.eup %5272 }
0x1f45   :  { %v2838_v45 = vmul.f32 %v5273_v38, %v2836_v12  ;;  %vm2843_vm8 = vweird.f32 %v5273_v38  ;;  %v6836_v12 = vld [vmem:[%s7367_s18 + $0x10] sm:$0xff] }
0x1f46   :  { %vm2844_vm10 = vmor %vm2842_vm9, %vm2843_vm8  ;;  %3156 = vmatpush.msra.mxu2 %v6836_v12 }
0x1f47   :  { %v2839_v18 = vsub.f32 1.0, %v2838_v45  ;;  %v6847_v45 = vld [vmem:[%s7367_s18] sm:$0xff] }
0x1f49   :  { %v2840_v43 = vmul.f32 %v5273_v38, %v2839_v18 }
0x1f4b   :  { %v2841_v44 = vadd.f32 %v5273_v38, %v2840_v43  ;;  %v5349_v43 = vmov 0  }
0x1f4c   :  { %5186 = vset.pattern.permute.xlu2 %v5349_v43  ;;  %5187 = vset.pattern.permute.xlu1 %v5349_v43 }
0x1f4d   :  { %v2845_v36 = vsel %vm2844_vm10, %v5273_v38, %v2841_v44  ;;  %v6841_v38 = vld [vmem:[%s7367_s18 + $0x8] sm:$0xff]  ;;  %3166 = vperm.xlu2 %5186, %v3134_v10   ;;  %5188 = vset.pattern.permute.xlu0 %v5349_v43 }
0x1f4e   :  { %v2850_v22 = vsel %vm2847_vm11, %v2849_v5, %v2845_v36  ;;  %3157 = vmatpush.msra.mxu2 %v6841_v38 }
0x1f4f   :  { %v2851_v15 = vmul.f32 %v5271_v21, %v2850_v22  ;;  %v6824_v21 = vld [vmem:[%s7369_s20] sm:$0xff] }
0x1f50   :  { %3158 = vmatpush.msra.mxu2 %v6847_v45 }
0x1f51   :  { %5011 = vmatmul.msk.f32.vlgmr.msrb.gmra.mxu3 %vm215_vm3, %v2851_v15 }
0x1f52   :  { %3076 = vmatpush.msrb.mxu3 %v6519_v57  ;;  %v6720_v57 = vld [vmem:[%s7365_s16 + $0x1] ss:$0 sm:$0xff]  ;;  %s5351_s16 = smov 128  }
0x1f54   :  { %3077 = vmatpush.msrb.mxu3 %v6525_v1 }
0x1f56   :  { %3078 = vmatpush.msrb.mxu3 %v6531_v37  ;;  %v2417_v37 = vmul.f32 %v6720_v57, %v2411_v0 }
0x1f58   :  { %3079 = vmatpush.msrb.mxu3 %v6537_v32  ;;  %v6728_v32 = vld [vmem:[%s7366_s17 + $0x1] ss:$0 sm:$0xff]  ;;  %s5352_s17 = smov 8  }
0x1f59   :  { %5015 = vmatmul.msk.f32.vlgmr.msra.gmra.mxu3 %vm143_vm2, %v6509_v35  ;;  %v6733_v7 = vadd.f32 %v6728_v32, %v2417_v37  ;;  %v5204_v37 = vld [vmem:[%s7368_s19] ss:$0 sm:$0xff] }
0x1f5a   :  { %3194 = vmatpush.msra.mxu3 %v6806_v14 }
0x1f5c   :  { %3195 = vmatpush.msra.mxu3 %v6812_v28 }
0x1f5e   :  { %3196 = vmatpush.msra.mxu3 %v6818_v54 }
0x1f60   :  { %3197 = vmatpush.msra.mxu3 %v6824_v21 }
0x1fd4   :  { %v2872_v1 = vpop.f32.mrf.mxu3 }
0x1fd5   :  { %5012 = vmatmul.msk.f32.vlgmr.msrb.gmra.mxu0 %vm215_vm3, %v2872_v1 }
0x1fd6   :  { %3096 = vmatpush.msrb.mxu0 %v6547_v50 }
0x1fd8   :  { %3097 = vmatpush.msrb.mxu0 %v6552_v19 }
0x1fda   :  { %3098 = vmatpush.msrb.mxu0 %v6558_v3 }
0x1fdc   :  { %v2956_v11 = vpop.f32.mrf.mxu3  ;;  %3099 = vmatpush.msrb.mxu0 %v6569_v6 }
0x1fdd   :  { %5017 = vmatmul.msk.f32.vlgmr.msra.gmra.mxu0 %vm215_vm3, %v2916_v2  ;;  %3028 = vmatpush.msrb.mxu1 %v2956_v11  ;;  %v6898_v11 = vpop.permute.xlu2 %3166 }
0x1fde   :  { %3100 = vmatpush.msrb.mxu0 %v6576_v55 }
0x1fdf   :  { %3129 = vmatpush.msra.mxu1 %v6733_v7 }
0x1fe0   :  { %3101 = vmatpush.msrb.mxu0 %v6618_v46 }
0x1fe2   :  { %3102 = vmatpush.msrb.mxu0 %v6624_v56 }
0x1fe4   :  { %3103 = vmatpush.msrb.mxu0 %v6630_v63 }
0x2052   :  { %v2895_v50 = vpop.f32.mrf.mxu0 }
0x2053   :  { %v6743_v19 = vadd.f32 %v2895_v50, %v6693_v40  ;;  %v6756_v40 = vld [vmem:[%s7370_s21 + $0x10] sm:$0xff] }
0x205a   :  { %v2982_v3 = vpop.f32.mrf.mxu0 }
0x205b   :  { %v2985_v58 = vmul.f32 0.35355338, %v2982_v3  ;;  %v3172_v3 = vmul.f32 %v5204_v37, %v6898_v11  ;;  %v6945_v37 = vld [vmem:[%s7367_s18 + $0x58] sm:$0xff] }
0x205d   :  { %v2986_v6 = vsel %vm215_vm3, %v2985_v58, -inf }
0x205e   :  { %2987 = vmax.xlane.f32.xlu0 %v2986_v6  ;;  %v6905_v6 = vld [vmem:[%s7370_s21 + $0x38] sm:$0xff] }
0x20d1   :  { %v2988_v59 = vpop.xlane.xlu0 %2987 }
0x20d2   :  { %v2989_v48 = vsub.f32 %v2985_v58, %v2988_v59 }
0x20d4   :  { %v2990_v27 = vmul.f32 1.442695, %v2989_v48 }
0x20d6   :  { %5274 = vpow2.f32 %v2990_v27  ;;  %v6918_v27 = vld [vmem:[%s7370_s21 + $0x28] sm:$0xff] }
0x20dc   :  { %v5275_v55 = vpop.eup %5274 }
0x20dd   :  { %v2992_v46 = vsel %vm215_vm3, %v5275_v55, 0.0 }
0x20de   :  { %2993 = vadd.xlane.f32.xlu1 %v2992_v46 }
0x2151   :  { %v2994_v56 = vpop.xlane.xlu1 %2993 }
0x2152   :  { %5276 = vrcp.f32 %v2994_v56  ;;  %v3006_v52 = vand.u32 2147483648, %v2994_v56  ;;  %v3004_v31 = vand.u32 2147483647, %v2994_v56  ;;  %vm3000_vm13 = vweird.f32 %v2994_v56 }
0x2154   :  { %v3007_v29 = vor.u32 1.1754944e-38, %v3006_v52  ;;  %vm3005_vm15 = vcmp.eq.f32.partialorder %v3004_v31, 8.507059e+37 }
0x2158   :  { %v5277_v63 = vpop.eup %5276 }
0x2159   :  { %v2996_v49 = vmul.f32 %v5277_v63, %v2994_v56  ;;  %vm3001_vm12 = vweird.f32 %v5277_v63  ;;  %v6935_v56 = vld [vmem:[%s7454_s10] sm:$0xff] }
0x215a   :  { %vm3002_vm14 = vmor %vm3000_vm13, %vm3001_vm12 }
0x215b   :  { %v2997_v8 = vsub.f32 1.0, %v2996_v49 }
0x215d   :  { %v2998_v62 = vmul.f32 %v5277_v63, %v2997_v8 }
0x215f   :  { %v2999_v4 = vadd.f32 %v5277_v63, %v2998_v62 }
0x2161   :  { %v3003_v13 = vsel %vm3002_vm14, %v5277_v63, %v2999_v4 }
0x2162   :  { %v3008_v34 = vsel %vm3005_vm15, %v3007_v29, %v3003_v13 }
0x2163   :  { %v3009_v23 = vmul.f32 %v5275_v55, %v3008_v34  ;;  %v6926_v55 = vld [vmem:[%s7370_s21 + $0x20] sm:$0xff] }
0x2165   :  { %5018 = vmatmul.msk.f32.vlgmr.msrb.gmra.mxu1 %vm215_vm3, %v3009_v23 }
0x2166   :  { %3218 = vmatpush.msrb.mxu1 %v6750_v16 }
0x2168   :  { %3219 = vmatpush.msrb.mxu1 %v6756_v40 }
0x216a   :  { %3220 = vmatpush.msrb.mxu1 %v6762_v41 }
0x216c   :  { %3221 = vmatpush.msrb.mxu1 %v6768_v61 }
0x216d   :  { %5022 = vmatmul.msk.f32.vlgmr.msra.gmra.mxu1 %vm215_vm3, %v7397_v60 }
0x216e   :  { %3352 = vmatpush.msra.mxu1 %v6774_v51 }
0x2170   :  { %3353 = vmatpush.msra.mxu1 %v6782_v26 }
0x2172   :  { %3354 = vmatpush.msra.mxu1 %v6788_v47 }
0x2174   :  { %3355 = vmatpush.msra.mxu1 %v6794_v20 }
0x2175   :  { %5025 = vmatmul.msk.f32.vlgmr.msrb.gmra.mxu1 %vm143_vm2, %v6733_v7 }
0x217d   :  { %5039 = vmatmul.msk.f32.vlgmr.msra.gmra.mxu1 %vm143_vm2, %v6733_v7 }
0x21e2   :  { %v3030_v53 = vpop.f32.mrf.mxu1 }
0x21e3   :  { %5019 = vmatmul.msk.f32.vlgmr.msrb.gmra.mxu2 %vm215_vm3, %v3030_v53 }
0x21ea   :  { %v6850_v18 = vpop.f32.mrf.mxu1 }
0x21eb   :  { %5023 = vmatmul.msk.f32.vlgmr.msra.gmra.mxu2 %vm143_vm2, %v6850_v18 }
0x21f2   :  { %v3223_v15 = vpop.f32.mrf.mxu1 }
0x21fa   :  { %v3357_v0 = vpop.f32.mrf.mxu1 }
0x2266   :  { %v3053_v33 = vpop.f32.mrf.mxu2 }
0x2267   :  { %v3056_v44 = vadd.f32 %v3053_v33, %v6743_v19 }
0x2269   :  { %v3057_v5 = vadd.f32 %v6564_v30, %v3056_v44  ;;  %v6879_v30 = vld [vmem:[%s7367_s18 + $0x30] sm:$0xff] }
0x226b   :  { %v3058_v36 = vadd.f32 %v3057_v5, %v6509_v35  ;;  %v6873_v35 = vld [vmem:[%s7367_s18 + $0x38] sm:$0xff] }
0x226c   :  { %3319 = vmatpush.msra.mxu0 %v6873_v35 }
0x226d   :  { %v3059_v22 = vmul.f32 %v6583_v24, %v3058_v36  ;;  %v6885_v24 = vld [vmem:[%s7367_s18 + $0x28] sm:$0xff] }
0x226e   :  { %3320 = vmatpush.msra.mxu0 %v6879_v30  ;;  %v3160_v50 = vpop.f32.mrf.mxu2 }
0x226f   :  { %v6863_v25 = vadd.f32 %v6590_v42, %v3059_v22  ;;  %v6891_v42 = vld [vmem:[%s7367_s18 + $0x20] sm:$0xff]  ;;  %v3173_v58 = vperm.slane %v3160_v50, 0 }
0x2270   :  { %3321 = vmatpush.msra.mxu0 %v6885_v24  ;;  %v5205_v50 = vld [vmem:[%s7368_s19 + $0x1] ss:$0 sm:$0xff] }
0x2271   :  { %5020 = vmatmul.msk.f32.vlgmr.msrb.gmra.mxu3 %vm143_vm2, %v6863_v25  ;;  %v3174_v59 = vadd.f32 %v3173_v58, %v3172_v3  ;;  %v6960_v58 = vld [vmem:[%s7367_s18 + $0x48] sm:$0xff] }
0x2272   :  { %3296 = vmatpush.msrb.mxu3 %v3223_v15  ;;  %3322 = vmatpush.msra.mxu0 %v6891_v42 }
0x2279   :  { %5024 = vmatmul.msk.f32.vlgmr.msra.gmra.mxu3 %vm143_vm2, %v6733_v7 }
0x227a   :  { %5045 = vmatpush.xpose.msk.msra.mxu3 %vm215_vm3, %v3357_v0 }
0x22f4   :  { %v3081_v1 = vpop.f32.mrf.mxu3 }
0x22f5   :  { %v3082_v2 = vadd.f32 %v6640_v9, %v3081_v1  ;;  %v6912_v9 = vld [vmem:[%s7370_s21 + $0x30] sm:$0xff] }
0x22f7   :  { %v3084_v19 = vmax.f32 %v3082_v2, 0.0 }
0x22f9   :  { %5021 = vmatmul.msk.f32.vlgmr.msrb.gmra.mxu0 %vm898_vm6, %v3084_v19  ;;  %v6954_v19 = vld [vmem:[%s7367_s18 + $0x50] sm:$0xff] }
0x22fc   :  { %v3199_v48 = vpop.f32.mrf.mxu3 }
0x22fd   :  { %5026 = vmatpush.xpose.msk.msrb.mxu2 %vm215_vm3, %v3199_v48  ;;  %v6967_v48 = vld [vmem:[%s7367_s18 + $0x40] sm:$0xff] }
0x2300   :  { %5027 = vmatmul.msk.f32.vlgmr.msrb.gmra.mxu2 %vm215_vm3, %v3174_v59  ;;  %v3332_v59 = vmul.f32 %v5205_v50, %v6898_v11 }
0x2301   :  { %3377 = vmatpush.msra.mxu2 %v6905_v6  ;;  %5033 = vmatmul.msk.f32.vlgmr.msra.gmra.mxu0 %vm143_vm2, %v6850_v18 }
0x2303   :  { %3378 = vmatpush.msra.mxu2 %v6912_v9 }
0x2305   :  { %3379 = vmatpush.msra.mxu2 %v6918_v27 }
0x2307   :  { %3380 = vmatpush.msra.mxu2 %v6926_v55 }
0x2308   :  { %5044 = vmatmul.msk.f32.vlgmr.msra.gmra.mxu2 %vm143_vm2, %v6733_v7 }
0x2376   :  { %v6940_v10 = vpop.f32.mrf.mxu0 }
0x237e   :  { %v3324_v2 = vpop.f32.mrf.mxu0 }
0x237f   :  { %v3333_v3 = vperm.slane %v3324_v2, 0 }
0x2383   :  { %v3249_v46 = vpop.f32.mrf.mxu2 }
0x2384   :  { %v3252_v63 = vmul.f32 0.35355338, %v3249_v46  ;;  %v3334_v46 = vadd.f32 %v3333_v3, %v3332_v59 }
0x2386   :  { %v3253_v49 = vadd.f32 %v3252_v63, %v6935_v56  ;;  %v6977_v63 = vld [vmem:[%s7371_s22] sm:$0xff] }
0x2387   :  { %3503 = vmatpush.msrb.mxu2 %v6977_v63 }
0x2388   :  { %v3254_v8 = vsel %vm215_vm3, %v3253_v49, -inf }
0x2389   :  { %3255 = vmax.xlane.f32.xlu0 %v3254_v8 }
0x238b   :  { %v3382_v52 = vpop.f32.mrf.mxu2 }
0x238c   :  { %3455 = vmatpush.msrb.mxu0 %v3382_v52 }
0x23fc   :  { %v3256_v62 = vpop.xlane.xlu0 %3255 }
0x23fd   :  { %v3257_v31 = vsub.f32 %v3253_v49, %v3256_v62 }
0x23ff   :  { %v3258_v4 = vmul.f32 1.442695, %v3257_v31 }
0x2401   :  { %5278 = vpow2.f32 %v3258_v4 }
0x2407   :  { %v5279_v29 = vpop.eup %5278 }
0x2408   :  { %v3260_v13 = vsel %vm215_vm3, %v5279_v29, 0.0 }
0x2409   :  { %3261 = vadd.xlane.f32.xlu1 %v3260_v13 }
0x247c   :  { %v3262_v34 = vpop.xlane.xlu1 %3261 }
0x247d   :  { %5280 = vrcp.f32 %v3262_v34  ;;  %v3274_v33 = vand.u32 2147483648, %v3262_v34  ;;  %v3272_v5 = vand.u32 2147483647, %v3262_v34  ;;  %vm3268_vm0 = vweird.f32 %v3262_v34 }
0x247f   :  { %v3275_v22 = vor.u32 1.1754944e-38, %v3274_v33  ;;  %vm3273_vm4 = vcmp.eq.f32.partialorder %v3272_v5, 8.507059e+37  ;;  %v6998_v33 = vld [vmem:[%s7369_s20 + $0x48] sm:$0xff] }
0x2483   :  { %v5281_v23 = vpop.eup %5280 }
0x2484   :  { %v3264_v53 = vmul.f32 %v5281_v23, %v3262_v34  ;;  %vm3269_vm6 = vweird.f32 %v5281_v23 }
0x2485   :  { %vm3270_vm1 = vmor %vm3268_vm0, %vm3269_vm6 }
0x2486   :  { %v3265_v43 = vsub.f32 1.0, %v3264_v53  ;;  %v6987_v53 = vld [vmem:[%s7369_s20 + $0x58] sm:$0xff] }
0x2487   :  { %3558 = vmatpush.msra.mxu0 %v6987_v53 }
0x2488   :  { %v3266_v44 = vmul.f32 %v5281_v23, %v3265_v43  ;;  %v6992_v43 = vld [vmem:[%s7369_s20 + $0x50] sm:$0xff] }
0x2489   :  { %3559 = vmatpush.msra.mxu0 %v6992_v43 }
0x248a   :  { %v3267_v36 = vadd.f32 %v5281_v23, %v3266_v44  ;;  %v7004_v44 = vld [vmem:[%s7369_s20 + $0x40] sm:$0xff] }
0x248b   :  { %3560 = vmatpush.msra.mxu0 %v6998_v33 }
0x248c   :  { %v3271_v15 = vsel %vm3270_vm1, %v5281_v23, %v3267_v36 }
0x248d   :  { %v3276_v0 = vsel %vm3273_vm4, %v3275_v22, %v3271_v15  ;;  %3561 = vmatpush.msra.mxu0 %v7004_v44 }
0x248e   :  { %v3277_v1 = vmul.f32 %v5279_v29, %v3276_v0 }
0x2490   :  { %5028 = vmatmul.msk.f32.vlgmr.msrb.gmra.mxu3 %vm215_vm3, %v3277_v1 }
0x2491   :  { %3525 = vmatpush.msrb.mxu3 %v6945_v37 }
0x2493   :  { %3526 = vmatpush.msrb.mxu3 %v6954_v19 }
0x2495   :  { %3527 = vmatpush.msrb.mxu3 %v6960_v58 }
0x2497   :  { %3528 = vmatpush.msrb.mxu3 %v6967_v48 }
0x2498   :  { %5046 = vmatmul.msk.f32.vlgmr.msra.gmra.mxu3 %vm215_vm3, %v3334_v46 }
0x24a0   :  { %5055 = vmatmul.msk.f32.vlgmr.msrb.gmra.mxu3 %vm143_vm2, %v6850_v18 }
0x2513   :  { %v3298_v49 = vpop.f32.mrf.mxu3 }
0x2514   :  { %5050 = vmatmul.msk.f32.vlgmr.msrb.gmra.mxu2 %vm215_vm3, %v3298_v49 }
0x251b   :  { %v3408_v8 = vpop.f32.mrf.mxu3 }
0x251c   :  { %v3411_v52 = vmul.f32 0.35355338, %v3408_v8  ;;  %v7014_v8 = vld [vmem:[%s7371_s22 + $0x8] sm:$0xff] }
0x251d   :  { %3480 = vmatpush.msrb.mxu1 %v7014_v8 }
0x251e   :  { %v3412_v62 = vadd.f32 %v3411_v52, %v6935_v56  ;;  %v7020_v52 = vld [vmem:[%s7370_s21 + $0x58] sm:$0xff] }
0x251f   :  { %3583 = vmatpush.msra.mxu1 %v7020_v52 }
0x2520   :  { %v3413_v31 = vsel %vm215_vm3, %v3412_v62, -inf }
0x2521   :  { %3414 = vmax.xlane.f32.xlu0 %v3413_v31  ;;  %v7031_v31 = vld [vmem:[%s7370_s21 + $0x48] sm:$0xff] }
0x2594   :  { %v3415_v4 = vpop.xlane.xlu0 %3414 }
0x2595   :  { %v3416_v29 = vsub.f32 %v3412_v62, %v3415_v4  ;;  %v7025_v62 = vld [vmem:[%s7370_s21 + $0x50] sm:$0xff]  ;;  %v7038_v4 = vld [vmem:[%s7370_s21 + $0x40] sm:$0xff] }
0x2596   :  { %3584 = vmatpush.msra.mxu1 %v7025_v62 }
0x2597   :  { %v3417_v13 = vmul.f32 1.442695, %v3416_v29  ;;  %v7044_v29 = vld [vmem:[%s7367_s18 + $0x78] sm:$0xff] }
0x2598   :  { %3585 = vmatpush.msra.mxu1 %v7031_v31 }
0x2599   :  { %5282 = vpow2.f32 %v3417_v13 }
0x259a   :  { %3586 = vmatpush.msra.mxu1 %v7038_v4 }
0x259f   :  { %v5283_v34 = vpop.eup %5282 }
0x25a0   :  { %v3419_v23 = vsel %vm215_vm3, %v5283_v34, 0.0 }
0x25a1   :  { %3420 = vadd.xlane.f32.xlu1 %v3419_v23  ;;  %v3530_v23 = vpop.f32.mrf.mxu3 }
0x2614   :  { %v3421_v5 = vpop.xlane.xlu1 %3420 }
0x2615   :  { %5284 = vrcp.f32 %v3421_v5  ;;  %v3433_v0 = vand.u32 2147483648, %v3421_v5  ;;  %v3431_v2 = vand.u32 2147483647, %v3421_v5  ;;  %vm3427_vm7 = vweird.f32 %v3421_v5 }
0x2617   :  { %v3434_v3 = vor.u32 1.1754944e-38, %v3433_v0  ;;  %vm3432_vm9 = vcmp.eq.f32.partialorder %v3431_v2, 8.507059e+37  ;;  %v7071_v0 = vld [vmem:[%s7369_s20 + $0x78] sm:$0xff] }
0x2618   :  { %7457 = vst [vmem:[#allocation7_spill] sm:$0xff] %v7071_v0 }
0x261b   :  { %v5285_v36 = vpop.eup %5284 }
0x261c   :  { %v3423_v22 = vmul.f32 %v5285_v36, %v3421_v5  ;;  %vm3428_vm5 = vweird.f32 %v5285_v36  ;;  %v7056_v5 = vld [vmem:[%s7367_s18 + $0x68] sm:$0xff] }
0x261d   :  { %vm3429_vm8 = vmor %vm3427_vm7, %vm3428_vm5  ;;  %7455 = vst [vmem:[#allocation5_spill] sm:$0xff] %v7056_v5 }
0x261e   :  { %v3424_v15 = vsub.f32 1.0, %v3423_v22  ;;  %v7065_v22 = vld [vmem:[%s7367_s18 + $0x60] sm:$0xff] }
0x261f   :  { %7456 = vst [vmem:[#allocation6_spill] sm:$0xff] %v7065_v22 }
0x2620   :  { %v3425_v1 = vmul.f32 %v5285_v36, %v3424_v15  ;;  %v3539_v15 = vperm.slane %v3530_v23, 0 }
0x2622   :  { %v3426_v50 = vadd.f32 %v5285_v36, %v3425_v1 }
0x2624   :  { %v3430_v59 = vsel %vm3429_vm8, %v5285_v36, %v3426_v50  ;;  %v5206_v36 = vld [vmem:[%s7368_s19 + $0x2] ss:$0 sm:$0xff] }
0x2625   :  { %v3435_v46 = vsel %vm3432_vm9, %v3434_v3, %v3430_v59  ;;  %v3538_v1 = vmul.f32 %v5206_v36, %v6898_v11  ;;  %v7082_v3 = vld [vmem:[%s7369_s20 + $0x70] sm:$0xff]  ;;  %v7088_v59 = vld [vmem:[%s7369_s20 + $0x68] sm:$0xff] }
0x2626   :  { %v3436_v49 = vmul.f32 %v5283_v34, %v3435_v46  ;;  %v7050_v34 = vld [vmem:[%s7367_s18 + $0x70] sm:$0xff]  ;;  %7458 = vst [vmem:[#allocation8_spill] sm:$0xff] %v7082_v3  ;;  %v7094_v46 = vld [vmem:[%s7369_s20 + $0x60] sm:$0xff] }
0x2627   :  { %v3540_v50 = vadd.f32 %v3539_v15, %v3538_v1  ;;  %7459 = vst [vmem:[#allocation9_spill] sm:$0xff] %v7088_v59 }
0x2628   :  { %5047 = vmatmul.msk.f32.vlgmr.msrb.gmra.mxu0 %vm215_vm3, %v3436_v49  ;;  %7460 = vst [vmem:[#allocation10_spill] sm:$0xff] %v7094_v46  ;;  %v7105_v49 = vld [vmem:[%s7371_s22 + $0x10] sm:$0xff] }
0x2629   :  { %3686 = vmatpush.msrb.mxu0 %v7105_v49 }
0x2630   :  { %5061 = vmatmul.msk.f32.vlgmr.msra.gmra.mxu0 %vm143_vm2, %v6733_v7 }
0x26a5   :  { %v3457_v13 = vpop.f32.mrf.mxu0 }
0x26a6   :  { %5049 = vmatmul.msk.f32.vlgmr.msrb.gmra.mxu1 %vm215_vm3, %v3457_v13  ;;  %v3505_v13 = vpop.f32.mrf.mxu2 }
0x26a7   :  { %3709 = vmatpush.msrb.mxu1 %v7044_v29 }
0x26a9   :  { %3710 = vmatpush.msrb.mxu1 %v7050_v34 }
0x26ab   :  { %3711 = vmatpush.msrb.mxu1 %v7056_v5 }
0x26ad   :  { %v3563_v2 = vpop.f32.mrf.mxu0  ;;  %3712 = vmatpush.msrb.mxu1 %v7065_v22 }
0x26ae   :  { %5066 = vmatmul.msk.f32.vlgmr.msra.gmra.mxu1 %vm143_vm2, %v6733_v7  ;;  %5067 = vmatpush.xpose.msk.msra.mxu2 %vm215_vm3, %v3563_v2 }
0x26b1   :  { %5068 = vmatmul.msk.f32.vlgmr.msra.gmra.mxu2 %vm215_vm3, %v3540_v50 }
0x26b2   :  { %3742 = vmatpush.msrb.mxu2 %v7071_v0 }
0x26b4   :  { %3743 = vmatpush.msrb.mxu2 %v7082_v3 }
0x26b6   :  { %3744 = vmatpush.msrb.mxu2 %v7088_v59  ;;  %5076 = vmatmul.msk.f32.vlgmr.msrb.gmra.mxu1 %vm143_vm2, %v6850_v18 }
0x26b8   :  { %3745 = vmatpush.msrb.mxu2 %v7094_v46 }
0x26b9   :  { %5082 = vmatmul.msk.f32.vlgmr.msrb.gmra.mxu2 %vm143_vm2, %v6733_v7 }
0x2723   :  { %v3482_v23 = vpop.f32.mrf.mxu1 }
0x2724   :  { %v7108_v36 = vadd.f32 %v3505_v13, %v3482_v23  ;;  %v7117_v23 = vld [vmem:[%s7370_s21 + $0x78] sm:$0xff] }
0x2725   :  { %7461 = vst [vmem:[#allocation11_spill] sm:$0xff] %v7117_v23 }
0x272b   :  { %v3588_v15 = vpop.f32.mrf.mxu1 }
0x272c   :  { %3661 = vmatpush.msra.mxu3 %v3588_v15  ;;  %v7123_v15 = vld [vmem:[%s7370_s21 + $0x70] sm:$0xff] }
0x272d   :  { %7462 = vst [vmem:[#allocation12_spill] sm:$0xff] %v7123_v15 }
0x272e   :  { %3767 = vmatpush.msrb.mxu3 %v7117_v23 }
0x2730   :  { %3768 = vmatpush.msrb.mxu3 %v7123_v15 }
0x2734   :  { %v3614_v1 = vpop.f32.mrf.mxu2 }
0x2735   :  { %v3617_v18 = vmul.f32 0.35355338, %v3614_v1 }
0x2737   :  { %v3618_v2 = vadd.f32 %v3617_v18, %v6935_v56 }
0x2739   :  { %v3619_v50 = vsel %vm215_vm3, %v3618_v2, -inf }
0x273a   :  { %3620 = vmax.xlane.f32.xlu0 %v3619_v50 }
0x273c   :  { %v3747_v60 = vpop.f32.mrf.mxu2 }
0x273d   :  { %5088 = vmatpush.xpose.msk.msra.mxu0 %vm215_vm3, %v3747_v60  ;;  %v7129_v60 = vld [vmem:[%s7370_s21 + $0x68] sm:$0xff] }
0x273e   :  { %7463 = vst [vmem:[#allocation13_spill] sm:$0xff] %v7129_v60  ;;  %3769 = vmatpush.msrb.mxu3 %v7129_v60 }
0x27ad   :  { %v3621_v46 = vpop.xlane.xlu0 %3620 }
0x27ae   :  { %v3622_v59 = vsub.f32 %v3618_v2, %v3621_v46 }
0x27b0   :  { %v3623_v3 = vmul.f32 1.442695, %v3622_v59 }
0x27b2   :  { %5286 = vpow2.f32 %v3623_v3  ;;  %v7135_v3 = vld [vmem:[%s7370_s21 + $0x60] sm:$0xff] }
0x27b3   :  { %3770 = vmatpush.msrb.mxu3 %v7135_v3 }
0x27b8   :  { %v5287_v0 = vpop.eup %5286 }
0x27b9   :  { %v3625_v13 = vsel %vm215_vm3, %v5287_v0, 0.0 }
0x27ba   :  { %3626 = vadd.xlane.f32.xlu1 %v3625_v13 }
0x282d   :  { %v3627_v59 = vpop.xlane.xlu1 %3626 }
0x282e   :  { %5288 = vrcp.f32 %v3627_v59  ;;  %v3639_v2 = vand.u32 2147483648, %v3627_v59  ;;  %v3637_v13 = vand.u32 2147483647, %v3627_v59  ;;  %vm3633_vm11 = vweird.f32 %v3627_v59 }
0x2830   :  { %v3640_v60 = vor.u32 1.1754944e-38, %v3639_v2  ;;  %vm3638_vm13 = vcmp.eq.f32.partialorder %v3637_v13, 8.507059e+37 }
0x2834   :  { %v5289_v46 = vpop.eup %5288 }
0x2835   :  { %v3629_v1 = vmul.f32 %v5289_v46, %v3627_v59  ;;  %vm3634_vm10 = vweird.f32 %v5289_v46 }
0x2836   :  { %vm3635_vm12 = vmor %vm3633_vm11, %vm3634_vm10 }
0x2837   :  { %v3630_v18 = vsub.f32 1.0, %v3629_v1  ;;  %v7174_v1 = vld [vmem:[%s7371_s22 + $0x18] sm:$0xff] }
0x2838   :  { %3870 = vmatpush.msra.mxu2 %v7174_v1 }
0x2839   :  { %v3631_v50 = vmul.f32 %v5289_v46, %v3630_v18 }
0x283a   :  { %4029 = vmatpush.msrb.mxu2 %v6806_v14 }
0x283b   :  { %v3632_v15 = vadd.f32 %v5289_v46, %v3631_v50 }
0x283c   :  { %4030 = vmatpush.msrb.mxu2 %v6812_v28 }
0x283d   :  { %v3636_v23 = vsel %vm3635_vm12, %v5289_v46, %v3632_v15  ;;  %v3714_v15 = vpop.f32.mrf.mxu1 }
0x283e   :  { %v3641_v22 = vsel %vm3638_vm13, %v3640_v60, %v3636_v23  ;;  %v3106_v23 = vadd.f32 %v6712_v39, %v6940_v10  ;;  %4031 = vmatpush.msrb.mxu2 %v6818_v54 }
0x283f   :  { %v3642_v5 = vmul.f32 %v5287_v0, %v3641_v22 }
0x2840   :  { %v3108_v22 = vadd.f32 %v3106_v23, %v6863_v25  ;;  %4032 = vmatpush.msrb.mxu2 %v6824_v21  ;;  %v5096_v21 = vld [vmem:[%s7453_s1 + $0x8] sm:$0xff] }
0x2841   :  { %5069 = vmatmul.msk.f32.vlgmr.msra.gmra.mxu3 %vm215_vm3, %v3642_v5  ;;  %4001 = vperm.xlu1 %5187, %v5096_v21  }
0x2842   :  { %5093 = vmatpush.xpose.msk.msra.mxu3 %vm143_vm2, %v6733_v7  ;;  %v3109_v5 = vmul.f32 %v6720_v57, %v3108_v22  ;;  %v7464_v57 = vmov 0.125  }
0x2844   :  { %v7152_v0 = vadd.f32 %v6728_v32, %v3109_v5 }
0x2849   :  { %5087 = vmatmul.msk.f32.vlgmr.msrb.gmra.mxu3 %vm143_vm2, %v6733_v7 }
0x284a   :  { %4053 = vmatpush.msrb.mxu3 %v6750_v16  ;;  %v5207_v16 = vld [vmem:[%s7368_s19 + $0x3] ss:$0 sm:$0xff] }
0x284b   :  { %v3722_v39 = vmul.f32 %v5207_v16, %v6898_v11 }
0x284c   :  { %4054 = vmatpush.msrb.mxu3 %v6756_v40  ;;  %v3723_v40 = vperm.slane %v3714_v15, 0 }
0x284e   :  { %4055 = vmatpush.msrb.mxu3 %v6762_v41  ;;  %v3724_v41 = vadd.f32 %v3723_v40, %v3722_v39  ;;  %v5208_v40 = vld [vmem:[%s7372_s23] ss:$0 sm:$0xff] }
0x2850   :  { %4056 = vmatpush.msrb.mxu3 %v6768_v61 }
0x28c4   :  { %v3663_v7 = vpop.f32.mrf.mxu3 }
0x28c5   :  { %5071 = vmatmul.msk.f32.vlgmr.msrb.gmra.mxu0 %vm215_vm3, %v3663_v7 }
0x28c6   :  { %3962 = vmatpush.msrb.mxu0 %v7152_v0 }
0x28cc   :  { %v3772_v61 = vpop.f32.mrf.mxu3 }
0x28cd   :  { %5089 = vmatmul.msk.f32.vlgmr.msra.gmra.mxu0 %vm215_vm3, %v3724_v41  ;;  %3845 = vmatpush.msra.mxu1 %v3772_v61  ;;  %v7204_v41 = vpop.permute.xlu1 %4001 }
0x28cf   :  { %3990 = vmatpush.msrb.mxu1 %v6830_v17 }
0x28d1   :  { %3991 = vmatpush.msrb.mxu1 %v6836_v12 }
0x28d3   :  { %3992 = vmatpush.msrb.mxu1 %v6841_v38 }
0x28d5   :  { %3993 = vmatpush.msrb.mxu1 %v6847_v45  ;;  %5095 = vmatmul.msk.f32.vlgmr.msrb.gmra.mxu0 %vm215_vm3, %v7464_v57 }
0x2942   :  { %v3688_v32 = vpop.f32.mrf.mxu0 }
0x2943   :  { %v3691_v25 = vadd.f32 %v3688_v32, %v7108_v36 }
0x294a   :  { %v3798_v11 = vpop.f32.mrf.mxu0 }
0x294b   :  { %v3801_v10 = vmul.f32 0.35355338, %v3798_v11 }
0x294d   :  { %v3802_v60 = vadd.f32 %v3801_v10, %v6935_v56 }
0x294f   :  { %v3803_v59 = vsel %vm215_vm3, %v3802_v60, -inf }
0x2950   :  { %3804 = vmax.xlane.f32.xlu2 %v3803_v59 }
0x2952   :  { %v7182_v54 = vpop.f32.mrf.mxu0 }
0x29c3   :  { %v3805_v17 = vpop.xlane.xlu2 %3804 }
0x29c4   :  { %v3806_v46 = vsub.f32 %v3802_v60, %v3805_v17 }
0x29c6   :  { %v3807_v12 = vmul.f32 1.442695, %v3806_v46 }
0x29c8   :  { %5290 = vpow2.f32 %v3807_v12 }
0x29ce   :  { %v5291_v38 = vpop.eup %5290 }
0x29cf   :  { %v3809_v45 = vsel %vm215_vm3, %v5291_v38, 0.0 }
0x29d0   :  { %3810 = vadd.xlane.f32.xlu0 %v3809_v45 }
0x2a43   :  { %v3811_v36 = vpop.xlane.xlu0 %3810 }
0x2a44   :  { %5292 = vrcp.f32 %v3811_v36  ;;  %v3823_v13 = vand.u32 2147483648, %v3811_v36  ;;  %v3821_v22 = vand.u32 2147483647, %v3811_v36  ;;  %vm3817_vm15 = vweird.f32 %v3811_v36 }
0x2a46   :  { %v3824_v15 = vor.u32 1.1754944e-38, %v3823_v13  ;;  %vm3822_vm0 = vcmp.eq.f32.partialorder %v3821_v22, 8.507059e+37 }
0x2a4a   :  { %v5293_v18 = vpop.eup %5292 }
0x2a4b   :  { %v3813_v2 = vmul.f32 %v5293_v18, %v3811_v36  ;;  %vm3818_vm14 = vweird.f32 %v5293_v18  ;;  %v5210_v36 = vld [vmem:[%s7368_s19 + $0x1] ss:$0 sm:$0xff] }
0x2a4c   :  { %vm3819_vm6 = vmor %vm3817_vm15, %vm3818_vm14 }
0x2a4d   :  { %v3814_v50 = vsub.f32 1.0, %v3813_v2  ;;  %v4165_v2 = vmul.f32 %v5210_v36, %v7204_v41 }
0x2a4f   :  { %v3815_v23 = vmul.f32 %v5293_v18, %v3814_v50 }
0x2a51   :  { %v3816_v5 = vadd.f32 %v5293_v18, %v3815_v23 }
0x2a53   :  { %v3820_v14 = vsel %vm3819_vm6, %v5293_v18, %v3816_v5 }
0x2a54   :  { %v3825_v28 = vsel %vm3822_vm0, %v3824_v15, %v3820_v14 }
0x2a55   :  { %v3826_v7 = vmul.f32 %v5291_v38, %v3825_v28 }
0x2a57   :  { %5090 = vmatmul.msk.f32.vlgmr.msra.gmra.mxu1 %vm215_vm3, %v3826_v7 }
0x2a5f   :  { %5098 = vmatmul.msk.f32.vlgmr.msrb.gmra.mxu1 %vm143_vm2, %v7182_v54 }
0x2ad4   :  { %v3847_v16 = vpop.f32.mrf.mxu1 }
0x2ad5   :  { %5092 = vmatmul.msk.f32.vlgmr.msra.gmra.mxu2 %vm215_vm3, %v3847_v16 }
0x2ad6   :  { %4153 = vmatpush.msra.mxu2 %v6873_v35  ;;  %v5209_v35 = vld [vmem:[%s7368_s19] ss:$0 sm:$0xff] }
0x2ad7   :  { %v4007_v61 = vmul.f32 %v5209_v35, %v7204_v41 }
0x2ad8   :  { %4154 = vmatpush.msra.mxu2 %v6879_v30 }
0x2ada   :  { %4155 = vmatpush.msra.mxu2 %v6885_v24 }
0x2adc   :  { %4156 = vmatpush.msra.mxu2 %v6891_v42  ;;  %v3995_v24 = vpop.f32.mrf.mxu1 }
0x2add   :  { %5099 = vmatmul.msk.f32.vlgmr.msrb.gmra.mxu2 %vm143_vm2, %v7152_v0  ;;  %v4008_v57 = vperm.slane %v3995_v24, 0 }
0x2adf   :  { %v4009_v32 = vadd.f32 %v4008_v57, %v4007_v61 }
0x2ae5   :  { %5108 = vmatmul.msk.f32.vlgmr.msra.gmra.mxu2 %vm143_vm2, %v7182_v54 }
0x2b58   :  { %v3872_v39 = vpop.f32.mrf.mxu2 }
0x2b59   :  { %v3875_v30 = vadd.f32 %v3872_v39, %v3691_v25 }
0x2b5b   :  { %v3880_v42 = vadd.f32 %v5208_v40, %v3875_v30 }
0x2b5d   :  { %5094 = vmatmul.msk.f32.vlgmr.msra.gmra.mxu3 %vm143_vm2, %v3880_v42 }
0x2b5e   :  { %4184 = vmatpush.msra.mxu3 %v6774_v51 }
0x2b60   :  { %v4034_v11 = vpop.f32.mrf.mxu2  ;;  %4185 = vmatpush.msra.mxu3 %v6782_v26 }
0x2b61   :  { %5101 = vmatpush.xpose.msk.msra.mxu0 %vm215_vm3, %v4034_v11 }
0x2b62   :  { %4186 = vmatpush.msra.mxu3 %v6788_v47  ;;  %v7235_v47 = vld [vmem:[%s7454_s10 + $0x8] sm:$0xff] }
0x2b64   :  { %5102 = vmatmul.msk.f32.vlgmr.msra.gmra.mxu0 %vm215_vm3, %v4009_v32  ;;  %4187 = vmatpush.msra.mxu3 %v6794_v20 }
0x2b65   :  { %4208 = vmatpush.msrb.mxu0 %v6905_v6  ;;  %5100 = vmatmul.msk.f32.vlgmr.msrb.gmra.mxu3 %vm143_vm2, %v7152_v0 }
0x2b66   :  { %4310 = vmatpush.msrb.mxu3 %v7014_v8 }
0x2b67   :  { %4209 = vmatpush.msrb.mxu0 %v6912_v9 }
0x2b68   :  { %v4158_v45 = vpop.f32.mrf.mxu2 }
0x2b69   :  { %4210 = vmatpush.msrb.mxu0 %v6918_v27  ;;  %v4166_v18 = vperm.slane %v4158_v45, 0 }
0x2b6b   :  { %4211 = vmatpush.msrb.mxu0 %v6926_v55  ;;  %v4167_v50 = vadd.f32 %v4166_v18, %v4165_v2 }
0x2b6c   :  { %5119 = vmatmul.msk.f32.vlgmr.msrb.gmra.mxu0 %vm143_vm2, %v7152_v0 }
0x2b6d   :  { %4333 = vmatpush.msra.mxu0 %v6977_v63  ;;  %5114 = vmatmul.msk.f32.vlgmr.msra.gmra.mxu3 %vm143_vm2, %v7152_v0 }
0x2b6e   :  { %4409 = vmatpush.msra.mxu3 %v7020_v52 }
0x2b70   :  { %4410 = vmatpush.msra.mxu3 %v7025_v62 }
0x2b72   :  { %4411 = vmatpush.msra.mxu3 %v7031_v31 }
0x2b74   :  { %4412 = vmatpush.msra.mxu3 %v7038_v4 }
0x2be0   :  { %v7230_v51 = vpop.f32.mrf.mxu3 }
0x2be1   :  { %v4084_v26 = vpop.f32.mrf.mxu0 }
0x2be2   :  { %v4087_v20 = vmul.f32 0.35355338, %v4084_v26  ;;  %v5211_v26 = vld [vmem:[%s7368_s19 + $0x2] ss:$0 sm:$0xff] }
0x2be4   :  { %v4088_v6 = vadd.f32 %v7235_v47, %v4087_v20 }
0x2be6   :  { %v4089_v9 = vsel %vm215_vm3, %v4088_v6, -inf }
0x2be7   :  { %4090 = vmax.xlane.f32.xlu0 %v4089_v9 }
0x2be8   :  { %v4058_v27 = vpop.f32.mrf.mxu3 }
0x2be9   :  { %4131 = vmatpush.msra.mxu1 %v4058_v27  ;;  %v4213_v55 = vpop.f32.mrf.mxu0  ;;  %v7466_v27 = vld [vmem:[#allocation6_spill] sm:$0xff] }
0x2bea   :  { %4286 = vmatpush.msrb.mxu2 %v4213_v55  ;;  %v7467_v55 = vld [vmem:[#allocation7_spill] sm:$0xff] }
0x2bec   :  { %4385 = vmatpush.msra.mxu2 %v6987_v53 }
0x2bee   :  { %4386 = vmatpush.msra.mxu2 %v6992_v43 }
0x2bf0   :  { %4387 = vmatpush.msra.mxu2 %v6998_v33  ;;  %v4189_v63 = vpop.f32.mrf.mxu3 }
0x2bf1   :  { %5120 = vmatpush.xpose.msk.msrb.mxu1 %vm215_vm3, %v4189_v63  ;;  %v7468_v63 = vld [vmem:[#allocation8_spill] sm:$0xff] }
0x2bf2   :  { %4388 = vmatpush.msra.mxu2 %v7004_v44 }
0x2c5a   :  { %v4091_v8 = vpop.xlane.xlu0 %4090 }
0x2c5b   :  { %v4092_v52 = vsub.f32 %v4088_v6, %v4091_v8  ;;  %v7465_v6 = vld [vmem:[#allocation5_spill] sm:$0xff]  ;;  %v7470_v8 = vld [vmem:[#allocation10_spill] sm:$0xff] }
0x2c5d   :  { %v4093_v62 = vmul.f32 1.442695, %v4092_v52 }
0x2c5f   :  { %5294 = vpow2.f32 %v4093_v62 }
0x2c65   :  { %v5295_v31 = vpop.eup %5294 }
0x2c66   :  { %v4095_v4 = vsel %vm215_vm3, %v5295_v31, 0.0 }
0x2c67   :  { %4096 = vadd.xlane.f32.xlu0 %v4095_v4 }
0x2cda   :  { %v4097_v25 = vpop.xlane.xlu0 %4096 }
0x2cdb   :  { %5296 = vrcp.f32 %v4097_v25  ;;  %v4109_v60 = vand.u32 2147483648, %v4097_v25  ;;  %v4107_v59 = vand.u32 2147483647, %v4097_v25  ;;  %vm4103_vm4 = vweird.f32 %v4097_v25 }
0x2cdd   :  { %v4110_v44 = vor.u32 1.1754944e-38, %v4109_v60  ;;  %vm4108_vm7 = vcmp.eq.f32.partialorder %v4107_v59, 8.507059e+37  ;;  %v7471_v60 = vld [vmem:[#allocation11_spill] sm:$0xff] }
0x2ce1   :  { %v5297_v53 = vpop.eup %5296 }
0x2ce2   :  { %v4099_v10 = vmul.f32 %v5297_v53, %v4097_v25  ;;  %vm4104_vm1 = vweird.f32 %v5297_v53 }
0x2ce3   :  { %vm4105_vm5 = vmor %vm4103_vm4, %vm4104_vm1 }
0x2ce4   :  { %v4100_v43 = vsub.f32 1.0, %v4099_v10 }
0x2ce6   :  { %v4101_v33 = vmul.f32 %v5297_v53, %v4100_v43 }
0x2ce8   :  { %v4102_v17 = vadd.f32 %v5297_v53, %v4101_v33  ;;  %v7473_v33 = vld [vmem:[#allocation13_spill] sm:$0xff] }
0x2cea   :  { %v4106_v46 = vsel %vm4105_vm5, %v5297_v53, %v4102_v17 }
0x2ceb   :  { %v4111_v12 = vsel %vm4108_vm7, %v4110_v44, %v4106_v46 }
0x2cec   :  { %v4112_v38 = vmul.f32 %v5295_v31, %v4111_v12 }
0x2cee   :  { %5103 = vmatmul.msk.f32.vlgmr.msra.gmra.mxu1 %vm215_vm3, %v4112_v38 }
0x2cef   :  { %4354 = vmatpush.msra.mxu1 %v6945_v37 }
0x2cf1   :  { %4355 = vmatpush.msra.mxu1 %v6954_v19 }
0x2cf3   :  { %4356 = vmatpush.msra.mxu1 %v6960_v58 }
0x2cf5   :  { %4357 = vmatpush.msra.mxu1 %v6967_v48 }
0x2cf6   :  { %5121 = vmatmul.msk.f32.vlgmr.msrb.gmra.mxu1 %vm215_vm3, %v4167_v50 }
0x2cfe   :  { %5130 = vmatmul.msk.f32.vlgmr.msra.gmra.mxu1 %vm143_vm2, %v7182_v54 }
0x2d6b   :  { %v4133_v13 = vpop.f32.mrf.mxu1 }
0x2d6c   :  { %5125 = vmatmul.msk.f32.vlgmr.msra.gmra.mxu0 %vm215_vm3, %v4133_v13 }
0x2d73   :  { %v4239_v23 = vpop.f32.mrf.mxu1 }
0x2d74   :  { %v4242_v37 = vmul.f32 0.35355338, %v4239_v23 }
0x2d76   :  { %v4243_v22 = vadd.f32 %v7235_v47, %v4242_v37 }
0x2d78   :  { %v4244_v19 = vsel %vm215_vm3, %v4243_v22, -inf }
0x2d79   :  { %4245 = vmax.xlane.f32.xlu0 %v4244_v19 }
0x2d7b   :  { %v4359_v11 = vpop.f32.mrf.mxu1 }
0x2d7c   :  { %v4367_v20 = vperm.slane %v4359_v11, 0 }
0x2de9   :  { %v4335_v52 = vpop.f32.mrf.mxu0 }
0x2dec   :  { %v4246_v5 = vpop.xlane.xlu0 %4245 }
0x2ded   :  { %v4247_v58 = vsub.f32 %v4243_v22, %v4246_v5 }
0x2def   :  { %v4248_v15 = vmul.f32 1.442695, %v4247_v58 }
0x2df1   :  { %5298 = vpow2.f32 %v4248_v15  ;;  %v5212_v15 = vld [vmem:[%s7368_s19 + $0x3] ss:$0 sm:$0xff] }
0x2df7   :  { %v5299_v48 = vpop.eup %5298 }
0x2df8   :  { %v4250_v14 = vsel %vm215_vm3, %v5299_v48, 0.0 }
0x2df9   :  { %4251 = vadd.xlane.f32.xlu1 %v4250_v14  ;;  %v4545_v14 = vmul.f32 %v5212_v15, %v7204_v41  ;;  %v5213_v15 = vld [vmem:[%s7372_s23] ss:$0 sm:$0xff]  ;;  %s5350_s23 = smov [#allocation2]  }
0x2dfa   :  { %s4769_s3 = sshll.u32 %s5350_s23, 4  ;;  %s4770_s3 = int_to_ptr.vmem [resolvable:$true] %s4769_s3 }
0x2e6c   :  { %v4252_v28 = vpop.xlane.xlu1 %4251 }
0x2e6d   :  { %5300 = vrcp.f32 %v4252_v28  ;;  %v4264_v40 = vand.u32 2147483648, %v4252_v28  ;;  %v4262_v35 = vand.u32 2147483647, %v4252_v28  ;;  %vm4258_vm9 = vweird.f32 %v4252_v28 }
0x2e6f   :  { %v4265_v24 = vor.u32 1.1754944e-38, %v4264_v40  ;;  %vm4263_vm11 = vcmp.eq.f32.partialorder %v4262_v35, 8.507059e+37 }
0x2e73   :  { %v5301_v7 = vpop.eup %5300 }
0x2e74   :  { %v4254_v21 = vmul.f32 %v5301_v7, %v4252_v28  ;;  %vm4259_vm8 = vweird.f32 %v5301_v7 }
0x2e75   :  { %vm4260_vm10 = vmor %vm4258_vm9, %vm4259_vm8 }
0x2e76   :  { %v4255_v16 = vsub.f32 1.0, %v4254_v21  ;;  %v3904_v21 = vmul.f32 0.17677669, %v7230_v51 }
0x2e78   :  { %v4256_v39 = vmul.f32 %v5301_v7, %v4255_v16 }
0x2e7a   :  { %v4257_v30 = vadd.f32 %v5301_v7, %v4256_v39 }
0x2e7c   :  { %v4261_v42 = vsel %vm4260_vm10, %v5301_v7, %v4257_v30 }
0x2e7d   :  { %v4266_v61 = vsel %vm4263_vm11, %v4265_v24, %v4261_v42 }
0x2e7e   :  { %v4267_v57 = vmul.f32 %v5299_v48, %v4266_v61 }
0x2e80   :  { %5122 = vmatmul.msk.f32.vlgmr.msrb.gmra.mxu2 %vm215_vm3, %v4267_v57 }
0x2e81   :  { %4511 = vmatpush.msrb.mxu2 %v7105_v49  ;;  %v4366_v49 = vmul.f32 %v5211_v26, %v7204_v41 }
0x2e88   :  { %5136 = vmatmul.msk.f32.vlgmr.msra.gmra.mxu2 %vm143_vm2, %v7152_v0 }
0x2f03   :  { %v4288_v32 = vpop.f32.mrf.mxu2 }
0x2f04   :  { %5124 = vmatmul.msk.f32.vlgmr.msrb.gmra.mxu3 %vm215_vm3, %v4288_v32 }
0x2f05   :  { %4533 = vmatpush.msrb.mxu3 %v7044_v29  ;;  %v4368_v29 = vadd.f32 %v4367_v20, %v4366_v49 }
0x2f07   :  { %4534 = vmatpush.msrb.mxu3 %v7050_v34  ;;  %v7469_v34 = vld [vmem:[#allocation9_spill] sm:$0xff] }
0x2f09   :  { %4535 = vmatpush.msrb.mxu3 %v7465_v6 }
0x2f0b   :  { %v4390_v9 = vpop.f32.mrf.mxu2  ;;  %4536 = vmatpush.msrb.mxu3 %v7466_v27 }
0x2f0c   :  { %5141 = vmatmul.msk.f32.vlgmr.msra.gmra.mxu3 %vm143_vm2, %v7152_v0  ;;  %5142 = vmatpush.xpose.msk.msrb.mxu0 %vm215_vm3, %v4390_v9 }
0x2f0f   :  { %5143 = vmatmul.msk.f32.vlgmr.msrb.gmra.mxu0 %vm215_vm3, %v4368_v29 }
0x2f10   :  { %4564 = vmatpush.msra.mxu0 %v7467_v55 }
0x2f12   :  { %4565 = vmatpush.msra.mxu0 %v7468_v63 }
0x2f14   :  { %4566 = vmatpush.msra.mxu0 %v7469_v34  ;;  %5151 = vmatmul.msk.f32.vlgmr.msrb.gmra.mxu3 %vm143_vm2, %v7182_v54  ;;  %v7472_v54 = vld [vmem:[#allocation12_spill] sm:$0xff] }
0x2f16   :  { %4567 = vmatpush.msra.mxu0 %v7470_v8 }
0x2f17   :  { %5157 = vmatmul.msk.f32.vlgmr.msra.gmra.mxu0 %vm143_vm2, %v7152_v0 }
0x2f18   :  { %4690 = vmatpush.msrb.mxu0 %v7174_v1 }
0x2f87   :  { %v4312_v62 = vpop.f32.mrf.mxu3 }
0x2f88   :  { %v4336_v31 = vadd.f32 %v4335_v52, %v4312_v62 }
0x2f8c   :  { %v4440_v4 = vpop.f32.mrf.mxu0 }
0x2f8d   :  { %v4443_v25 = vmul.f32 0.35355338, %v4440_v4 }
0x2f8f   :  { %v4414_v53 = vpop.f32.mrf.mxu3  ;;  %v4444_v10 = vadd.f32 %v7235_v47, %v4443_v25 }
0x2f90   :  { %4487 = vmatpush.msrb.mxu1 %v4414_v53 }
0x2f91   :  { %v4445_v43 = vsel %vm215_vm3, %v4444_v10, -inf }
0x2f92   :  { %4588 = vmatpush.msra.mxu1 %v7471_v60  ;;  %4446 = vmax.xlane.f32.xlu0 %v4445_v43 }
0x2f94   :  { %4589 = vmatpush.msra.mxu1 %v7472_v54  ;;  %v4569_v1 = vpop.f32.mrf.mxu0 }
0x2f95   :  { %5163 = vmatpush.xpose.msk.msra.mxu2 %vm215_vm3, %v4569_v1 }
0x2f96   :  { %4590 = vmatpush.msra.mxu1 %v7473_v33 }
0x2f97   :  { %v4538_v5 = vpop.f32.mrf.mxu3 }
0x2f98   :  { %4591 = vmatpush.msra.mxu1 %v7135_v3  ;;  %v4546_v48 = vperm.slane %v4538_v5, 0 }
0x2f9a   :  { %v4547_v28 = vadd.f32 %v4546_v48, %v4545_v14 }
0x3005   :  { %v4447_v59 = vpop.xlane.xlu0 %4446 }
0x3006   :  { %v4448_v17 = vsub.f32 %v4444_v10, %v4447_v59 }
0x3008   :  { %v4449_v44 = vmul.f32 1.442695, %v4448_v17 }
0x300a   :  { %5302 = vpow2.f32 %v4449_v44 }
0x3010   :  { %v5303_v46 = vpop.eup %5302 }
0x3011   :  { %v4451_v12 = vsel %vm215_vm3, %v5303_v46, 0.0 }
0x3012   :  { %4452 = vadd.xlane.f32.xlu2 %v4451_v12 }
0x3085   :  { %v4453_v38 = vpop.xlane.xlu2 %4452 }
0x3086   :  { %5304 = vrcp.f32 %v4453_v38  ;;  %v4465_v2 = vand.u32 2147483648, %v4453_v38  ;;  %v4463_v13 = vand.u32 2147483647, %v4453_v38  ;;  %vm4459_vm13 = vweird.f32 %v4453_v38 }
0x3087   :  { %5306 = vtanh.f32 %v3904_v21 }
0x3088   :  { %v4466_v3 = vor.u32 1.1754944e-38, %v4465_v2  ;;  %vm4464_vm15 = vcmp.eq.f32.partialorder %v4463_v13, 8.507059e+37 }
0x308c   :  { %v5305_v45 = vpop.eup %5304 }
0x308d   :  { %v4455_v36 = vmul.f32 %v5305_v45, %v4453_v38  ;;  %vm4460_vm12 = vweird.f32 %v5305_v45  ;;  %v5307_v35 = vpop.eup %5306 }
0x308e   :  { %vm4461_vm14 = vmor %vm4459_vm13, %vm4460_vm12  ;;  %v3906_v24 = vmul.f32 10.0, %v5307_v35  ;;  %vm3945_vm12 = vcmask 7168  }
0x308f   :  { %v4456_v18 = vsub.f32 1.0, %v4455_v36  ;;  %v3933_v36 = vlaneseq }
0x3090   :  { %v3907_v41 = vadd.f32 %v3906_v24, %v6935_v56 }
0x3091   :  { %v4457_v50 = vmul.f32 %v5305_v45, %v4456_v18  ;;  %v7318_v18 = vand.u32 127, %v3933_v36 }
0x3092   :  { %v3908_v61 = vsel %vm215_vm3, %v3907_v41, -inf }
0x3093   :  { %v4458_v23 = vadd.f32 %v5305_v45, %v4457_v50  ;;  %v3935_v2 = vcvt.s32.f32 %v7318_v18 }
0x3095   :  { %v4462_v37 = vsel %vm4461_vm14, %v5305_v45, %v4458_v23 }
0x3096   :  { %v4467_v22 = vsel %vm4464_vm15, %v4466_v3, %v4462_v37 }
0x3097   :  { %v4468_v19 = vmul.f32 %v5303_v46, %v4467_v22 }
0x3099   :  { %5144 = vmatmul.msk.f32.vlgmr.msrb.gmra.mxu1 %vm215_vm3, %v4468_v19 }
0x309a   :  { %5168 = vmatpush.xpose.msk.msrb.mxu1 %vm143_vm2, %v7152_v0 }
0x30a1   :  { %5162 = vmatmul.msk.f32.vlgmr.msra.gmra.mxu1 %vm143_vm2, %v7152_v0 }
0x3116   :  { %v4489_v58 = vpop.f32.mrf.mxu1 }
0x3117   :  { %5146 = vmatmul.msk.f32.vlgmr.msrb.gmra.mxu2 %vm215_vm3, %v4489_v58 }
0x311e   :  { %v4593_v7 = vpop.f32.mrf.mxu1 }
0x311f   :  { %5164 = vmatmul.msk.f32.vlgmr.msra.gmra.mxu2 %vm215_vm3, %v4547_v28  ;;  %4666 = vmatpush.msra.mxu3 %v4593_v7 }
0x319a   :  { %v4513_v16 = vpop.f32.mrf.mxu2 }
0x319b   :  { %v7307_v0 = vadd.f32 %v4513_v16, %v4336_v31 }
0x31a2   :  { %v4619_v40 = vpop.f32.mrf.mxu2 }
0x31a3   :  { %v4622_v39 = vmul.f32 0.35355338, %v4619_v40 }
0x31a5   :  { %v4623_v30 = vadd.f32 %v7235_v47, %v4622_v39 }
0x31a7   :  { %v4624_v42 = vsel %vm215_vm3, %v4623_v30, -inf }
0x31a8   :  { %4625 = vmax.xlane.f32.xlu0 %v4624_v42 }
0x31b0   :  { %3909 = vmax.xlane.f32.xlu0 %v3908_v61 }
0x321b   :  { %v4626_v57 = vpop.xlane.xlu0 %4625 }
0x321c   :  { %v4627_v51 = vsub.f32 %v4623_v30, %v4626_v57 }
0x321e   :  { %v4628_v32 = vmul.f32 1.442695, %v4627_v51 }
0x3220   :  { %5308 = vpow2.f32 %v4628_v32 }
0x3223   :  { %v3910_v11 = vpop.xlane.xlu0 %3909 }
0x3224   :  { %v3911_v26 = vsub.f32 %v3907_v41, %v3910_v11 }
0x3226   :  { %v5309_v20 = vpop.eup %5308  ;;  %v3912_v6 = vmul.f32 1.442695, %v3911_v26 }
0x3227   :  { %v4630_v49 = vsel %vm215_vm3, %v5309_v20, 0.0 }
0x3228   :  { %5310 = vpow2.f32 %v3912_v6  ;;  %4631 = vadd.xlane.f32.xlu2 %v4630_v49 }
0x322e   :  { %v5311_v9 = vpop.eup %5310 }
0x322f   :  { %v3914_v27 = vsel %vm215_vm3, %v5311_v9, 0.0 }
0x3230   :  { %3915 = vadd.xlane.f32.xlu0 %v3914_v27 }
0x329b   :  { %v4632_v56 = vpop.xlane.xlu2 %4631 }
0x329c   :  { %5312 = vrcp.f32 %v4632_v56  ;;  %v4644_v8 = vand.u32 2147483648, %v4632_v56  ;;  %v4642_v62 = vand.u32 2147483647, %v4632_v56  ;;  %vm4638_vm0 = vweird.f32 %v4632_v56 }
0x329e   :  { %v4645_v25 = vor.u32 1.1754944e-38, %v4644_v8  ;;  %vm4643_vm4 = vcmp.eq.f32.partialorder %v4642_v62, 8.507059e+37 }
0x32a2   :  { %v5313_v29 = vpop.eup %5312 }
0x32a3   :  { %v4634_v55 = vmul.f32 %v5313_v29, %v4632_v56  ;;  %v3916_v63 = vpop.xlane.xlu0 %3915  ;;  %vm4639_vm6 = vweird.f32 %v5313_v29 }
0x32a4   :  { %5314 = vrcp.f32 %v3916_v63  ;;  %vm4640_vm1 = vmor %vm4638_vm0, %vm4639_vm6  ;;  %v3928_v1 = vand.u32 2147483648, %v3916_v63  ;;  %v3926_v59 = vand.u32 2147483647, %v3916_v63  ;;  %vm3922_vm7 = vweird.f32 %v3916_v63 }
0x32a5   :  { %v4635_v34 = vsub.f32 1.0, %v4634_v55 }
0x32a6   :  { %v3929_v44 = vor.u32 1.1754944e-38, %v3928_v1  ;;  %vm3927_vm9 = vcmp.eq.f32.partialorder %v3926_v59, 8.507059e+37 }
0x32a7   :  { %v4636_v52 = vmul.f32 %v5313_v29, %v4635_v34 }
0x32a9   :  { %v4637_v31 = vadd.f32 %v5313_v29, %v4636_v52 }
0x32aa   :  { %v5315_v4 = vpop.eup %5314 }
0x32ab   :  { %v4641_v53 = vsel %vm4640_vm1, %v5313_v29, %v4637_v31  ;;  %v3918_v10 = vmul.f32 %v5315_v4, %v3916_v63  ;;  %vm3923_vm5 = vweird.f32 %v5315_v4 }
0x32ac   :  { %v4646_v43 = vsel %vm4643_vm4, %v4645_v25, %v4641_v53  ;;  %vm3924_vm8 = vmor %vm3922_vm7, %vm3923_vm5 }
0x32ad   :  { %v4647_v60 = vmul.f32 %v5309_v20, %v4646_v43  ;;  %v3919_v54 = vsub.f32 1.0, %v3918_v10 }
0x32af   :  { %v3920_v33 = vmul.f32 %v5315_v4, %v3919_v54  ;;  %5165 = vmatmul.msk.f32.vlgmr.msra.gmra.mxu3 %vm215_vm3, %v4647_v60 }
0x32b1   :  { %v3921_v17 = vadd.f32 %v5315_v4, %v3920_v33 }
0x32b3   :  { %v3925_v46 = vsel %vm3924_vm8, %v5315_v4, %v3921_v17 }
0x32b4   :  { %v3930_v12 = vsel %vm3927_vm9, %v3929_v44, %v3925_v46 }
0x32b5   :  { %v3931_v38 = vmul.f32 %v5311_v9, %v3930_v12 }
0x32b7   :  { %v3936_v45 = vsel %vm215_vm3, %v3931_v38, -inf  ;;  %3932 = vst.msk [vmem:[#allocation2] sm:$0xff] %vm215_vm3, %v3931_v38 }
0x32b8   :  { %3937 = vmax.xlane.f32.xlu0 %v3936_v45 }
0x332b   :  { %v3938_v50 = vpop.xlane.xlu0 %3937 }
0x332c   :  { %vm3939_vm10 = vcmp.ge.f32.partialorder %v3931_v38, %v3938_v50 }
0x332d   :  { %v3940_v13 = vsel %vm3939_vm10, %v3935_v2, 8.0 }
0x332e   :  { %v3941_v23 = vsel %vm215_vm3, %v3940_v13, inf }
0x332f   :  { %3942 = vmin.xlane.f32.xlu1 %v3941_v23 }
0x3332   :  { %v4668_v3 = vpop.f32.mrf.mxu3 }
0x3333   :  { %5167 = vmatmul.msk.f32.vlgmr.msrb.gmra.mxu0 %vm215_vm3, %v4668_v3 }
0x33a2   :  { %v3943_v37 = vpop.xlane.xlu1 %3942 }
0x33a3   :  { %vm5171_vm11 = vcmp.lt.s32.totalorder %v3943_v37, 0  ;;  %v5172_v22 = vceil.f32 %v3943_v37  ;;  %v5173_v19 = vfloor.f32 %v3943_v37 }
0x33a5   :  { %v5174_v5 = vsel %vm5171_vm11, %v5172_v22, %v5173_v19 }
0x33a6   :  { %v5175_v58 = vcvt.f32.s32 %v5174_v5 }
0x33a8   :  { %3946 = vst.msk [vmem:[%s7374_s25] sm:$0xff] %vm3945_vm12, %v5175_v58 }
0x33b0   :  { %v4692_v48 = vpop.f32.mrf.mxu0 }
0x33b1   :  { %v4695_v14 = vadd.f32 %v4692_v48, %v7307_v0 }
0x33b3   :  { %v4700_v28 = vadd.f32 %v5213_v15, %v4695_v14 }
0x33b5   :  { %5169 = vmatmul.msk.f32.vlgmr.msrb.gmra.mxu1 %vm143_vm2, %v4700_v28 }
0x3432   :  { %v4721_v7 = vpop.f32.mrf.mxu1 }
0x3433   :  { %v4724_v21 = vmul.f32 0.17677669, %v4721_v7 }
0x3435   :  { %5316 = vtanh.f32 %v4724_v21 }
0x343b   :  { %v5317_v16 = vpop.eup %5316 }
0x343c   :  { %v4726_v40 = vmul.f32 10.0, %v5317_v16 }
0x343e   :  { %v4727_v39 = vadd.f32 %v7235_v47, %v4726_v40 }
0x3440   :  { %v4728_v35 = vsel %vm215_vm3, %v4727_v39, -inf }
0x3441   :  { %4729 = vmax.xlane.f32.xlu2 %v4728_v35 }
0x34b4   :  { %v4730_v30 = vpop.xlane.xlu2 %4729 }
0x34b5   :  { %v4731_v24 = vsub.f32 %v4727_v39, %v4730_v30 }
0x34b7   :  { %v4732_v42 = vmul.f32 1.442695, %v4731_v24 }
0x34b9   :  { %5318 = vpow2.f32 %v4732_v42 }
0x34bf   :  { %v5319_v41 = vpop.eup %5318 }
0x34c0   :  { %v4734_v0 = vsel %vm215_vm3, %v5319_v41, 0.0 }
0x34c1   :  { %4735 = vadd.xlane.f32.xlu2 %v4734_v0 }
0x3534   :  { %v4736_v61 = vpop.xlane.xlu2 %4735 }
0x3535   :  { %5320 = vrcp.f32 %v4736_v61  ;;  %v4748_v11 = vand.u32 2147483648, %v4736_v61  ;;  %v4746_v47 = vand.u32 2147483647, %v4736_v61  ;;  %vm4742_vm13 = vweird.f32 %v4736_v61 }
0x3537   :  { %v4749_v6 = vor.u32 1.1754944e-38, %v4748_v11  ;;  %vm4747_vm15 = vcmp.eq.f32.partialorder %v4746_v47, 8.507059e+37 }
0x353b   :  { %v5321_v57 = vpop.eup %5320 }
0x353c   :  { %v4738_v51 = vmul.f32 %v5321_v57, %v4736_v61  ;;  %vm4743_vm2 = vweird.f32 %v5321_v57 }
0x353d   :  { %vm4744_vm14 = vmor %vm4742_vm13, %vm4743_vm2 }
0x353e   :  { %v4739_v32 = vsub.f32 1.0, %v4738_v51 }
0x3540   :  { %v4740_v26 = vmul.f32 %v5321_v57, %v4739_v32 }
0x3542   :  { %v4741_v20 = vadd.f32 %v5321_v57, %v4740_v26 }
0x3544   :  { %v4745_v49 = vsel %vm4744_vm14, %v5321_v57, %v4741_v20 }
0x3545   :  { %v4750_v9 = vsel %vm4747_vm15, %v4749_v6, %v4745_v49 }
0x3546   :  { %v4751_v27 = vmul.f32 %v5319_v41, %v4750_v9 }
0x3548   :  { %v4754_v56 = vsel %vm215_vm3, %v4751_v27, -inf  ;;  %4753 = vst.msk [vmem:[#allocation2 + $0x8] sm:$0xff] %vm215_vm3, %v4751_v27 }
0x3549   :  { %4755 = vmax.xlane.f32.xlu2 %v4754_v56  ;;  %4777 = dma.vmem_to_hbm [thread:$0]  %s4770_s3, 256, %s4772_s15, [#allocation3], %s5351_s16, %s5351_s16, %s5352_s17  }
0x35bc   :  { %v4756_v29 = vpop.xlane.xlu2 %4755 }
0x35bd   :  { %vm4757_vm6 = vcmp.ge.f32.partialorder %v4751_v27, %v4756_v29 }
0x35be   :  { %v4758_v55 = vsel %vm4757_vm6, %v3935_v2, 8.0 }
0x35bf   :  { %v4759_v63 = vsel %vm215_vm3, %v4758_v55, inf }
0x35c0   :  { %4760 = vmin.xlane.f32.xlu0 %v4759_v63 }
0x3633   :  { %v4761_v34 = vpop.xlane.xlu0 %4760 }
0x3634   :  { %vm5176_vm0 = vcmp.lt.s32.totalorder %v4761_v34, 0  ;;  %v5177_v8 = vceil.f32 %v4761_v34  ;;  %v5178_v52 = vfloor.f32 %v4761_v34 }
0x3636   :  { %v5179_v62 = vsel %vm5176_vm0, %v5177_v8, %v5178_v52 }
0x3637   :  { %v5180_v31 = vcvt.f32.s32 %v5179_v62 }
0x3639   :  { %5170 = vst.msk [vmem:[%s7374_s25 + $0x8] sm:$0xff] %vm3945_vm12, %v5180_v31 }
0x363a   :  { %5346 = dma.done.wait [#allocation3], 256  }
0x363b   :  { %5347 = vsyncadd [#allocation3], 4294967040 }
0x363c   :  { %4786 = vsyncpa [#allocation3], 1 }

</bundles_post_ra>
